<compile_context>
chip_gen: v7x
topology: tpu7x:2x2x1
jax: 0.10.0
libtpu: 0.0.40
codegen_flags: <defaults>
</compile_context>

<pallas_src>
import functools

import numpy as np
import jax
import jax.numpy as jnp
from jax.experimental import pallas as pl
from jax.experimental.pallas import tpu as pltpu

BN_EPS = 1e-5


def _hardswish(y):
    # nn.Hardswish: x * relu6(x + 3) / 6
    return y * jnp.clip(y + 3.0, 0.0, 6.0) * (1.0 / 6.0)


# --------------------------------------------------------------------------- #
# Fused MBConv-core kernel:
#   3x3 depthwise conv (+ folded BN, Hardswish)  ->  1x1 pointwise GEMM (+ folded BN, Hardswish)
# One grid step == one batch image; the intermediate never touches HBM.
# --------------------------------------------------------------------------- #
def _mbconv_kernel_factory(stride, Ho, Wo):
    s = stride

    def kernel(ph_ref, wdw_ref, bdw_ref, wpw_ref, bpw_ref, o_ref):
        cin = ph_ref.shape[-1]

        # ---- depthwise 3x3 (stride folded into the phase decomposition), f32 accumulate ----
        acc = jnp.zeros((Ho, Wo, cin), jnp.float32)
        for di in range(3):
            for dj in range(3):
                p = (di % s) * s + (dj % s)              # which spatial phase holds this tap
                oi, oj = di // s, dj // s                # offset inside that phase
                tap = ph_ref[p, pl.ds(oi, Ho), pl.ds(oj, Wo), :].astype(jnp.float32)
                w = wdw_ref[pl.ds(di * 3 + dj, 1), :].astype(jnp.float32)      # (1, cin)
                acc = acc + tap * w                      # VPU FMA, broadcast over (Ho, Wo)
        h = _hardswish(acc + bdw_ref[...])               # BN shift + act (scale folded in w)

        # ---- pointwise 1x1 as one MXU GEMM: (Ho*Wo, Cin) @ (Cin, Cout), f32 accumulate ----
        hm = h.reshape(Ho * Wo, cin).astype(wpw_ref.dtype)          # bf16 operand
        y = jnp.dot(hm, wpw_ref[...], preferred_element_type=jnp.float32)
        y = _hardswish(y + bpw_ref[...])
        o_ref[0] = y.reshape(Ho, Wo, -1).astype(o_ref.dtype)

    return kernel


# --------------------------------------------------------------------------- #
# Module forward (NCHW in / NCHW out, PyTorch convention)
# --------------------------------------------------------------------------- #
def dwc_patch_embed_forward(x_nchw, params, *, stride=1):
    B, C, H, W = x_nchw.shape
    w_dw, w_pw = params["w_dw"], params["w_pw"]          # (C,3,3), (Cout,C)
    Cout = w_pw.shape[0]
    s, k, pad = stride, 3, 1
    Ho = (H + 2 * pad - k) // s + 1
    Wo = (W + 2 * pad - k) // s + 1

    # ---- fold eval-mode BatchNorm into the conv weights / bias (host side) ----
    s1 = params["bn1_gamma"] * jax.lax.rsqrt(params["bn1_var"] + BN_EPS)
    b1 = params["bn1_beta"] - params["bn1_mean"] * s1
    s2 = params["bn2_gamma"] * jax.lax.rsqrt(params["bn2_var"] + BN_EPS)
    b2 = params["bn2_beta"] - params["bn2_mean"] * s2
    wdw_f = (w_dw * s1[:, None, None]).transpose(1, 2, 0).reshape(9, C)   # (9, C) f32, tap-major
    wpw_f = (w_pw * s2[:, None]).T.astype(jnp.bfloat16)                   # (C, Cout) bf16

    # ---- NHWC once at the boundary; bf16 activations for DMA + MXU ----
    x = jnp.transpose(x_nchw, (0, 2, 3, 1)).astype(jnp.bfloat16)
    Hph, Wph = Ho + 2, Wo + 2                 # per-phase padded extent (>= what the taps read)
    Hp, Wp = s * Hph, s * Wph
    xp = jnp.pad(x, ((0, 0), (pad, Hp - H - pad), (pad, Wp - W - pad), (0, 0)))
    if s == 1:
        ph = xp                                                       # (B, Hph, Wph, C), no copy
    else:
        # stride-s conv == unit-stride taps over the s*s spatial phases of the padded input
        ph = jnp.stack([xp[:, pi::s, pj::s, :] for pi in range(s) for pj in range(s)],
                       axis=1).reshape(B * s * s, Hph, Wph, C)

    out_nhwc = pl.pallas_call(
        _mbconv_kernel_factory(s, Ho, Wo),
        out_shape=jax.ShapeDtypeStruct((B, Ho, Wo, Cout), jnp.float32),
        grid_spec=pltpu.PrefetchScalarGridSpec(
            num_scalar_prefetch=0,
            grid=(B,),
            in_specs=[
                # full-extent blocks everywhere: no 128-padding of K/N in HBM
                pl.BlockSpec((s * s, Hph, Wph, C), lambda b: (b, 0, 0, 0)),
                pl.BlockSpec((9, C), lambda b: (0, 0)),
                pl.BlockSpec((1, C), lambda b: (0, 0)),
                pl.BlockSpec((C, Cout), lambda b: (0, 0)),
                pl.BlockSpec((1, Cout), lambda b: (0, 0)),
            ],
            out_specs=pl.BlockSpec((1, Ho, Wo, Cout), lambda b: (b, 0, 0, 0)),
        ),
        compiler_params=pltpu.CompilerParams(
            dimension_semantics=("parallel",)),
    )(ph, wdw_f, b1.reshape(1, C), wpw_f, b2.reshape(1, Cout))

    return jnp.transpose(out_nhwc, (0, 3, 1, 2))          # back to NCHW


# --------------------------------------------------------------------------- #
# Pure-JAX reference (same operand roundings as the kernel, f32 math)
# --------------------------------------------------------------------------- #
def dwc_patch_embed_reference(x_nchw, params, *, stride=1):
    B, C, H, W = x_nchw.shape
    w_dw, w_pw = params["w_dw"], params["w_pw"]
    s, k, pad = stride, 3, 1
    Ho = (H + 2 * pad - k) // s + 1
    Wo = (W + 2 * pad - k) // s + 1
    s1 = params["bn1_gamma"] * jax.lax.rsqrt(params["bn1_var"] + BN_EPS)
    b1 = params["bn1_beta"] - params["bn1_mean"] * s1
    s2 = params["bn2_gamma"] * jax.lax.rsqrt(params["bn2_var"] + BN_EPS)
    b2 = params["bn2_beta"] - params["bn2_mean"] * s2
    wdw_f = (w_dw * s1[:, None, None]).transpose(1, 2, 0).reshape(9, C)
    wpw_f = (w_pw * s2[:, None]).T.astype(jnp.bfloat16).astype(jnp.float32)

    x = jnp.transpose(x_nchw, (0, 2, 3, 1)).astype(jnp.bfloat16).astype(jnp.float32)
    xp = jnp.pad(x, ((0, 0), (pad, pad), (pad, pad), (0, 0)))
    acc = jnp.zeros((B, Ho, Wo, C), jnp.float32)
    for di in range(3):
        for dj in range(3):
            tap = xp[:, di:di + s * (Ho - 1) + 1:s, dj:dj + s * (Wo - 1) + 1:s, :]
            acc = acc + tap * wdw_f[di * 3 + dj]
    h = _hardswish(acc + b1)
    hm = h.astype(jnp.bfloat16).astype(jnp.float32)
    y = jnp.einsum("bhwc,cd->bhwd", hm, wpw_f, precision=jax.lax.Precision.HIGHEST)
    y = _hardswish(y + b2)
    return jnp.transpose(y, (0, 3, 1, 2))


# --------------------------------------------------------------------------- #
# Deterministic synthetic parameters
# --------------------------------------------------------------------------- #
def make_params(key, in_chans, embed_dim):
    k1, k2 = jax.random.split(key)
    return {
        "w_dw": jax.random.normal(k1, (in_chans, 3, 3), jnp.float32) * float(np.sqrt(2.0 / 9.0)),
        "w_pw": jax.random.normal(k2, (embed_dim, in_chans), jnp.float32)
                * float(np.sqrt(2.0 / in_chans)),
        "bn1_gamma": jnp.ones((in_chans,), jnp.float32),
        "bn1_beta": jnp.zeros((in_chans,), jnp.float32),
        "bn1_mean": jnp.zeros((in_chans,), jnp.float32),
        "bn1_var": jnp.ones((in_chans,), jnp.float32),
        "bn2_gamma": jnp.ones((embed_dim,), jnp.float32),
        "bn2_beta": jnp.zeros((embed_dim,), jnp.float32),
        "bn2_mean": jnp.zeros((embed_dim,), jnp.float32),
        "bn2_var": jnp.ones((embed_dim,), jnp.float32),
    }


# --------------------------------------------------------------------------- #
if __name__ == "__main__":
    key = jax.random.PRNGKey(0)
    kp1, kp2, kx = jax.random.split(key, 3)

    B, Cin, H, W = 2, 8, 16, 16
    embed_dim = 32
    x = jax.random.normal(kx, (B, Cin, H, W), jnp.float32)

    # stride=1 (DWCPatchEmbed default: MBConv with downscale=False)
    P1 = make_params(kp1, Cin, embed_dim)
    fwd1 = jax.jit(functools.partial(dwc_patch_embed_forward, stride=1))
    out1 = jax.block_until_ready(fwd1(x, P1))
    assert out1.shape == (B, embed_dim, H, W)
    ref1 = dwc_patch_embed_reference(x, P1, stride=1)
    np.testing.assert_allclose(np.asarray(out1), np.asarray(ref1), rtol=2e-2, atol=2e-2)

    # stride=2 (MBConv with downscale=True)
    P2 = make_params(kp2, Cin, embed_dim)
    fwd2 = jax.jit(functools.partial(dwc_patch_embed_forward, stride=2))
    out2 = jax.block_until_ready(fwd2(x, P2))
    assert out2.shape == (B, embed_dim, H // 2, W // 2)
    ref2 = dwc_patch_embed_reference(x, P2, stride=2)
    np.testing.assert_allclose(np.asarray(out2), np.asarray(ref2), rtol=2e-2, atol=2e-2)

    print("KERNEL_OK")
</pallas_src>

<mosaic_0001>
module attributes {stable_mosaic.version = 11 : i64} {
  func.func @kernel(%arg0: i32, %arg1: memref<1x18x18x8xbf16, #tpu.memory_space<vmem>>, %arg2: memref<9x8xf32, #tpu.memory_space<vmem>>, %arg3: memref<1x8xf32, #tpu.memory_space<vmem>>, %arg4: memref<8x32xbf16, #tpu.memory_space<vmem>>, %arg5: memref<1x32xf32, #tpu.memory_space<vmem>>, %arg6: memref<1x16x16x32xf32, #tpu.memory_space<vmem>>) attributes {dimension_semantics = [#tpu.dimension_semantics<parallel>], iteration_bounds = array<i64: 2>, scalar_prefetch = 0 : i64, scratch_operands = 0 : i64, tpu.core_type = #tpu.core_type<tc>, window_params = [{transform_indices = @transform_0, window_bounds = array<i64: 1, 18, 18, 8>}, {pipeline_mode = #tpu.pipeline_mode<synchronous>, transform_indices = @transform_1, window_bounds = array<i64: 9, 8>}, {pipeline_mode = #tpu.pipeline_mode<synchronous>, transform_indices = @transform_2, window_bounds = array<i64: 1, 8>}, {pipeline_mode = #tpu.pipeline_mode<synchronous>, transform_indices = @transform_3, window_bounds = array<i64: 8, 32>}, {pipeline_mode = #tpu.pipeline_mode<synchronous>, transform_indices = @transform_4, window_bounds = array<i64: 1, 32>}, {transform_indices = @transform_5, window_bounds = array<i64: 1, 16, 16, 32>}]} {
    %cst = arith.constant 0.000000e+00 : f32
    %0 = vector.broadcast %cst : f32 to vector<16x16x8xf32>
    %c0 = arith.constant 0 : index
    %c0_0 = arith.constant 0 : index
    %c0_1 = arith.constant 0 : index
    %c0_2 = arith.constant 0 : index
    %1 = vector.load %arg1[%c0, %c0_0, %c0_1, %c0_2] : memref<1x18x18x8xbf16, #tpu.memory_space<vmem>>, vector<1x16x16x8xbf16>
    %2 = vector.shape_cast %1 : vector<1x16x16x8xbf16> to vector<16x16x8xbf16>
    %3 = arith.extf %2 : vector<16x16x8xbf16> to vector<16x16x8xf32>
    %c0_3 = arith.constant 0 : index
    %c0_4 = arith.constant 0 : index
    %4 = vector.load %arg2[%c0_3, %c0_4] : memref<9x8xf32, #tpu.memory_space<vmem>>, vector<1x8xf32>
    %5 = vector.shape_cast %4 : vector<1x8xf32> to vector<1x1x8xf32>
    %6 = vector.broadcast %5 : vector<1x1x8xf32> to vector<16x16x8xf32>
    %7 = arith.mulf %3, %6 : vector<16x16x8xf32>
    %8 = arith.addf %0, %7 : vector<16x16x8xf32>
    %c0_5 = arith.constant 0 : index
    %c0_6 = arith.constant 0 : index
    %c1 = arith.constant 1 : index
    %c0_7 = arith.constant 0 : index
    %9 = vector.load %arg1[%c0_5, %c0_6, %c1, %c0_7] : memref<1x18x18x8xbf16, #tpu.memory_space<vmem>>, vector<1x16x16x8xbf16>
    %10 = vector.shape_cast %9 : vector<1x16x16x8xbf16> to vector<16x16x8xbf16>
    %11 = arith.extf %10 : vector<16x16x8xbf16> to vector<16x16x8xf32>
    %c1_8 = arith.constant 1 : index
    %c0_9 = arith.constant 0 : index
    %12 = vector.load %arg2[%c1_8, %c0_9] : memref<9x8xf32, #tpu.memory_space<vmem>>, vector<1x8xf32>
    %13 = vector.shape_cast %12 : vector<1x8xf32> to vector<1x1x8xf32>
    %14 = vector.broadcast %13 : vector<1x1x8xf32> to vector<16x16x8xf32>
    %15 = arith.mulf %11, %14 : vector<16x16x8xf32>
    %16 = arith.addf %8, %15 : vector<16x16x8xf32>
    %c0_10 = arith.constant 0 : index
    %c0_11 = arith.constant 0 : index
    %c2 = arith.constant 2 : index
    %c0_12 = arith.constant 0 : index
    %17 = vector.load %arg1[%c0_10, %c0_11, %c2, %c0_12] : memref<1x18x18x8xbf16, #tpu.memory_space<vmem>>, vector<1x16x16x8xbf16>
    %18 = vector.shape_cast %17 : vector<1x16x16x8xbf16> to vector<16x16x8xbf16>
    %19 = arith.extf %18 : vector<16x16x8xbf16> to vector<16x16x8xf32>
    %c2_13 = arith.constant 2 : index
    %c0_14 = arith.constant 0 : index
    %20 = vector.load %arg2[%c2_13, %c0_14] : memref<9x8xf32, #tpu.memory_space<vmem>>, vector<1x8xf32>
    %21 = vector.shape_cast %20 : vector<1x8xf32> to vector<1x1x8xf32>
    %22 = vector.broadcast %21 : vector<1x1x8xf32> to vector<16x16x8xf32>
    %23 = arith.mulf %19, %22 : vector<16x16x8xf32>
    %24 = arith.addf %16, %23 : vector<16x16x8xf32>
    %c0_15 = arith.constant 0 : index
    %c1_16 = arith.constant 1 : index
    %c0_17 = arith.constant 0 : index
    %c0_18 = arith.constant 0 : index
    %25 = vector.load %arg1[%c0_15, %c1_16, %c0_17, %c0_18] : memref<1x18x18x8xbf16, #tpu.memory_space<vmem>>, vector<1x16x16x8xbf16>
    %26 = vector.shape_cast %25 : vector<1x16x16x8xbf16> to vector<16x16x8xbf16>
    %27 = arith.extf %26 : vector<16x16x8xbf16> to vector<16x16x8xf32>
    %c3 = arith.constant 3 : index
    %c0_19 = arith.constant 0 : index
    %28 = vector.load %arg2[%c3, %c0_19] : memref<9x8xf32, #tpu.memory_space<vmem>>, vector<1x8xf32>
    %29 = vector.shape_cast %28 : vector<1x8xf32> to vector<1x1x8xf32>
    %30 = vector.broadcast %29 : vector<1x1x8xf32> to vector<16x16x8xf32>
    %31 = arith.mulf %27, %30 : vector<16x16x8xf32>
    %32 = arith.addf %24, %31 : vector<16x16x8xf32>
    %c0_20 = arith.constant 0 : index
    %c1_21 = arith.constant 1 : index
    %c1_22 = arith.constant 1 : index
    %c0_23 = arith.constant 0 : index
    %33 = vector.load %arg1[%c0_20, %c1_21, %c1_22, %c0_23] : memref<1x18x18x8xbf16, #tpu.memory_space<vmem>>, vector<1x16x16x8xbf16>
    %34 = vector.shape_cast %33 : vector<1x16x16x8xbf16> to vector<16x16x8xbf16>
    %35 = arith.extf %34 : vector<16x16x8xbf16> to vector<16x16x8xf32>
    %c4 = arith.constant 4 : index
    %c0_24 = arith.constant 0 : index
    %36 = vector.load %arg2[%c4, %c0_24] : memref<9x8xf32, #tpu.memory_space<vmem>>, vector<1x8xf32>
    %37 = vector.shape_cast %36 : vector<1x8xf32> to vector<1x1x8xf32>
    %38 = vector.broadcast %37 : vector<1x1x8xf32> to vector<16x16x8xf32>
    %39 = arith.mulf %35, %38 : vector<16x16x8xf32>
    %40 = arith.addf %32, %39 : vector<16x16x8xf32>
    %c0_25 = arith.constant 0 : index
    %c1_26 = arith.constant 1 : index
    %c2_27 = arith.constant 2 : index
    %c0_28 = arith.constant 0 : index
    %41 = vector.load %arg1[%c0_25, %c1_26, %c2_27, %c0_28] : memref<1x18x18x8xbf16, #tpu.memory_space<vmem>>, vector<1x16x16x8xbf16>
    %42 = vector.shape_cast %41 : vector<1x16x16x8xbf16> to vector<16x16x8xbf16>
    %43 = arith.extf %42 : vector<16x16x8xbf16> to vector<16x16x8xf32>
    %c5 = arith.constant 5 : index
    %c0_29 = arith.constant 0 : index
    %44 = vector.load %arg2[%c5, %c0_29] : memref<9x8xf32, #tpu.memory_space<vmem>>, vector<1x8xf32>
    %45 = vector.shape_cast %44 : vector<1x8xf32> to vector<1x1x8xf32>
    %46 = vector.broadcast %45 : vector<1x1x8xf32> to vector<16x16x8xf32>
    %47 = arith.mulf %43, %46 : vector<16x16x8xf32>
    %48 = arith.addf %40, %47 : vector<16x16x8xf32>
    %c0_30 = arith.constant 0 : index
    %c2_31 = arith.constant 2 : index
    %c0_32 = arith.constant 0 : index
    %c0_33 = arith.constant 0 : index
    %49 = vector.load %arg1[%c0_30, %c2_31, %c0_32, %c0_33] : memref<1x18x18x8xbf16, #tpu.memory_space<vmem>>, vector<1x16x16x8xbf16>
    %50 = vector.shape_cast %49 : vector<1x16x16x8xbf16> to vector<16x16x8xbf16>
    %51 = arith.extf %50 : vector<16x16x8xbf16> to vector<16x16x8xf32>
    %c6 = arith.constant 6 : index
    %c0_34 = arith.constant 0 : index
    %52 = vector.load %arg2[%c6, %c0_34] : memref<9x8xf32, #tpu.memory_space<vmem>>, vector<1x8xf32>
    %53 = vector.shape_cast %52 : vector<1x8xf32> to vector<1x1x8xf32>
    %54 = vector.broadcast %53 : vector<1x1x8xf32> to vector<16x16x8xf32>
    %55 = arith.mulf %51, %54 : vector<16x16x8xf32>
    %56 = arith.addf %48, %55 : vector<16x16x8xf32>
    %c0_35 = arith.constant 0 : index
    %c2_36 = arith.constant 2 : index
    %c1_37 = arith.constant 1 : index
    %c0_38 = arith.constant 0 : index
    %57 = vector.load %arg1[%c0_35, %c2_36, %c1_37, %c0_38] : memref<1x18x18x8xbf16, #tpu.memory_space<vmem>>, vector<1x16x16x8xbf16>
    %58 = vector.shape_cast %57 : vector<1x16x16x8xbf16> to vector<16x16x8xbf16>
    %59 = arith.extf %58 : vector<16x16x8xbf16> to vector<16x16x8xf32>
    %c7 = arith.constant 7 : index
    %c0_39 = arith.constant 0 : index
    %60 = vector.load %arg2[%c7, %c0_39] : memref<9x8xf32, #tpu.memory_space<vmem>>, vector<1x8xf32>
    %61 = vector.shape_cast %60 : vector<1x8xf32> to vector<1x1x8xf32>
    %62 = vector.broadcast %61 : vector<1x1x8xf32> to vector<16x16x8xf32>
    %63 = arith.mulf %59, %62 : vector<16x16x8xf32>
    %64 = arith.addf %56, %63 : vector<16x16x8xf32>
    %c0_40 = arith.constant 0 : index
    %c2_41 = arith.constant 2 : index
    %c2_42 = arith.constant 2 : index
    %c0_43 = arith.constant 0 : index
    %65 = vector.load %arg1[%c0_40, %c2_41, %c2_42, %c0_43] : memref<1x18x18x8xbf16, #tpu.memory_space<vmem>>, vector<1x16x16x8xbf16>
    %66 = vector.shape_cast %65 : vector<1x16x16x8xbf16> to vector<16x16x8xbf16>
    %67 = arith.extf %66 : vector<16x16x8xbf16> to vector<16x16x8xf32>
    %c8 = arith.constant 8 : index
    %c0_44 = arith.constant 0 : index
    %68 = vector.load %arg2[%c8, %c0_44] : memref<9x8xf32, #tpu.memory_space<vmem>>, vector<1x8xf32>
    %69 = vector.shape_cast %68 : vector<1x8xf32> to vector<1x1x8xf32>
    %70 = vector.broadcast %69 : vector<1x1x8xf32> to vector<16x16x8xf32>
    %71 = arith.mulf %67, %70 : vector<16x16x8xf32>
    %72 = arith.addf %64, %71 : vector<16x16x8xf32>
    %c0_45 = arith.constant 0 : index
    %c0_46 = arith.constant 0 : index
    %73 = vector.load %arg3[%c0_45, %c0_46] : memref<1x8xf32, #tpu.memory_space<vmem>>, vector<1x8xf32>
    %74 = vector.shape_cast %73 : vector<1x8xf32> to vector<1x1x8xf32>
    %75 = vector.broadcast %74 : vector<1x1x8xf32> to vector<16x16x8xf32>
    %76 = arith.addf %72, %75 : vector<16x16x8xf32>
    %cst_47 = arith.constant 3.000000e+00 : f32
    %77 = vector.broadcast %cst_47 : f32 to vector<16x16x8xf32>
    %78 = arith.addf %76, %77 : vector<16x16x8xf32>
    %cst_48 = arith.constant 0.000000e+00 : f32
    %cst_49 = arith.constant 6.000000e+00 : f32
    %79 = vector.broadcast %cst_48 : f32 to vector<16x16x8xf32>
    %80 = arith.maximumf %79, %78 : vector<16x16x8xf32>
    %81 = vector.broadcast %cst_49 : f32 to vector<16x16x8xf32>
    %82 = arith.minimumf %81, %80 : vector<16x16x8xf32>
    %83 = arith.mulf %76, %82 : vector<16x16x8xf32>
    %cst_50 = arith.constant 0.166666672 : f32
    %84 = vector.broadcast %cst_50 : f32 to vector<16x16x8xf32>
    %85 = arith.mulf %83, %84 : vector<16x16x8xf32>
    %86 = vector.shape_cast %85 : vector<16x16x8xf32> to vector<256x8xf32>
    %87 = arith.truncf %86 : vector<256x8xf32> to vector<256x8xbf16>
    %c0_51 = arith.constant 0 : index
    %c0_52 = arith.constant 0 : index
    %88 = vector.load %arg4[%c0_51, %c0_52] : memref<8x32xbf16, #tpu.memory_space<vmem>>, vector<8x32xbf16>
    %cst_53 = arith.constant dense<0.000000e+00> : vector<256x32xf32>
    %89 = tpu.matmul %87, %88, %cst_53 {dimension_numbers = #tpu.dot_dimension_numbers<[1], [0], [0], [1], [0, 0, 1, 1], [], []>} : vector<256x8xbf16>, vector<8x32xbf16>, vector<256x32xf32> -> vector<256x32xf32>
    %c0_54 = arith.constant 0 : index
    %c0_55 = arith.constant 0 : index
    %90 = vector.load %arg5[%c0_54, %c0_55] : memref<1x32xf32, #tpu.memory_space<vmem>>, vector<1x32xf32>
    %91 = vector.broadcast %90 : vector<1x32xf32> to vector<256x32xf32>
    %92 = arith.addf %89, %91 : vector<256x32xf32>
    %cst_56 = arith.constant 3.000000e+00 : f32
    %93 = vector.broadcast %cst_56 : f32 to vector<256x32xf32>
    %94 = arith.addf %92, %93 : vector<256x32xf32>
    %cst_57 = arith.constant 0.000000e+00 : f32
    %cst_58 = arith.constant 6.000000e+00 : f32
    %95 = vector.broadcast %cst_57 : f32 to vector<256x32xf32>
    %96 = arith.maximumf %95, %94 : vector<256x32xf32>
    %97 = vector.broadcast %cst_58 : f32 to vector<256x32xf32>
    %98 = arith.minimumf %97, %96 : vector<256x32xf32>
    %99 = arith.mulf %92, %98 : vector<256x32xf32>
    %cst_59 = arith.constant 0.166666672 : f32
    %100 = vector.broadcast %cst_59 : f32 to vector<256x32xf32>
    %101 = arith.mulf %99, %100 : vector<256x32xf32>
    %102 = vector.shape_cast %101 : vector<256x32xf32> to vector<16x16x32xf32>
    %c0_60 = arith.constant 0 : index
    %c0_61 = arith.constant 0 : index
    %c0_62 = arith.constant 0 : index
    %c0_63 = arith.constant 0 : index
    %103 = vector.load %arg6[%c0_60, %c0_61, %c0_62, %c0_63] : memref<1x16x16x32xf32, #tpu.memory_space<vmem>>, vector<1x16x16x32xf32>
    %104 = vector.shape_cast %103 : vector<1x16x16x32xf32> to vector<16x16x32xf32>
    %105 = vector.shape_cast %102 : vector<16x16x32xf32> to vector<1x16x16x32xf32>
    tpu.vector_store %arg6[%c0_60, %c0_61, %c0_62, %c0_63], %105 {strides = array<i32>} : memref<1x16x16x32xf32, #tpu.memory_space<vmem>>, vector<1x16x16x32xf32>,
    return
  }
  func.func @transform_0(%arg0: i32) -> (i32, i32, i32, i32) {
    %c0_i32 = arith.constant 0 : i32
    %c0_i32_0 = arith.constant 0 : i32
    %c0_i32_1 = arith.constant 0 : i32
    %c0_i32_2 = arith.constant 0 : i32
    return %arg0, %c0_i32, %c0_i32_0, %c0_i32_1 : i32, i32, i32, i32
  }
  func.func @transform_1(%arg0: i32) -> (i32, i32) {
    %c0_i32 = arith.constant 0 : i32
    %c0_i32_0 = arith.constant 0 : i32
    %c0_i32_1 = arith.constant 0 : i32
    return %c0_i32, %c0_i32_0 : i32, i32
  }
  func.func @transform_2(%arg0: i32) -> (i32, i32) {
    %c0_i32 = arith.constant 0 : i32
    %c0_i32_0 = arith.constant 0 : i32
    %c0_i32_1 = arith.constant 0 : i32
    return %c0_i32, %c0_i32_0 : i32, i32
  }
  func.func @transform_3(%arg0: i32) -> (i32, i32) {
    %c0_i32 = arith.constant 0 : i32
    %c0_i32_0 = arith.constant 0 : i32
    %c0_i32_1 = arith.constant 0 : i32
    return %c0_i32, %c0_i32_0 : i32, i32
  }
  func.func @transform_4(%arg0: i32) -> (i32, i32) {
    %c0_i32 = arith.constant 0 : i32
    %c0_i32_0 = arith.constant 0 : i32
    %c0_i32_1 = arith.constant 0 : i32
    return %c0_i32, %c0_i32_0 : i32, i32
  }
  func.func @transform_5(%arg0: i32) -> (i32, i32, i32, i32) {
    %c0_i32 = arith.constant 0 : i32
    %c0_i32_0 = arith.constant 0 : i32
    %c0_i32_1 = arith.constant 0 : i32
    %c0_i32_2 = arith.constant 0 : i32
    return %arg0, %c0_i32, %c0_i32_0, %c0_i32_1 : i32, i32, i32, i32
  }
}

</mosaic_0001>

<bundles_post_ra>
// kernel: dwc_patch_embed_forward.1
= control target key start
LH: loop header
LB: loop body
LE: loop exit
PB: predicated region body
PF: predicated region fallthrough
CT: control target
= control target key end

     0   :  { %10 = vsyncpa [#allocation3], 0  ;;  %s4795_s0 = inlined_call_operand.vmem [shape: bf16[2,18,18,8], index: 0, kind: input, shape index: {}]   ;;  %s4796_s1 = inlined_call_operand.vmem [shape: f32[9,8], index: 1, kind: input, shape index: {}]   ;;  %s4797_s2 = inlined_call_operand.vmem [shape: f32[1,8], index: 2, kind: input, shape index: {}]   ;;  %s4798_s3 = inlined_call_operand.vmem [shape: bf16[8,32], index: 3, kind: input, shape index: {}]   ;;  %s4799_s4 = inlined_call_operand.vmem [shape: f32[1,32], index: 4, kind: input, shape index: {}]   ;;  %s4800_s5 = inlined_call_operand.hbm [shape: f32[2,16,16,32], index: 5, kind: output, shape index: {}]  }
   0x1   :  { %12 = vsyncpa [#allocation3 + $0x1], 0  ;;  %s3504_s18 = smov 0   ;;  %s3506_s19 = smov 0  }
   0x2   :  { %s3508_s20 = smov 0   ;;  %s3510_s21 = smov 0  }
   0x3 LB: > { %s3525_s22 = sadd.s32 4294967295, %s3469_s21   ;;  %s2995_s23 = sadd.s32 4294967294, %s3469_s21   ;;  %s3469_s21 = sphi %s3510_s21, %s4806_s21   ;;  %s3465_s20 = sphi %s3508_s20, %s4805_s20   ;;  %s3461_s19 = sphi %s3506_s19, %s4804_s19   ;;  %s3457_s18 = sphi %s3504_s18, %s4803_s18  }
   0x4   : > { %s3529_s24 = sadd.s32 1, %s3469_s21   ;;  %s135_s25 = sadd.s32 1, %s3465_s20 }
   0x5   : > { %s132_s26 = ssub.s32 %s3469_s21, %s3529_s24  ;;  %p145_p0 = scmp.ne.s32.totalorder %s3465_s20, %s3461_s19 }
   0x6   : > { %p133_p1 = scmp.eq.s32.totalorder %s132_s26, 0  ;;  %p146_p2 = scmp.eq.s32.totalorder %s3525_s22, 1 }
   0x7   : > { %p151_p3 = scmp.ne.s32.totalorder %s3461_s19, %s3457_s18  ;;  %p152_p4 = scmp.eq.s32.totalorder %s2995_s23, 1 }
   0x8   : > { %s3540_s27 = scalar_select %p133_p1, %s3465_s20, %s135_s25  }
   0x9   : > { %p3542_p5 = por %p146_p2, %p145_p0  ;;  %p3546_p6 = por %p152_p4, %p151_p3 }
   0xa   : > { %p2998_p7 = scmp.ge.s32.totalorder %s3469_s21, 1  ;;  %p190_p8 = scmp.lt.s32.totalorder %s3469_s21, 3 }
   0xc   : > { %p191_p9 = pnand %p2998_p7, %p190_p8 }
   0xd   : > { %v2504_v0 = vld [vmem:[%s4798_s3] sm:$0xf] (!%p191_p9)  ;;  %vm2561_vm0 = vcmask (!%p191_p9), 1043456   ;;  %p218_p10 = scmp.lt.s32.totalorder (!%p191_p9), %s3525_s22, 1  ;;  %vm490_vm1 = vcmask (!%p191_p9), 1046528   ;;  %vm768_vm2 = vcmask (!%p191_p9), 1045504  }
   0xe   : > { %194 = sbr.rel (%p191_p9) target bundleno = 657 (0x291), region = 40  ;;  %3334 = vmatprep.subr.msk.bf16.mxu0 (!%p191_p9), %vm2561_vm0, %v2504_v0  ;;  %3335 = vmatprep.subr.msk.bf16.mxu1 (!%p191_p9), %vm2561_vm0, %v2504_v0  ;;  %v2563_v1 = vsel (!%p191_p9), %vm2561_vm0, %v2504_v0, 0  ;;  %v3560_v2 = vld [vmem:[%s4796_s1] ss:$0 sm:$0xff] (!%p191_p9)  ;;  %v3570_v3 = vld [vmem:[%s4796_s1 + $0x1] ss:$0 sm:$0xff] (!%p191_p9) }
   0xf   : > { %3299 = vmatpush3.bf16.msra.mxu0 (!%p191_p9), %v2563_v1  ;;  %3333 = vmatpush3.bf16.msra.mxu1 (!%p191_p9), %v2563_v1  ;;  %v3575_v4 = vld [vmem:[%s4796_s1 + $0x2] ss:$0 sm:$0xff] (!%p191_p9)  ;;  %v3586_v17 = vld [vmem:[%s4796_s1 + $0x3] ss:$0 sm:$0xff] (!%p191_p9)  ;;  %v3599_v28 = vld [vmem:[%s4796_s1 + $0x4] ss:$0 sm:$0xff] (!%p191_p9) }
  0x10   : > { %v3610_v41 = vld [vmem:[%s4796_s1 + $0x5] ss:$0 sm:$0xff] (!%p191_p9)  ;;  %v3622_v55 = vld [vmem:[%s4796_s1 + $0x6] ss:$0 sm:$0xff] (!%p191_p9)  ;;  %v3632_v61 = vld [vmem:[%s4796_s1 + $0x7] ss:$0 sm:$0xff] (!%p191_p9) }
  0x11   : > { %vm2512_vm3 = vcmask (!%p191_p9), 64512   ;;  %vm2886_vm4 = vcmask (!%p191_p9), 261120   ;;  %s215_s14 = sand.u32 (!%p191_p9), 1, %s3461_s19   ;;  %s3161_s25 = sshll.u32 (!%p191_p9), %s3525_s22, 12 }
  0x12   : > { %s2999_s15 = sshll.u32 (!%p191_p9), %s215_s14, 8  ;;  %s3471_s9 = smov (!%p191_p9), [#allocation2]  }
  0x13   : > { %s4648_s23 = scalar_lea.vmem (!%p191_p9), [#allocation2], %s2999_s15  ;;  %s3411_s10 = sshll.u32 (!%p191_p9), %s3471_s9, 4  ;;  %s3412_s10 = int_to_ptr.vmem [resolvable:$false] %s3411_s10 }
  0x14   : > { %s2933_s26 = sshll.u32 (!%p191_p9), %s4648_s23, 4  ;;  %s3413_s11 = scalar_lea.vmem (!%p191_p9), %s3412_s10, 8192  ;;  %s4744_s26 = int_to_ptr.vmem [resolvable:$true] %s2933_s26 }
  0x15   : > { %s219_s7 = scalar_select %p218_p10, %s3525_s22, 1 }
  0x16   : > { %s4754_s22 = scalar_lea.sflag [#allocation3], %s215_s14  ;;  %p3414_p0 = scmp.lt.s32.totalorder %s4744_s26, %s3412_s10 }
  0x17   : > { %s3336_s8 = smul.u32 216, %s219_s7  ;;  %s4742_s7 = scalar_lea.hbm %s4800_s5, %s3161_s25 }
  0x19   : > { %s3565_s13 = scalar_lea.vmem %s4795_s0, %s3336_s8  ;;  %s3407_s8 = scalar_lea.vmem %s4744_s26, 4096 }
  0x1a   : > { %v3163_v5 = vld [vmem:[%s3565_s13] sm:$0xff]   ;;  %v357_v6 = vld [vmem:[%s3565_s13 + $0x8] sm:$0x1]  ;;  %v3004_v12 = vld [vmem:[%s3565_s13 + $0xc] sm:$0xff]   ;;  %p3408_p11 = scmp.ne.s32.totalorder %s4744_s26, %s3407_s8  ;;  %p3415_p1 = scmp.lt.s32.totalorder %s3413_s11, %s3407_s8 }
  0x1b   : > { %v635_v7 = vld [vmem:[%s3565_s13] sm:$0xe]  ;;  %v3164_v8 = vunpack.c.l.bf16 %v3163_v5  ;;  %v3165_v9 = vunpack.c.h.bf16 %v3163_v5  ;;  %v373_v10 = vunpack.c.l.bf16 %v357_v6  ;;  %v3037_v13 = vld [vmem:[%s3565_s13 + $0x14] sm:$0x1]  ;;  %v3054_v14 = vld [vmem:[%s3565_s13 + $0xc] sm:$0xe]  ;;  %v946_v15 = vunpack.c.l.bf16 %v3004_v12 }
  0x1c   : > { %v651_v11 = vunpack.c.l.bf16 %v635_v7  ;;  %v947_v16 = vunpack.c.h.bf16 %v3004_v12  ;;  %v1063_v18 = vunpack.c.l.bf16 %v3037_v13  ;;  %v1340_v19 = vunpack.c.l.bf16 %v3054_v14  ;;  %v3273_v46 = vld [vmem:[%s3565_s13 + $0x18] sm:$0xff]   ;;  %v3104_v56 = vld [vmem:[%s3565_s13 + $0x20] sm:$0x1]  ;;  %p3409_p12 = pnand %p3408_p11, %p3542_p5  ;;  %p3416_p2 = por %p3415_p1, %p3414_p0 }
  0x1d   : > { %v293_v20 = vmul.f32 %v3164_v8, %v3560_v2  ;;  %v294_v21 = vmul.f32 %v3165_v9, %v3560_v2  ;;  %v394_v22 = vmul.f32 %v3164_v8, %v3570_v3  ;;  %v395_v23 = vmul.f32 %v3165_v9, %v3570_v3 }
  0x1e   : > { %v396_v24 = vmul.f32 %v3570_v3, %v373_v10  ;;  %v672_v25 = vmul.f32 %v3575_v4, %v651_v11  ;;  %v673_v26 = vmul.f32 %v3165_v9, %v3575_v4  ;;  %v674_v27 = vmul.f32 %v3575_v4, %v373_v10  ;;  %v3121_v9 = vld [vmem:[%s3565_s13 + $0x18] sm:$0xe]  ;;  %v3642_v10 = vld [vmem:[%s4796_s1 + $0x8] ss:$0 sm:$0xff]  ;;  %p3410_p13 = pneg %p3409_p12 }
  0x1f   : > { %v491_v29 = vrot.slane %v394_v22, 1  ;;  %v492_v30 = vrot.slane %v395_v23, 1  ;;  %v983_v31 = vmul.f32 %v3586_v17, %v946_v15  ;;  %v984_v32 = vmul.f32 %v3586_v17, %v947_v16 }
  0x20   : > { %v494_v33 = vrot.slane %v396_v24, 1  ;;  %v769_v34 = vrot.slane %v672_v25, 2  ;;  %v770_v35 = vrot.slane %v673_v26, 2  ;;  %v772_v36 = vrot.slane %v674_v27, 2  ;;  %p3417_p3 = pnand %p3416_p2, %p3410_p13 }
  0x21   : > { %v493_v37 = vsel %vm490_vm1, %v491_v29, %v492_v30  ;;  %v1084_v38 = vmul.f32 %v3599_v28, %v946_v15  ;;  %v1085_v39 = vmul.f32 %v3599_v28, %v947_v16  ;;  %v1086_v40 = vmul.f32 %v3599_v28, %v1063_v18 }
  0x22   : > { %v495_v42 = vsel %vm490_vm1, %v492_v30, %v494_v33  ;;  %v603_v43 = vadd.f32 %v493_v37, %v293_v20  ;;  %v771_v44 = vsel %vm768_vm2, %v769_v34, %v770_v35  ;;  %v773_v45 = vsel %vm768_vm2, %v770_v35, %v772_v36  ;;  %v3261_v20 = vld [vmem:[%s3565_s13 + $0x60] sm:$0xff]   ;;  %v365_v34 = vld [vmem:[%s3565_s13 + $0x68] sm:$0x1] }
  0x23   : > { %v604_v47 = vadd.f32 %v495_v42, %v294_v21  ;;  %v1180_v48 = vrot.slane %v1084_v38, 1  ;;  %v1181_v49 = vrot.slane %v1085_v39, 1  ;;  %v1183_v50 = vrot.slane %v1086_v40, 1  ;;  %v643_v39 = vld [vmem:[%s3565_s13 + $0x60] sm:$0xe] }
  0x24   : > { %v881_v51 = vadd.f32 %v771_v44, %v603_v43  ;;  %v1361_v52 = vmul.f32 %v3610_v41, %v1340_v19  ;;  %v1362_v53 = vmul.f32 %v3610_v41, %v947_v16  ;;  %v1363_v54 = vmul.f32 %v3610_v41, %v1063_v18 }
  0x25   : > { %v882_v57 = vadd.f32 %v773_v45, %v604_v47  ;;  %v1182_v58 = vsel %vm490_vm1, %v1180_v48, %v1181_v49  ;;  %v1184_v59 = vsel %vm490_vm1, %v1181_v49, %v1183_v50  ;;  %v3627_v60 = vunpack.c.l.bf16 %v3273_v46  ;;  %v3669_v50 = vld [vmem:[%s4797_s2] ss:$0 sm:$0xff] }
  0x26   : > { %v1015_v62 = vadd.f32 %v983_v31, %v881_v51  ;;  %v1457_v63 = vrot.slane %v1361_v52, 2  ;;  %v1458_v0 = vrot.slane %v1362_v53, 2  ;;  %v1460_v1 = vrot.slane %v1363_v54, 2  ;;  %v3020_v54 = vld [vmem:[%s3565_s13 + $0x6c] sm:$0xff]  }
  0x27   : > { %v1016_v5 = vadd.f32 %v984_v32, %v882_v57  ;;  %v3634_v6 = vunpack.c.h.bf16 %v3273_v46  ;;  %v1671_v7 = vmul.f32 %v3627_v60, %v3622_v55  ;;  %v1751_v8 = vunpack.c.l.bf16 %v3104_v56 }
  0x28   : > { %v1292_v11 = vadd.f32 %v1182_v58, %v1015_v62  ;;  %v1459_v12 = vsel %vm768_vm2, %v1457_v63, %v1458_v0  ;;  %v1461_v13 = vsel %vm768_vm2, %v1458_v0, %v1460_v1  ;;  %v1772_v14 = vmul.f32 %v3627_v60, %v3632_v61 }
  0x29   : > { %v1293_v15 = vadd.f32 %v1184_v59, %v1016_v5  ;;  %v1672_v16 = vmul.f32 %v3634_v6, %v3622_v55  ;;  %v1773_v18 = vmul.f32 %v3634_v6, %v3632_v61  ;;  %v1774_v19 = vmul.f32 %v3632_v61, %v1751_v8 }
  0x2a   : > { %v1569_v21 = vadd.f32 %v1459_v12, %v1292_v11  ;;  %v1868_v22 = vrot.slane %v1772_v14, 1  ;;  %v2028_v23 = vunpack.c.l.bf16 %v3121_v9  ;;  %v2050_v24 = vmul.f32 %v3634_v6, %v3642_v10 }
  0x2b   : > { %v1570_v25 = vadd.f32 %v1461_v13, %v1293_v15  ;;  %v1869_v26 = vrot.slane %v1773_v18, 1  ;;  %v1871_v27 = vrot.slane %v1774_v19, 1  ;;  %v2051_v29 = vmul.f32 %v3642_v10, %v1751_v8 }
  0x2c   : > { %v1703_v30 = vadd.f32 %v1671_v7, %v1569_v21  ;;  %v2049_v31 = vmul.f32 %v3642_v10, %v2028_v23  ;;  %v2146_v32 = vrot.slane %v2050_v24, 2  ;;  %v3180_v33 = vunpack.c.l.bf16 %v3261_v20 }
  0x2d   : > { %v1704_v35 = vadd.f32 %v1672_v16, %v1570_v25  ;;  %v1870_v36 = vsel %vm490_vm1, %v1868_v22, %v1869_v26  ;;  %v1872_v37 = vsel %vm490_vm1, %v1869_v26, %v1871_v27  ;;  %v2148_v38 = vrot.slane %v2051_v29, 2 }
  0x2e   : > { %v1980_v40 = vadd.f32 %v1870_v36, %v1703_v30  ;;  %v2145_v42 = vrot.slane %v2049_v31, 2  ;;  %v3181_v43 = vunpack.c.h.bf16 %v3261_v20  ;;  %v309_v44 = vmul.f32 %v3180_v33, %v3560_v2  ;;  %v3045_v20 = vld [vmem:[%s3565_s13 + $0x74] sm:$0x1]  ;;  %v3062_v30 = vld [vmem:[%s3565_s13 + $0x6c] sm:$0xe] }
  0x2f   : > { %v1981_v45 = vadd.f32 %v1872_v37, %v1704_v35  ;;  %v2149_v46 = vsel %vm768_vm2, %v2146_v32, %v2148_v38  ;;  %v381_v47 = vunpack.c.l.bf16 %v365_v34  ;;  %v418_v48 = vmul.f32 %v3180_v33, %v3570_v3 }
  0x30   : > { %v2147_v49 = vsel %vm768_vm2, %v2145_v42, %v2146_v32  ;;  %v310_v51 = vmul.f32 %v3181_v43, %v3560_v2  ;;  %v419_v52 = vmul.f32 %v3181_v43, %v3570_v3  ;;  %v659_v53 = vunpack.c.l.bf16 %v643_v39  ;;  %v3277_v39 = vld [vmem:[%s3565_s13 + $0x78] sm:$0xff]  }
  0x31   : > { %v2257_v56 = vadd.f32 %v2147_v49, %v1980_v40  ;;  %v2258_v57 = vadd.f32 %v2149_v46, %v1981_v45  ;;  %v420_v58 = vmul.f32 %v3570_v3, %v381_v47  ;;  %v531_v59 = vrot.slane %v418_v48, 1 }
  0x32   : > { %v532_v62 = vrot.slane %v419_v52, 1  ;;  %v696_v63 = vmul.f32 %v3575_v4, %v659_v53  ;;  %v697_v0 = vmul.f32 %v3181_v43, %v3575_v4  ;;  %v698_v1 = vmul.f32 %v3575_v4, %v381_v47 }
  0x33   : > { %v2296_v5 = vadd.f32 %v3669_v50, %v2257_v56  ;;  %v2297_v7 = vadd.f32 %v3669_v50, %v2258_v57  ;;  %v534_v8 = vrot.slane %v420_v58, 1  ;;  %v962_v9 = vunpack.c.l.bf16 %v3020_v54 }
  0x34   : > { %v533_v11 = vsel %vm490_vm1, %v531_v59, %v532_v62  ;;  %v809_v12 = vrot.slane %v696_v63, 2  ;;  %v810_v13 = vrot.slane %v697_v0, 2  ;;  %v812_v14 = vrot.slane %v698_v1, 2 }
  0x35   : > { %v2328_v15 = vadd.f32 3.0, %v2296_v5  ;;  %v2329_v16 = vadd.f32 3.0, %v2297_v7  ;;  %v535_v18 = vsel %vm490_vm1, %v532_v62, %v534_v8  ;;  %v619_v19 = vadd.f32 %v533_v11, %v309_v44  ;;  %v3129_v11 = vld [vmem:[%s3565_s13 + $0x78] sm:$0xe] }
  0x36   : > { %v620_v21 = vadd.f32 %v535_v18, %v310_v51  ;;  %v811_v22 = vsel %vm768_vm2, %v809_v12, %v810_v13  ;;  %v813_v23 = vsel %vm768_vm2, %v810_v13, %v812_v14  ;;  %v963_v24 = vunpack.c.h.bf16 %v3020_v54  ;;  %v3112_v54 = vld [vmem:[%s3565_s13 + $0x80] sm:$0x1] }
  0x37   : > { %v2360_v25 = vmax.f32 %v2328_v15, 0.0  ;;  %v2361_v26 = vmax.f32 %v2329_v16, 0.0  ;;  %v897_v27 = vadd.f32 %v811_v22, %v619_v19  ;;  %v999_v29 = vmul.f32 %v3586_v17, %v962_v9 }
  0x38   : > { %v898_v31 = vadd.f32 %v813_v23, %v620_v21  ;;  %v1000_v32 = vmul.f32 %v3586_v17, %v963_v24  ;;  %v1071_v33 = vunpack.c.l.bf16 %v3045_v20  ;;  %v1108_v34 = vmul.f32 %v3599_v28, %v962_v9  ;;  %v226_v21 = vld [vmem:[%s3565_s13 + $0xc] sm:$0xff]  }
  0x39   : > { %v2392_v35 = vmin.f32 %v2360_v25, 6.0  ;;  %v2393_v36 = vmin.f32 %v2361_v26, 6.0  ;;  %v1031_v37 = vadd.f32 %v999_v29, %v897_v27  ;;  %v1109_v38 = vmul.f32 %v3599_v28, %v963_v24  ;;  %v358_v26 = vld [vmem:[%s3565_s13 + $0x14] sm:$0x1] }
  0x3a   : > { %v1032_v40 = vadd.f32 %v1000_v32, %v898_v31  ;;  %v1110_v42 = vmul.f32 %v3599_v28, %v1071_v33  ;;  %v1220_v43 = vrot.slane %v1108_v34, 1  ;;  %v1348_v44 = vunpack.c.l.bf16 %v3062_v30 }
  0x3b   : > { %v2424_v45 = vmul.f32 %v2392_v35, %v2296_v5  ;;  %v2425_v46 = vmul.f32 %v2393_v36, %v2297_v7  ;;  %v1221_v47 = vrot.slane %v1109_v38, 1  ;;  %v1386_v48 = vmul.f32 %v3610_v41, %v963_v24 }
  0x3c   : > { %v1223_v49 = vrot.slane %v1110_v42, 1  ;;  %v1385_v51 = vmul.f32 %v3610_v41, %v1348_v44  ;;  %v1387_v52 = vmul.f32 %v3610_v41, %v1071_v33  ;;  %v3695_v53 = vunpack.c.l.bf16 %v3277_v39 }
  0x3d   : > { %v2456_v56 = vmul.f32 0.16666667, %v2424_v45  ;;  %v2457_v57 = vmul.f32 0.16666667, %v2425_v46  ;;  %v1222_v58 = vsel %vm490_vm1, %v1220_v43, %v1221_v47  ;;  %v1498_v59 = vrot.slane %v1386_v48, 2 }
  0x3e   : > { %v1224_v62 = vsel %vm490_vm1, %v1221_v47, %v1223_v49  ;;  %v1308_v63 = vadd.f32 %v1222_v58, %v1031_v37  ;;  %v1497_v0 = vrot.slane %v1385_v51, 2  ;;  %v1500_v1 = vrot.slane %v1387_v52, 2 }
  0x3f   : > { %v2488_v5 = vpack.c.bf16 %v2457_v57, %v2456_v56  ;;  %v1309_v7 = vadd.f32 %v1224_v62, %v1032_v40  ;;  %v3700_v8 = vunpack.c.h.bf16 %v3277_v39  ;;  %v1687_v9 = vmul.f32 %v3695_v53, %v3622_v55  ;;  %v636_v40 = vld [vmem:[%s3565_s13 + $0xc] sm:$0xe] }
  0x40   : > { %v1499_v12 = vsel %vm768_vm2, %v1497_v0, %v1498_v59  ;;  %v1501_v13 = vsel %vm768_vm2, %v1498_v59, %v1500_v1  ;;  %v1759_v14 = vunpack.c.l.bf16 %v3112_v54  ;;  %v1796_v15 = vmul.f32 %v3695_v53, %v3632_v61 }
  0x41   : > { %3300 = vmatprep.mubr.msk.bf16.mxu0 %vm2512_vm3, %v2488_v5  ;;  %v1585_v16 = vadd.f32 %v1499_v12, %v1308_v63  ;;  %v1586_v18 = vadd.f32 %v1501_v13, %v1309_v7  ;;  %v1688_v19 = vmul.f32 %v3700_v8, %v3622_v55  ;;  %v1797_v20 = vmul.f32 %v3700_v8, %v3632_v61  ;;  %v3038_v13 = vld [vmem:[%s3565_s13 + $0x20] sm:$0x1] }
  0x42   : > { %v1798_v22 = vmul.f32 %v3632_v61, %v1759_v14  ;;  %v1908_v23 = vrot.slane %v1796_v15, 1  ;;  %v2036_v24 = vunpack.c.l.bf16 %v3129_v11  ;;  %v2074_v25 = vmul.f32 %v3700_v8, %v3642_v10 }
  0x43   : > { %v1719_v27 = vadd.f32 %v1687_v9, %v1585_v16  ;;  %v1720_v29 = vadd.f32 %v1688_v19, %v1586_v18  ;;  %v1909_v30 = vrot.slane %v1797_v20, 1  ;;  %v2075_v31 = vmul.f32 %v3642_v10, %v1759_v14 }
  0x44   : > { %v1911_v32 = vrot.slane %v1798_v22, 1  ;;  %v2073_v33 = vmul.f32 %v3642_v10, %v2036_v24  ;;  %v2186_v34 = vrot.slane %v2074_v25, 2  ;;  %v258_v35 = vunpack.c.l.bf16 %v226_v21 }
  0x45   : > { %v1910_v36 = vsel %vm490_vm1, %v1908_v23, %v1909_v30  ;;  %v2188_v37 = vrot.slane %v2075_v31, 2  ;;  %v259_v38 = vunpack.c.h.bf16 %v226_v21  ;;  %v374_v39 = vunpack.c.l.bf16 %v358_v26  ;;  %v3055_v23 = vld [vmem:[%s3565_s13 + $0x18] sm:$0xe] }
  0x46   : > { %v1912_v42 = vsel %vm490_vm1, %v1909_v30, %v1911_v32  ;;  %v1996_v43 = vadd.f32 %v1910_v36, %v1719_v27  ;;  %v2185_v44 = vrot.slane %v2073_v33, 2  ;;  %v295_v45 = vmul.f32 %v3560_v2, %v258_v35 }
  0x47   : > { %v1997_v46 = vadd.f32 %v1912_v42, %v1720_v29  ;;  %v2189_v47 = vsel %vm768_vm2, %v2186_v34, %v2188_v37  ;;  %v296_v48 = vmul.f32 %v3560_v2, %v259_v38  ;;  %v397_v49 = vmul.f32 %v3570_v3, %v258_v35  ;;  %v3073_v42 = vld [vmem:[%s3565_s13 + $0x24] sm:$0xff]  }
  0x48   : > { %v2187_v51 = vsel %vm768_vm2, %v2185_v44, %v2186_v34  ;;  %v398_v52 = vmul.f32 %v3570_v3, %v259_v38  ;;  %v399_v54 = vmul.f32 %v3570_v3, %v374_v39  ;;  %v652_v56 = vunpack.c.l.bf16 %v636_v40 }
  0x49   : > { %v2273_v57 = vadd.f32 %v2187_v51, %v1996_v43  ;;  %v2274_v58 = vadd.f32 %v2189_v47, %v1997_v46  ;;  %v496_v59 = vrot.slane %v397_v49, 1  ;;  %v676_v62 = vmul.f32 %v3575_v4, %v259_v38 }
  0x4a   : > { %v497_v63 = vrot.slane %v398_v52, 1  ;;  %v499_v0 = vrot.slane %v399_v54, 1  ;;  %v675_v1 = vmul.f32 %v3575_v4, %v652_v56  ;;  %v677_v5 = vmul.f32 %v3575_v4, %v374_v39 }
  0x4b   : > { %v2312_v7 = vadd.f32 %v3669_v50, %v2273_v57  ;;  %v2313_v9 = vadd.f32 %v3669_v50, %v2274_v58  ;;  %v775_v11 = vrot.slane %v676_v62, 2  ;;  %v985_v12 = vmul.f32 %v3627_v60, %v3586_v17  ;;  %v3105_v58 = vld [vmem:[%s3565_s13 + $0x2c] sm:$0x1] }
  0x4c   : > { %v498_v14 = vsel %vm490_vm1, %v496_v59, %v497_v63  ;;  %v500_v15 = vsel %vm490_vm1, %v497_v63, %v499_v0  ;;  %v774_v16 = vrot.slane %v675_v1, 2  ;;  %v777_v18 = vrot.slane %v677_v5, 2  ;;  %v3122_v59 = vld [vmem:[%s3565_s13 + $0x24] sm:$0xe] }
  0x4d   : > { %v2344_v19 = vadd.f32 3.0, %v2312_v7  ;;  %v2345_v20 = vadd.f32 3.0, %v2313_v9  ;;  %v605_v21 = vadd.f32 %v498_v14, %v295_v45  ;;  %v606_v22 = vadd.f32 %v500_v15, %v296_v48 }
  0x4e   : > { %v776_v24 = vsel %vm768_vm2, %v774_v16, %v775_v11  ;;  %v778_v25 = vsel %vm768_vm2, %v775_v11, %v777_v18  ;;  %v986_v26 = vmul.f32 %v3634_v6, %v3586_v17  ;;  %v1064_v27 = vunpack.c.l.bf16 %v3038_v13 }
  0x4f   : > { %v2376_v29 = vmax.f32 %v2344_v19, 0.0  ;;  %v2377_v30 = vmax.f32 %v2345_v20, 0.0  ;;  %v883_v31 = vadd.f32 %v776_v24, %v605_v21  ;;  %v884_v32 = vadd.f32 %v778_v25, %v606_v22  ;;  %v242_v21 = vld [vmem:[%s3565_s13 + $0x6c] sm:$0xff]  }
  0x50   : > { %v1087_v33 = vmul.f32 %v3627_v60, %v3599_v28  ;;  %v1088_v34 = vmul.f32 %v3634_v6, %v3599_v28  ;;  %v1089_v35 = vmul.f32 %v3599_v28, %v1064_v27  ;;  %v1341_v36 = vunpack.c.l.bf16 %v3055_v23 }
  0x51   : > { %v2408_v37 = vmin.f32 %v2376_v29, 6.0  ;;  %v2409_v38 = vmin.f32 %v2377_v30, 6.0  ;;  %v1017_v39 = vadd.f32 %v985_v12, %v883_v31  ;;  %v1018_v40 = vadd.f32 %v986_v26, %v884_v32 }
  0x52   : > { %v1185_v43 = vrot.slane %v1087_v33, 1  ;;  %v1186_v44 = vrot.slane %v1088_v34, 1  ;;  %v1188_v45 = vrot.slane %v1089_v35, 1  ;;  %v1364_v46 = vmul.f32 %v3610_v41, %v1341_v36  ;;  %v366_v35 = vld [vmem:[%s3565_s13 + $0x74] sm:$0x1] }
  0x53   : > { %v2440_v47 = vmul.f32 %v2408_v37, %v2312_v7  ;;  %v2441_v48 = vmul.f32 %v2409_v38, %v2313_v9  ;;  %v1365_v49 = vmul.f32 %v3634_v6, %v3610_v41  ;;  %v1366_v51 = vmul.f32 %v3610_v41, %v1064_v27 }
  0x54   : > { %v1187_v52 = vsel %vm490_vm1, %v1185_v43, %v1186_v44  ;;  %v1189_v54 = vsel %vm490_vm1, %v1186_v44, %v1188_v45  ;;  %v1462_v56 = vrot.slane %v1364_v46, 2  ;;  %v1636_v57 = vunpack.c.l.bf16 %v3073_v42  ;;  %v644_v45 = vld [vmem:[%s3565_s13 + $0x6c] sm:$0xe] }
  0x55   : > { %v2472_v62 = vmul.f32 0.16666667, %v2440_v47  ;;  %v2473_v63 = vmul.f32 0.16666667, %v2441_v48  ;;  %v1294_v0 = vadd.f32 %v1187_v52, %v1017_v39  ;;  %v1295_v1 = vadd.f32 %v1189_v54, %v1018_v40 }
  0x56   : > { %v1463_v5 = vrot.slane %v1365_v49, 2  ;;  %v1465_v7 = vrot.slane %v1366_v51, 2  ;;  %v1637_v9 = vunpack.c.h.bf16 %v3073_v42  ;;  %v1673_v11 = vmul.f32 %v3622_v55, %v1636_v57 }
  0x57   : > { %v2496_v12 = vpack.c.bf16 %v2473_v63, %v2472_v62  ;;  %v1752_v13 = vunpack.c.l.bf16 %v3105_v58  ;;  %v1775_v14 = vmul.f32 %v3632_v61, %v1636_v57  ;;  %v2029_v15 = vunpack.c.l.bf16 %v3122_v59 }
  0x58   : > { %v1464_v16 = vsel %vm768_vm2, %v1462_v56, %v1463_v5  ;;  %v1466_v18 = vsel %vm768_vm2, %v1463_v5, %v1465_v7  ;;  %v1674_v19 = vmul.f32 %v3622_v55, %v1637_v9  ;;  %v1776_v20 = vmul.f32 %v3632_v61, %v1637_v9 }
  0x59   : > { %3316 = vmatprep.mubr.msk.bf16.mxu1 %vm2512_vm3, %v2496_v12  ;;  %v1571_v22 = vadd.f32 %v1464_v16, %v1294_v0  ;;  %v1572_v23 = vadd.f32 %v1466_v18, %v1295_v1  ;;  %v1777_v24 = vmul.f32 %v3632_v61, %v1752_v13  ;;  %v1873_v25 = vrot.slane %v1775_v14, 1  ;;  %v3046_v18 = vld [vmem:[%s3565_s13 + $0x80] sm:$0x1] }
  0x5a   : > { %v1874_v26 = vrot.slane %v1776_v20, 1  ;;  %v2052_v27 = vmul.f32 %v3642_v10, %v2029_v15  ;;  %v2053_v29 = vmul.f32 %v3642_v10, %v1637_v9  ;;  %v2054_v30 = vmul.f32 %v3642_v10, %v1752_v13 }
  0x5b   : > { %v1705_v31 = vadd.f32 %v1673_v11, %v1571_v22  ;;  %v1706_v32 = vadd.f32 %v1674_v19, %v1572_v23  ;;  %v1876_v33 = vrot.slane %v1777_v24, 1  ;;  %v274_v34 = vunpack.c.l.bf16 %v242_v21 }
  0x5c   : > { %v1875_v36 = vsel %vm490_vm1, %v1873_v25, %v1874_v26  ;;  %v2150_v37 = vrot.slane %v2052_v27, 2  ;;  %v2151_v38 = vrot.slane %v2053_v29, 2  ;;  %v2153_v39 = vrot.slane %v2054_v30, 2  ;;  %v3063_v27 = vld [vmem:[%s3565_s13 + $0x78] sm:$0xe] }
  0x5d   : > { %v1877_v40 = vsel %vm490_vm1, %v1874_v26, %v1876_v33  ;;  %v1982_v42 = vadd.f32 %v1875_v36, %v1705_v31  ;;  %v275_v43 = vunpack.c.h.bf16 %v242_v21  ;;  %v311_v44 = vmul.f32 %v3560_v2, %v274_v34 }
  0x5e   : > { %v1983_v46 = vadd.f32 %v1877_v40, %v1706_v32  ;;  %v2152_v47 = vsel %vm768_vm2, %v2150_v37, %v2151_v38  ;;  %v2154_v48 = vsel %vm768_vm2, %v2151_v38, %v2153_v39  ;;  %v382_v49 = vunpack.c.l.bf16 %v366_v35 }
  0x5f   : > { %v2259_v51 = vadd.f32 %v2152_v47, %v1982_v42  ;;  %v312_v52 = vmul.f32 %v3560_v2, %v275_v43  ;;  %v421_v54 = vmul.f32 %v3570_v3, %v274_v34  ;;  %v422_v56 = vmul.f32 %v3570_v3, %v275_v43  ;;  %v3089_v42 = vld [vmem:[%s3565_s13 + $0x84] sm:$0xff]  }
  0x60   : > { %v2260_v57 = vadd.f32 %v2154_v48, %v1983_v46  ;;  %v423_v58 = vmul.f32 %v3570_v3, %v382_v49  ;;  %v660_v59 = vunpack.c.l.bf16 %v644_v45  ;;  %v700_v62 = vmul.f32 %v3575_v4, %v275_v43 }
  0x61   : > { %v2298_v63 = vadd.f32 %v3669_v50, %v2259_v51  ;;  %v536_v0 = vrot.slane %v421_v54, 1  ;;  %v537_v1 = vrot.slane %v422_v56, 1  ;;  %v701_v5 = vmul.f32 %v3575_v4, %v382_v49 }
  0x62   : > { %v2299_v7 = vadd.f32 %v3669_v50, %v2260_v57  ;;  %v539_v9 = vrot.slane %v423_v58, 1  ;;  %v699_v11 = vmul.f32 %v3575_v4, %v660_v59  ;;  %v815_v12 = vrot.slane %v700_v62, 2  ;;  %v3113_v58 = vld [vmem:[%s3565_s13 + $0x8c] sm:$0x1] }
  0x63   : > { %v2330_v13 = vadd.f32 3.0, %v2298_v63  ;;  %v538_v14 = vsel %vm490_vm1, %v536_v0, %v537_v1  ;;  %v817_v15 = vrot.slane %v701_v5, 2  ;;  %v1001_v16 = vmul.f32 %v3695_v53, %v3586_v17 }
  0x64   : > { %v2331_v19 = vadd.f32 3.0, %v2299_v7  ;;  %v540_v20 = vsel %vm490_vm1, %v537_v1, %v539_v9  ;;  %v621_v21 = vadd.f32 %v538_v14, %v311_v44  ;;  %v814_v22 = vrot.slane %v699_v11, 2 }
  0x65   : > { %v2362_v23 = vmax.f32 %v2330_v13, 0.0  ;;  %v622_v24 = vadd.f32 %v540_v20, %v312_v52  ;;  %v818_v25 = vsel %vm768_vm2, %v815_v12, %v817_v15  ;;  %v1002_v26 = vmul.f32 %v3700_v8, %v3586_v17  ;;  %v3130_v15 = vld [vmem:[%s3565_s13 + $0x84] sm:$0xe] }
  0x66   : > { %v2363_v29 = vmax.f32 %v2331_v19, 0.0  ;;  %v816_v30 = vsel %vm768_vm2, %v814_v22, %v815_v12  ;;  %v1072_v31 = vunpack.c.l.bf16 %v3046_v18  ;;  %v1111_v32 = vmul.f32 %v3695_v53, %v3599_v28 }
  0x67   : > { %v2394_v33 = vmin.f32 %v2362_v23, 6.0  ;;  %v899_v34 = vadd.f32 %v816_v30, %v621_v21  ;;  %v900_v35 = vadd.f32 %v818_v25, %v622_v24  ;;  %v1112_v36 = vmul.f32 %v3700_v8, %v3599_v28  ;;  %v359_v30 = vld [vmem:[%s3565_s13 + $0x20] sm:$0x1] }
  0x68   : > { %v2395_v37 = vmin.f32 %v2363_v29, 6.0  ;;  %v1113_v38 = vmul.f32 %v3599_v28, %v1072_v31  ;;  %v1225_v39 = vrot.slane %v1111_v32, 1  ;;  %v1349_v40 = vunpack.c.l.bf16 %v3063_v27 }
  0x69   : > { %v2426_v43 = vmul.f32 %v2394_v33, %v2298_v63  ;;  %v1033_v44 = vadd.f32 %v1001_v16, %v899_v34  ;;  %v1034_v45 = vadd.f32 %v1002_v26, %v900_v35  ;;  %v1226_v46 = vrot.slane %v1112_v36, 1 }
  0x6a   : > { %v2427_v47 = vmul.f32 %v2395_v37, %v2299_v7  ;;  %v1228_v48 = vrot.slane %v1113_v38, 1  ;;  %v1388_v49 = vmul.f32 %v3610_v41, %v1349_v40  ;;  %v1389_v51 = vmul.f32 %v3700_v8, %v3610_v41 }
  0x6b   : > { %v2458_v52 = vmul.f32 0.16666667, %v2426_v43  ;;  %v1227_v54 = vsel %vm490_vm1, %v1225_v39, %v1226_v46  ;;  %v1390_v56 = vmul.f32 %v3610_v41, %v1072_v31  ;;  %v1652_v57 = vunpack.c.l.bf16 %v3089_v42  ;;  %v637_v39 = vld [vmem:[%s3565_s13 + $0x18] sm:$0xe] }
  0x6c   : > { %v2459_v59 = vmul.f32 0.16666667, %v2427_v47  ;;  %v1229_v62 = vsel %vm490_vm1, %v1226_v46, %v1228_v48  ;;  %v1310_v63 = vadd.f32 %v1227_v54, %v1033_v44  ;;  %v1502_v0 = vrot.slane %v1388_v49, 2 }
  0x6d   : > { %v1311_v1 = vadd.f32 %v1229_v62, %v1034_v45  ;;  %v1503_v5 = vrot.slane %v1389_v51, 2  ;;  %v1505_v7 = vrot.slane %v1390_v56, 2  ;;  %v1653_v9 = vunpack.c.h.bf16 %v3089_v42  ;;  %v3008_v56 = vld [vmem:[%s3565_s13 + $0x24] sm:$0xff]  }
  0x6e   : > { %v2489_v11 = vpack.c.bf16 %v2459_v59, %v2458_v52  ;;  %v1689_v12 = vmul.f32 %v3622_v55, %v1652_v57  ;;  %v1760_v13 = vunpack.c.l.bf16 %v3113_v58  ;;  %v1799_v14 = vmul.f32 %v3632_v61, %v1652_v57 }
  0x6f   : > { %v1504_v16 = vsel %vm768_vm2, %v1502_v0, %v1503_v5  ;;  %v1506_v18 = vsel %vm768_vm2, %v1503_v5, %v1505_v7  ;;  %v1690_v19 = vmul.f32 %v3622_v55, %v1653_v9  ;;  %v1800_v20 = vmul.f32 %v3632_v61, %v1653_v9 }
  0x70   : > { %3301 = vmatmul.mubr.msk.bf16.vlgmr.msra.gmra.mrb[0].mxu0 %vm2512_vm3, %v2489_v11  ;;  %v1587_v21 = vadd.f32 %v1504_v16, %v1310_v63  ;;  %v1588_v22 = vadd.f32 %v1506_v18, %v1311_v1  ;;  %v1801_v23 = vmul.f32 %v3632_v61, %v1760_v13  ;;  %v1913_v24 = vrot.slane %v1799_v14, 1  ;;  %v3039_v14 = vld [vmem:[%s3565_s13 + $0x2c] sm:$0x1] }
  0x71   : > { %v1914_v25 = vrot.slane %v1800_v20, 1  ;;  %v2037_v26 = vunpack.c.l.bf16 %v3130_v15  ;;  %v2077_v27 = vmul.f32 %v3642_v10, %v1653_v9  ;;  %v2078_v29 = vmul.f32 %v3642_v10, %v1760_v13 }
  0x72   : > { %v1721_v31 = vadd.f32 %v1689_v12, %v1587_v21  ;;  %v1722_v32 = vadd.f32 %v1690_v19, %v1588_v22  ;;  %v1916_v33 = vrot.slane %v1801_v23, 1  ;;  %v297_v34 = vmul.f32 %v3627_v60, %v3560_v2  ;;  %v3056_v23 = vld [vmem:[%s3565_s13 + $0x24] sm:$0xe] }
  0x73   : > { %v1915_v35 = vsel %vm490_vm1, %v1913_v24, %v1914_v25  ;;  %v2076_v36 = vmul.f32 %v3642_v10, %v2037_v26  ;;  %v2191_v37 = vrot.slane %v2077_v27, 2  ;;  %v2193_v38 = vrot.slane %v2078_v29, 2 }
  0x74   : > { %v1917_v40 = vsel %vm490_vm1, %v1914_v25, %v1916_v33  ;;  %v1998_v42 = vadd.f32 %v1915_v35, %v1721_v31  ;;  %v298_v43 = vmul.f32 %v3634_v6, %v3560_v2  ;;  %v375_v44 = vunpack.c.l.bf16 %v359_v30 }
  0x75   : > { %v1999_v45 = vadd.f32 %v1917_v40, %v1722_v32  ;;  %v2190_v46 = vrot.slane %v2076_v36, 2  ;;  %v2194_v47 = vsel %vm768_vm2, %v2191_v37, %v2193_v38  ;;  %v400_v48 = vmul.f32 %v3627_v60, %v3570_v3 }
  0x76   : > { %v401_v49 = vmul.f32 %v3634_v6, %v3570_v3  ;;  %v402_v51 = vmul.f32 %v3570_v3, %v375_v44  ;;  %v653_v52 = vunpack.c.l.bf16 %v637_v39  ;;  %v679_v54 = vmul.f32 %v3634_v6, %v3575_v4 }
  0x77   : > { %v2192_v57 = vsel %vm768_vm2, %v2190_v46, %v2191_v37  ;;  %v2276_v58 = vadd.f32 %v2194_v47, %v1999_v45  ;;  %v501_v59 = vrot.slane %v400_v48, 1  ;;  %v680_v62 = vmul.f32 %v3575_v4, %v375_v44  ;;  %v3274_v37 = vld [vmem:[%s3565_s13 + $0x30] sm:$0xff]  }
  0x78   : > { %v2275_v63 = vadd.f32 %v2192_v57, %v1998_v42  ;;  %v502_v0 = vrot.slane %v401_v49, 1  ;;  %v504_v60 = vrot.slane %v402_v51, 1  ;;  %v678_v1 = vmul.f32 %v3575_v4, %v653_v52  ;;  %v3123_v57 = vld [vmem:[%s3565_s13 + $0x30] sm:$0xe] }
  0x79   : > { %v2315_v5 = vadd.f32 %v3669_v50, %v2276_v58  ;;  %v780_v3 = vrot.slane %v679_v54, 2  ;;  %v782_v7 = vrot.slane %v680_v62, 2  ;;  %v950_v9 = vunpack.c.l.bf16 %v3008_v56 }
  0x7a   : > { %v2314_v6 = vadd.f32 %v3669_v50, %v2275_v63  ;;  %v503_v11 = vsel %vm490_vm1, %v501_v59, %v502_v0  ;;  %v505_v12 = vsel %vm490_vm1, %v502_v0, %v504_v60  ;;  %v779_v13 = vrot.slane %v678_v1, 2 }
  0x7b   : > { %v2347_v15 = vadd.f32 3.0, %v2315_v5  ;;  %v607_v16 = vadd.f32 %v503_v11, %v297_v34  ;;  %v608_v18 = vadd.f32 %v505_v12, %v298_v43  ;;  %v783_v19 = vsel %vm768_vm2, %v780_v3, %v782_v7 }
  0x7c   : > { %v2346_v4 = vadd.f32 3.0, %v2314_v6  ;;  %v781_v20 = vsel %vm768_vm2, %v779_v13, %v780_v3  ;;  %v951_v21 = vunpack.c.h.bf16 %v3008_v56  ;;  %v987_v22 = vmul.f32 %v3586_v17, %v950_v9 }
  0x7d   : > { %v2379_v24 = vmax.f32 %v2347_v15, 0.0  ;;  %v885_v25 = vadd.f32 %v781_v20, %v607_v16  ;;  %v886_v26 = vadd.f32 %v783_v19, %v608_v18  ;;  %v1065_v27 = vunpack.c.l.bf16 %v3039_v14  ;;  %v367_v19 = vld [vmem:[%s3565_s13 + $0x80] sm:$0x1] }
  0x7e   : > { %v2378_v29 = vmax.f32 %v2346_v4, 0.0  ;;  %v988_v30 = vmul.f32 %v3586_v17, %v951_v21  ;;  %v1090_v31 = vmul.f32 %v3599_v28, %v950_v9  ;;  %v1091_v32 = vmul.f32 %v3599_v28, %v951_v21 }
  0x7f   : > { %v2411_v33 = vmin.f32 %v2379_v24, 6.0  ;;  %v1019_v34 = vadd.f32 %v987_v22, %v885_v25  ;;  %v1092_v35 = vmul.f32 %v3599_v28, %v1065_v27  ;;  %v1342_v36 = vunpack.c.l.bf16 %v3056_v23  ;;  %v3106_v28 = vld [vmem:[%s3565_s13 + $0x38] sm:$0x1] }
  0x80   : > { %v2410_v38 = vmin.f32 %v2378_v29, 6.0  ;;  %v1020_v39 = vadd.f32 %v988_v30, %v886_v26  ;;  %v1190_v40 = vrot.slane %v1090_v31, 1  ;;  %v1191_v42 = vrot.slane %v1091_v32, 1  ;;  %v645_v30 = vld [vmem:[%s3565_s13 + $0x78] sm:$0xe] }
  0x81   : > { %v2443_v43 = vmul.f32 %v2411_v33, %v2315_v5  ;;  %v1193_v44 = vrot.slane %v1092_v35, 1  ;;  %v1367_v17 = vmul.f32 %v3610_v41, %v1342_v36  ;;  %v1368_v45 = vmul.f32 %v3610_v41, %v951_v21  ;;  %v3896_v33 = vld [vmem:[%s4796_s1 + $0x1] ss:$0 sm:$0xff] }
  0x82   : > { %v2442_v46 = vmul.f32 %v2410_v38, %v2314_v6  ;;  %v1192_v47 = vsel %vm490_vm1, %v1190_v40, %v1191_v42  ;;  %v1369_v48 = vmul.f32 %v3610_v41, %v1065_v27  ;;  %v3861_v49 = vunpack.c.l.bf16 %v3274_v37  ;;  %v3024_v38 = vld [vmem:[%s3565_s13 + $0x84] sm:$0xff]  }
  0x83   : > { %v2475_v51 = vmul.f32 0.16666667, %v2443_v43  ;;  %v1194_v52 = vsel %vm490_vm1, %v1191_v42, %v1193_v44  ;;  %v1296_v54 = vadd.f32 %v1192_v47, %v1019_v34  ;;  %v1467_v56 = vrot.slane %v1367_v17, 2  ;;  %v3908_v43 = vld [vmem:[%s4796_s1 + $0x2] ss:$0 sm:$0xff] }
  0x84   : > { %v2474_v58 = vmul.f32 0.16666667, %v2442_v46  ;;  %v1297_v59 = vadd.f32 %v1194_v52, %v1020_v39  ;;  %v1468_v62 = vrot.slane %v1368_v45, 2  ;;  %v1470_v63 = vrot.slane %v1369_v48, 2 }
  0x85   : > { %v3866_v0 = vunpack.c.h.bf16 %v3274_v37  ;;  %v1675_v60 = vmul.f32 %v3861_v49, %v3622_v55  ;;  %v1753_v41 = vunpack.c.l.bf16 %v3106_v28  ;;  %v1778_v1 = vmul.f32 %v3861_v49, %v3632_v61 }
  0x86   : > { %v2497_v5 = vpack.c.bf16 %v2475_v51, %v2474_v58  ;;  %v1469_v3 = vsel %vm768_vm2, %v1467_v56, %v1468_v62  ;;  %v1471_v7 = vsel %vm768_vm2, %v1468_v62, %v1470_v63  ;;  %v2030_v9 = vunpack.c.l.bf16 %v3123_v57 }
  0x87   : > { %v1573_v6 = vadd.f32 %v1469_v3, %v1296_v54  ;;  %v1574_v11 = vadd.f32 %v1471_v7, %v1297_v59  ;;  %v1676_v12 = vmul.f32 %v3866_v0, %v3622_v55  ;;  %v1779_v13 = vmul.f32 %v3866_v0, %v3632_v61  ;;  %v3064_v3 = vld [vmem:[%s3565_s13 + $0x84] sm:$0xe] }
  0x88   : > { %3317 = vmatmul.mubr.msk.bf16.vlgmr.msra.gmra.mrb[0].mxu1 %vm2512_vm3, %v2497_v5  ;;  %v1780_v14 = vmul.f32 %v3632_v61, %v1753_v41  ;;  %v1878_v15 = vrot.slane %v1778_v1, 1  ;;  %v2055_v16 = vmul.f32 %v3642_v10, %v2030_v9  ;;  %v2056_v18 = vmul.f32 %v3866_v0, %v3642_v10  ;;  %v3923_v5 = vld [vmem:[%s4796_s1 + $0x3] ss:$0 sm:$0xff] }
  0x89   : > { %v1707_v4 = vadd.f32 %v1675_v60, %v1573_v6  ;;  %v1708_v20 = vadd.f32 %v1676_v12, %v1574_v11  ;;  %v1879_v21 = vrot.slane %v1779_v13, 1  ;;  %v2057_v55 = vmul.f32 %v3642_v10, %v1753_v41 }
  0x8a   : > { %v1881_v22 = vrot.slane %v1780_v14, 1  ;;  %v2155_v23 = vrot.slane %v2055_v16, 2  ;;  %v2156_v24 = vrot.slane %v2056_v18, 2  ;;  %v313_v61 = vmul.f32 %v3695_v53, %v3560_v2 }
  0x8b   : > { %v1880_v25 = vsel %vm490_vm1, %v1878_v15, %v1879_v21  ;;  %v2158_v26 = vrot.slane %v2057_v55, 2  ;;  %v314_v27 = vmul.f32 %v3700_v8, %v3560_v2  ;;  %v383_v29 = vunpack.c.l.bf16 %v367_v19  ;;  %v3932_v15 = vld [vmem:[%s4796_s1 + $0x4] ss:$0 sm:$0xff] }
  0x8c   : > { %v1882_v31 = vsel %vm490_vm1, %v1879_v21, %v1881_v22  ;;  %v1984_v32 = vadd.f32 %v1880_v25, %v1707_v4  ;;  %v2157_v10 = vsel %vm768_vm2, %v2155_v23, %v2156_v24  ;;  %v424_v34 = vmul.f32 %v3896_v33, %v3695_v53  ;;  %v3278_v21 = vld [vmem:[%s3565_s13 + $0x90] sm:$0xff]  }
  0x8d   : > { %v1985_v35 = vadd.f32 %v1882_v31, %v1708_v20  ;;  %v2159_v36 = vsel %vm768_vm2, %v2156_v24, %v2158_v26  ;;  %v425_v2 = vmul.f32 %v3896_v33, %v3700_v8  ;;  %v426_v37 = vmul.f32 %v3896_v33, %v383_v29 }
  0x8e   : > { %v2261_v39 = vadd.f32 %v2157_v10, %v1984_v32  ;;  %v541_v40 = vrot.slane %v424_v34, 1  ;;  %v661_v42 = vunpack.c.l.bf16 %v645_v30  ;;  %v703_v53 = vmul.f32 %v3908_v43, %v3700_v8  ;;  %v3047_v8 = vld [vmem:[%s3565_s13 + $0x8c] sm:$0x1]  ;;  %v3114_v34 = vld [vmem:[%s3565_s13 + $0x98] sm:$0x1] }
  0x8f   : > { %v2262_v44 = vadd.f32 %v2159_v36, %v1985_v35  ;;  %v542_v17 = vrot.slane %v425_v2, 1  ;;  %v544_v45 = vrot.slane %v426_v37, 1  ;;  %v704_v46 = vmul.f32 %v3908_v43, %v383_v29 }
  0x90   : > { %v2300_v47 = vadd.f32 %v3669_v50, %v2261_v39  ;;  %v702_v48 = vmul.f32 %v3908_v43, %v661_v42  ;;  %v820_v28 = vrot.slane %v703_v53, 2  ;;  %v966_v51 = vunpack.c.l.bf16 %v3024_v38 }
  0x91   : > { %v2301_v52 = vadd.f32 %v3669_v50, %v2262_v44  ;;  %v543_v54 = vsel %vm490_vm1, %v541_v40, %v542_v17  ;;  %v545_v56 = vsel %vm490_vm1, %v542_v17, %v544_v45  ;;  %v822_v57 = vrot.slane %v704_v46, 2  ;;  %v3957_v45 = vld [vmem:[%s4796_s1 + $0x6] ss:$0 sm:$0xff] }
  0x92   : > { %v2332_v58 = vadd.f32 3.0, %v2300_v47  ;;  %v623_v59 = vadd.f32 %v543_v54, %v313_v61  ;;  %v624_v62 = vadd.f32 %v545_v56, %v314_v27  ;;  %v819_v63 = vrot.slane %v702_v48, 2  ;;  %v3941_v27 = vld [vmem:[%s4796_s1 + $0x5] ss:$0 sm:$0xff] }
  0x93   : > { %v2333_v60 = vadd.f32 3.0, %v2301_v52  ;;  %v823_v41 = vsel %vm768_vm2, %v820_v28, %v822_v57  ;;  %v967_v1 = vunpack.c.h.bf16 %v3024_v38  ;;  %v1003_v50 = vmul.f32 %v3923_v5, %v966_v51  ;;  %v3131_v38 = vld [vmem:[%s3565_s13 + $0x90] sm:$0xe] }
  0x94   : > { %v2364_v7 = vmax.f32 %v2332_v58, 0.0  ;;  %v821_v9 = vsel %vm768_vm2, %v819_v63, %v820_v28  ;;  %v902_v6 = vadd.f32 %v823_v41, %v624_v62  ;;  %v1073_v11 = vunpack.c.l.bf16 %v3047_v8  ;;  %v3980_v41 = vld [vmem:[%s4796_s1 + $0x8] ss:$0 sm:$0xff] }
  0x95   : > { %v2365_v12 = vmax.f32 %v2333_v60, 0.0  ;;  %v901_v13 = vadd.f32 %v821_v9, %v623_v59  ;;  %v1004_v14 = vmul.f32 %v3923_v5, %v967_v1  ;;  %v1114_v16 = vmul.f32 %v3932_v15, %v966_v51  ;;  %v3965_v51 = vld [vmem:[%s4796_s1 + $0x7] ss:$0 sm:$0xff] }
  0x96   : > { %v2396_v18 = vmin.f32 %v2364_v7, 6.0  ;;  %v1115_v19 = vmul.f32 %v3932_v15, %v967_v1  ;;  %v1116_v4 = vmul.f32 %v3932_v15, %v1073_v11  ;;  %v1350_v20 = vunpack.c.l.bf16 %v3064_v3  ;;  %v230_v59 = vld [vmem:[%s3565_s13 + $0x24] sm:$0xff]  }
  0x97   : > { %v2397_v55 = vmin.f32 %v2365_v12, 6.0  ;;  %v1035_v22 = vadd.f32 %v1003_v50, %v901_v13  ;;  %v1036_v23 = vadd.f32 %v1004_v14, %v902_v6  ;;  %v1230_v24 = vrot.slane %v1114_v16, 1  ;;  %v360_v6 = vld [vmem:[%s3565_s13 + $0x2c] sm:$0x1] }
  0x98   : > { %v2428_v61 = vmul.f32 %v2396_v18, %v2300_v47  ;;  %v1231_v25 = vrot.slane %v1115_v19, 1  ;;  %v1233_v26 = vrot.slane %v1116_v4, 1  ;;  %v1391_v29 = vmul.f32 %v3941_v27, %v1350_v20 }
  0x99   : > { %v2429_v30 = vmul.f32 %v2397_v55, %v2301_v52  ;;  %v1392_v31 = vmul.f32 %v3941_v27, %v967_v1  ;;  %v1393_v32 = vmul.f32 %v3941_v27, %v1073_v11  ;;  %v3946_v10 = vunpack.c.l.bf16 %v3278_v21  ;;  %v3992_v55 = vld [vmem:[%s4796_s1] ss:$0 sm:$0xff] }
  0x9a   : > { %v2460_v35 = vmul.f32 0.16666667, %v2428_v61  ;;  %v1232_v36 = vsel %vm490_vm1, %v1230_v24, %v1231_v25  ;;  %v1234_v2 = vsel %vm490_vm1, %v1231_v25, %v1233_v26  ;;  %v1507_v37 = vrot.slane %v1391_v29, 2  ;;  %v638_v24 = vld [vmem:[%s3565_s13 + $0x24] sm:$0xe] }
  0x9b   : > { %v2461_v39 = vmul.f32 0.16666667, %v2429_v30  ;;  %v1312_v40 = vadd.f32 %v1232_v36, %v1035_v22  ;;  %v1313_v42 = vadd.f32 %v1234_v2, %v1036_v23  ;;  %v1508_v53 = vrot.slane %v1392_v31, 2 }
  0x9c   : > { %v1510_v44 = vrot.slane %v1393_v32, 2  ;;  %v3952_v17 = vunpack.c.h.bf16 %v3278_v21  ;;  %v1691_v46 = vmul.f32 %v3957_v45, %v3946_v10  ;;  %v1761_v47 = vunpack.c.l.bf16 %v3114_v34 }
  0x9d   : > { %v2490_v48 = vpack.c.bf16 %v2461_v39, %v2460_v35  ;;  %v1509_v28 = vsel %vm768_vm2, %v1507_v37, %v1508_v53  ;;  %v1802_v52 = vmul.f32 %v3965_v51, %v3946_v10  ;;  %v2038_v54 = vunpack.c.l.bf16 %v3131_v38  ;;  %v4007_v38 = vld [vmem:[%s4797_s2] ss:$0 sm:$0xff] }
  0x9e   : > { %v1511_v56 = vsel %vm768_vm2, %v1508_v53, %v1510_v44  ;;  %v1589_v57 = vadd.f32 %v1509_v28, %v1312_v40  ;;  %v1692_v8 = vmul.f32 %v3957_v45, %v3952_v17  ;;  %v1803_v58 = vmul.f32 %v3965_v51, %v3952_v17  ;;  %v3040_v28 = vld [vmem:[%s3565_s13 + $0x38] sm:$0x1] }
  0x9f   : > { %3304 = vmatprep.mubr.msk.bf16.mxu0 %vm2512_vm3, %v2490_v48  ;;  %v1590_v62 = vadd.f32 %v1511_v56, %v1313_v42  ;;  %v1804_v63 = vmul.f32 %v3965_v51, %v1761_v47  ;;  %v1918_v60 = vrot.slane %v1802_v52, 1  ;;  %v2079_v1 = vmul.f32 %v3980_v41, %v2038_v54 }
  0xa0   : > { %v1723_v50 = vadd.f32 %v1691_v46, %v1589_v57  ;;  %v1919_v3 = vrot.slane %v1803_v58, 1  ;;  %v2080_v7 = vmul.f32 %v3980_v41, %v3952_v17  ;;  %v2081_v9 = vmul.f32 %v3980_v41, %v1761_v47 }
  0xa1   : > { %v1724_v11 = vadd.f32 %v1692_v8, %v1590_v62  ;;  %v1921_v12 = vrot.slane %v1804_v63, 1  ;;  %v2195_v13 = vrot.slane %v2079_v1, 2  ;;  %v262_v14 = vunpack.c.l.bf16 %v230_v59 }
  0xa2   : > { %v1920_v16 = vsel %vm490_vm1, %v1918_v60, %v1919_v3  ;;  %v2196_v18 = vrot.slane %v2080_v7, 2  ;;  %v2198_v19 = vrot.slane %v2081_v9, 2  ;;  %v263_v4 = vunpack.c.h.bf16 %v230_v59 }
  0xa3   : > { %v1922_v20 = vsel %vm490_vm1, %v1919_v3, %v1921_v12  ;;  %v2000_v21 = vadd.f32 %v1920_v16, %v1723_v50  ;;  %v299_v22 = vmul.f32 %v3992_v55, %v262_v14  ;;  %v376_v23 = vunpack.c.l.bf16 %v360_v6  ;;  %v3057_v3 = vld [vmem:[%s3565_s13 + $0x30] sm:$0xe] }
  0xa4   : > { %v2001_v61 = vadd.f32 %v1922_v20, %v1724_v11  ;;  %v2197_v25 = vsel %vm768_vm2, %v2195_v13, %v2196_v18  ;;  %v2199_v26 = vsel %vm768_vm2, %v2196_v18, %v2198_v19  ;;  %v300_v29 = vmul.f32 %v3992_v55, %v263_v4 }
  0xa5   : > { %v2277_v30 = vadd.f32 %v2197_v25, %v2000_v21  ;;  %v403_v31 = vmul.f32 %v3896_v33, %v262_v14  ;;  %v404_v32 = vmul.f32 %v3896_v33, %v263_v4  ;;  %v405_v34 = vmul.f32 %v3896_v33, %v376_v23  ;;  %v3077_v21 = vld [vmem:[%s3565_s13 + $0x3c] sm:$0xff]  }
  0xa6   : > { %v2278_v35 = vadd.f32 %v2199_v26, %v2001_v61  ;;  %v654_v36 = vunpack.c.l.bf16 %v638_v24  ;;  %v682_v2 = vmul.f32 %v3908_v43, %v263_v4  ;;  %v683_v37 = vmul.f32 %v3908_v43, %v376_v23 }
  0xa7   : > { %v2316_v39 = vadd.f32 %v4007_v38, %v2277_v30  ;;  %v506_v40 = vrot.slane %v403_v31, 1  ;;  %v507_v42 = vrot.slane %v404_v32, 1  ;;  %v509_v53 = vrot.slane %v405_v34, 1 }
  0xa8   : > { %v2317_v44 = vadd.f32 %v4007_v38, %v2278_v35  ;;  %v681_v46 = vmul.f32 %v3908_v43, %v654_v36  ;;  %v785_v47 = vrot.slane %v682_v2, 2  ;;  %v787_v48 = vrot.slane %v683_v37, 2  ;;  %v3107_v36 = vld [vmem:[%s3565_s13 + $0x44] sm:$0x1]  ;;  %v3124_v2 = vld [vmem:[%s3565_s13 + $0x3c] sm:$0xe] }
  0xa9   : > { %v2348_v52 = vadd.f32 3.0, %v2316_v39  ;;  %v508_v54 = vsel %vm490_vm1, %v506_v40, %v507_v42  ;;  %v510_v56 = vsel %vm490_vm1, %v507_v42, %v509_v53  ;;  %v989_v57 = vmul.f32 %v3923_v5, %v3861_v49 }
  0xaa   : > { %v2349_v8 = vadd.f32 3.0, %v2317_v44  ;;  %v609_v58 = vadd.f32 %v508_v54, %v299_v22  ;;  %v610_v59 = vadd.f32 %v510_v56, %v300_v29  ;;  %v784_v62 = vrot.slane %v681_v46, 2 }
  0xab   : > { %v2380_v63 = vmax.f32 %v2348_v52, 0.0  ;;  %v788_v60 = vsel %vm768_vm2, %v785_v47, %v787_v48  ;;  %v990_v1 = vmul.f32 %v3923_v5, %v3866_v0  ;;  %v1066_v50 = vunpack.c.l.bf16 %v3040_v28 }
  0xac   : > { %v2381_v7 = vmax.f32 %v2349_v8, 0.0  ;;  %v786_v9 = vsel %vm768_vm2, %v784_v62, %v785_v47  ;;  %v888_v6 = vadd.f32 %v788_v60, %v610_v59  ;;  %v1093_v11 = vmul.f32 %v3932_v15, %v3861_v49  ;;  %v246_v59 = vld [vmem:[%s3565_s13 + $0x84] sm:$0xff]  }
  0xad   : > { %v2412_v12 = vmin.f32 %v2380_v63, 6.0  ;;  %v887_v13 = vadd.f32 %v786_v9, %v609_v58  ;;  %v1094_v14 = vmul.f32 %v3932_v15, %v3866_v0  ;;  %v1095_v16 = vmul.f32 %v3932_v15, %v1066_v50 }
  0xae   : > { %v2413_v18 = vmin.f32 %v2381_v7, 6.0  ;;  %v1022_v19 = vadd.f32 %v990_v1, %v888_v6  ;;  %v1195_v4 = vrot.slane %v1093_v11, 1  ;;  %v1343_v20 = vunpack.c.l.bf16 %v3057_v3 }
  0xaf   : > { %v2444_v22 = vmul.f32 %v2412_v12, %v2316_v39  ;;  %v1021_v23 = vadd.f32 %v989_v57, %v887_v13  ;;  %v1196_v24 = vrot.slane %v1094_v14, 1  ;;  %v1198_v61 = vrot.slane %v1095_v16, 1  ;;  %v368_v14 = vld [vmem:[%s3565_s13 + $0x8c] sm:$0x1] }
  0xb0   : > { %v2445_v25 = vmul.f32 %v2413_v18, %v2317_v44  ;;  %v1370_v26 = vmul.f32 %v3941_v27, %v1343_v20  ;;  %v1371_v29 = vmul.f32 %v3941_v27, %v3866_v0  ;;  %v1372_v30 = vmul.f32 %v3941_v27, %v1066_v50 }
  0xb1   : > { %v2476_v31 = vmul.f32 0.16666667, %v2444_v22  ;;  %v1197_v32 = vsel %vm490_vm1, %v1195_v4, %v1196_v24  ;;  %v1199_v34 = vsel %vm490_vm1, %v1196_v24, %v1198_v61  ;;  %v1640_v35 = vunpack.c.l.bf16 %v3077_v21  ;;  %v646_v24 = vld [vmem:[%s3565_s13 + $0x84] sm:$0xe] }
  0xb2   : > { %v2477_v37 = vmul.f32 0.16666667, %v2445_v25  ;;  %v1298_v39 = vadd.f32 %v1197_v32, %v1021_v23  ;;  %v1299_v40 = vadd.f32 %v1199_v34, %v1022_v19  ;;  %v1472_v42 = vrot.slane %v1370_v26, 2 }
  0xb3   : > { %v1473_v53 = vrot.slane %v1371_v29, 2  ;;  %v1475_v44 = vrot.slane %v1372_v30, 2  ;;  %v1641_v46 = vunpack.c.h.bf16 %v3077_v21  ;;  %v1677_v47 = vmul.f32 %v3957_v45, %v1640_v35 }
  0xb4   : > { %v2498_v48 = vpack.c.bf16 %v2477_v37, %v2476_v31  ;;  %v1754_v28 = vunpack.c.l.bf16 %v3107_v36  ;;  %v1781_v52 = vmul.f32 %v3965_v51, %v1640_v35  ;;  %v2031_v54 = vunpack.c.l.bf16 %v3124_v2 }
  0xb5   : > { %v1474_v56 = vsel %vm768_vm2, %v1472_v42, %v1473_v53  ;;  %v1476_v57 = vsel %vm768_vm2, %v1473_v53, %v1475_v44  ;;  %v1678_v8 = vmul.f32 %v3957_v45, %v1641_v46  ;;  %v1782_v58 = vmul.f32 %v3965_v51, %v1641_v46 }
  0xb6   : > { %3320 = vmatprep.mubr.msk.bf16.mxu1 %vm2512_vm3, %v2498_v48  ;;  %v1575_v62 = vadd.f32 %v1474_v56, %v1298_v39  ;;  %v1576_v63 = vadd.f32 %v1476_v57, %v1299_v40  ;;  %v1783_v60 = vmul.f32 %v3965_v51, %v1754_v28  ;;  %v1883_v1 = vrot.slane %v1781_v52, 1  ;;  %v3048_v57 = vld [vmem:[%s3565_s13 + $0x98] sm:$0x1] }
  0xb7   : > { %v1884_v50 = vrot.slane %v1782_v58, 1  ;;  %v2058_v3 = vmul.f32 %v3980_v41, %v2031_v54  ;;  %v2059_v7 = vmul.f32 %v3980_v41, %v1641_v46  ;;  %v2060_v9 = vmul.f32 %v3980_v41, %v1754_v28 }
  0xb8   : > { %v1709_v6 = vadd.f32 %v1677_v47, %v1575_v62  ;;  %v1710_v11 = vadd.f32 %v1678_v8, %v1576_v63  ;;  %v1886_v12 = vrot.slane %v1783_v60, 1  ;;  %v278_v13 = vunpack.c.l.bf16 %v246_v59 }
  0xb9   : > { %v1885_v16 = vsel %vm490_vm1, %v1883_v1, %v1884_v50  ;;  %v2160_v18 = vrot.slane %v2058_v3, 2  ;;  %v2161_v19 = vrot.slane %v2059_v7, 2  ;;  %v2163_v4 = vrot.slane %v2060_v9, 2  ;;  %v3065_v3 = vld [vmem:[%s3565_s13 + $0x90] sm:$0xe] }
  0xba   : > { %v1887_v20 = vsel %vm490_vm1, %v1884_v50, %v1886_v12  ;;  %v1986_v21 = vadd.f32 %v1885_v16, %v1709_v6  ;;  %v279_v22 = vunpack.c.h.bf16 %v246_v59  ;;  %v315_v23 = vmul.f32 %v3992_v55, %v278_v13 }
  0xbb   : > { %v1987_v61 = vadd.f32 %v1887_v20, %v1710_v11  ;;  %v2162_v25 = vsel %vm768_vm2, %v2160_v18, %v2161_v19  ;;  %v2164_v26 = vsel %vm768_vm2, %v2161_v19, %v2163_v4  ;;  %v384_v29 = vunpack.c.l.bf16 %v368_v14 }
  0xbc   : > { %v2263_v30 = vadd.f32 %v2162_v25, %v1986_v21  ;;  %v316_v31 = vmul.f32 %v3992_v55, %v279_v22  ;;  %v427_v32 = vmul.f32 %v3896_v33, %v278_v13  ;;  %v428_v34 = vmul.f32 %v3896_v33, %v279_v22  ;;  %v3093_v21 = vld [vmem:[%s3565_s13 + $0x9c] sm:$0xff]  }
  0xbd   : > { %v2264_v35 = vadd.f32 %v2164_v26, %v1987_v61  ;;  %v429_v36 = vmul.f32 %v3896_v33, %v384_v29  ;;  %v662_v2 = vunpack.c.l.bf16 %v646_v24  ;;  %v706_v37 = vmul.f32 %v3908_v43, %v279_v22 }
  0xbe   : > { %v2302_v39 = vadd.f32 %v4007_v38, %v2263_v30  ;;  %v546_v40 = vrot.slane %v427_v32, 1  ;;  %v547_v42 = vrot.slane %v428_v34, 1  ;;  %v707_v53 = vmul.f32 %v3908_v43, %v384_v29 }
  0xbf   : > { %v2303_v44 = vadd.f32 %v4007_v38, %v2264_v35  ;;  %v549_v46 = vrot.slane %v429_v36, 1  ;;  %v705_v47 = vmul.f32 %v3908_v43, %v662_v2  ;;  %v825_v48 = vrot.slane %v706_v37, 2  ;;  %v3115_v36 = vld [vmem:[%s3565_s13 + $0xa4] sm:$0x1] }
  0xc0   : > { %v2334_v28 = vadd.f32 3.0, %v2302_v39  ;;  %v548_v52 = vsel %vm490_vm1, %v546_v40, %v547_v42  ;;  %v827_v54 = vrot.slane %v707_v53, 2  ;;  %v1005_v56 = vmul.f32 %v3923_v5, %v3946_v10 }
  0xc1   : > { %v2335_v8 = vadd.f32 3.0, %v2303_v44  ;;  %v550_v58 = vsel %vm490_vm1, %v547_v42, %v549_v46  ;;  %v625_v59 = vadd.f32 %v548_v52, %v315_v23  ;;  %v824_v62 = vrot.slane %v705_v47, 2 }
  0xc2   : > { %v2366_v63 = vmax.f32 %v2334_v28, 0.0  ;;  %v626_v60 = vadd.f32 %v550_v58, %v316_v31  ;;  %v828_v1 = vsel %vm768_vm2, %v825_v48, %v827_v54  ;;  %v1006_v50 = vmul.f32 %v3923_v5, %v3952_v17  ;;  %v3132_v54 = vld [vmem:[%s3565_s13 + $0x9c] sm:$0xe] }
  0xc3   : > { %v2367_v7 = vmax.f32 %v2335_v8, 0.0  ;;  %v826_v9 = vsel %vm768_vm2, %v824_v62, %v825_v48  ;;  %v1074_v6 = vunpack.c.l.bf16 %v3048_v57  ;;  %v1117_v11 = vmul.f32 %v3932_v15, %v3946_v10 }
  0xc4   : > { %v2398_v12 = vmin.f32 %v2366_v63, 6.0  ;;  %v903_v13 = vadd.f32 %v826_v9, %v625_v59  ;;  %v904_v14 = vadd.f32 %v828_v1, %v626_v60  ;;  %v1118_v16 = vmul.f32 %v3932_v15, %v3952_v17  ;;  %v361_v9 = vld [vmem:[%s3565_s13 + $0x38] sm:$0x1] }
  0xc5   : > { %v2399_v18 = vmin.f32 %v2367_v7, 6.0  ;;  %v1119_v19 = vmul.f32 %v3932_v15, %v1074_v6  ;;  %v1235_v4 = vrot.slane %v1117_v11, 1  ;;  %v1351_v20 = vunpack.c.l.bf16 %v3065_v3 }
  0xc6   : > { %v2430_v22 = vmul.f32 %v2398_v12, %v2302_v39  ;;  %v1037_v23 = vadd.f32 %v1005_v56, %v903_v13  ;;  %v1038_v24 = vadd.f32 %v1006_v50, %v904_v14  ;;  %v1236_v61 = vrot.slane %v1118_v16, 1 }
  0xc7   : > { %v2431_v25 = vmul.f32 %v2399_v18, %v2303_v44  ;;  %v1238_v26 = vrot.slane %v1119_v19, 1  ;;  %v1394_v29 = vmul.f32 %v3941_v27, %v1351_v20  ;;  %v1395_v30 = vmul.f32 %v3941_v27, %v3952_v17 }
  0xc8   : > { %v2462_v31 = vmul.f32 0.16666667, %v2430_v22  ;;  %v1237_v32 = vsel %vm490_vm1, %v1235_v4, %v1236_v61  ;;  %v1396_v34 = vmul.f32 %v3941_v27, %v1074_v6  ;;  %v1656_v35 = vunpack.c.l.bf16 %v3093_v21  ;;  %v639_v4 = vld [vmem:[%s3565_s13 + $0x30] sm:$0xe] }
  0xc9   : > { %v2463_v2 = vmul.f32 0.16666667, %v2431_v25  ;;  %v1239_v37 = vsel %vm490_vm1, %v1236_v61, %v1238_v26  ;;  %v1314_v39 = vadd.f32 %v1237_v32, %v1037_v23  ;;  %v1512_v40 = vrot.slane %v1394_v29, 2 }
  0xca   : > { %v1315_v42 = vadd.f32 %v1239_v37, %v1038_v24  ;;  %v1513_v53 = vrot.slane %v1395_v30, 2  ;;  %v1515_v44 = vrot.slane %v1396_v34, 2  ;;  %v1657_v46 = vunpack.c.h.bf16 %v3093_v21  ;;  %v3012_v34 = vld [vmem:[%s3565_s13 + $0x3c] sm:$0xff]  }
  0xcb   : > { %v2491_v47 = vpack.c.bf16 %v2463_v2, %v2462_v31  ;;  %v1693_v48 = vmul.f32 %v3957_v45, %v1656_v35  ;;  %v1762_v28 = vunpack.c.l.bf16 %v3115_v36  ;;  %v1805_v52 = vmul.f32 %v3965_v51, %v1656_v35 }
  0xcc   : > { %v1514_v56 = vsel %vm768_vm2, %v1512_v40, %v1513_v53  ;;  %v1516_v57 = vsel %vm768_vm2, %v1513_v53, %v1515_v44  ;;  %v1694_v8 = vmul.f32 %v3957_v45, %v1657_v46  ;;  %v1806_v58 = vmul.f32 %v3965_v51, %v1657_v46 }
  0xcd   : > { %3305 = vmatmul.mubr.msk.bf16.gmra.mrb[4].mxu0 %vm2512_vm3, %v2491_v47  ;;  %v1591_v59 = vadd.f32 %v1514_v56, %v1314_v39  ;;  %v1592_v62 = vadd.f32 %v1516_v57, %v1315_v42  ;;  %v1807_v63 = vmul.f32 %v3965_v51, %v1762_v28  ;;  %v1923_v60 = vrot.slane %v1805_v52, 1 }
  0xce   : > { %v1924_v1 = vrot.slane %v1806_v58, 1  ;;  %v2039_v50 = vunpack.c.l.bf16 %v3132_v54  ;;  %v2083_v3 = vmul.f32 %v3980_v41, %v1657_v46  ;;  %v2084_v7 = vmul.f32 %v3980_v41, %v1762_v28  ;;  %v3041_v54 = vld [vmem:[%s3565_s13 + $0x44] sm:$0x1] }
  0xcf   : > { %v1725_v6 = vadd.f32 %v1693_v48, %v1591_v59  ;;  %v1726_v11 = vadd.f32 %v1694_v8, %v1592_v62  ;;  %v1926_v12 = vrot.slane %v1807_v63, 1  ;;  %v301_v13 = vmul.f32 %v3992_v55, %v3861_v49 }
  0xd0   : > { %v1925_v14 = vsel %vm490_vm1, %v1923_v60, %v1924_v1  ;;  %v2082_v16 = vmul.f32 %v3980_v41, %v2039_v50  ;;  %v2201_v18 = vrot.slane %v2083_v3, 2  ;;  %v2203_v19 = vrot.slane %v2084_v7, 2 }
  0xd1   : > { %v1927_v20 = vsel %vm490_vm1, %v1924_v1, %v1926_v12  ;;  %v2002_v21 = vadd.f32 %v1925_v14, %v1725_v6  ;;  %v302_v22 = vmul.f32 %v3992_v55, %v3866_v0  ;;  %v377_v23 = vunpack.c.l.bf16 %v361_v9  ;;  %v3058_v1 = vld [vmem:[%s3565_s13 + $0x3c] sm:$0xe] }
  0xd2   : > { %v2003_v24 = vadd.f32 %v1927_v20, %v1726_v11  ;;  %v2200_v61 = vrot.slane %v2082_v16, 2  ;;  %v2204_v25 = vsel %vm768_vm2, %v2201_v18, %v2203_v19  ;;  %v406_v26 = vmul.f32 %v3896_v33, %v3861_v49 }
  0xd3   : > { %v407_v29 = vmul.f32 %v3896_v33, %v3866_v0  ;;  %v408_v30 = vmul.f32 %v3896_v33, %v377_v23  ;;  %v655_v31 = vunpack.c.l.bf16 %v639_v4  ;;  %v685_v32 = vmul.f32 %v3908_v43, %v3866_v0  ;;  %v3275_v4 = vld [vmem:[%s3565_s13 + $0x48] sm:$0xff]  }
  0xd4   : > { %v2202_v35 = vsel %vm768_vm2, %v2200_v61, %v2201_v18  ;;  %v2280_v36 = vadd.f32 %v2204_v25, %v2003_v24  ;;  %v511_v2 = vrot.slane %v406_v26, 1  ;;  %v686_v37 = vmul.f32 %v3908_v43, %v377_v23 }
  0xd5   : > { %v2279_v39 = vadd.f32 %v2202_v35, %v2002_v21  ;;  %v512_v40 = vrot.slane %v407_v29, 1  ;;  %v514_v49 = vrot.slane %v408_v30, 1  ;;  %v684_v42 = vmul.f32 %v3908_v43, %v655_v31 }
  0xd6   : > { %v2319_v53 = vadd.f32 %v4007_v38, %v2280_v36  ;;  %v790_v44 = vrot.slane %v685_v32, 2  ;;  %v792_v46 = vrot.slane %v686_v37, 2  ;;  %v954_v47 = vunpack.c.l.bf16 %v3012_v34 }
  0xd7   : > { %v2318_v0 = vadd.f32 %v4007_v38, %v2279_v39  ;;  %v513_v48 = vsel %vm490_vm1, %v511_v2, %v512_v40  ;;  %v515_v28 = vsel %vm490_vm1, %v512_v40, %v514_v49  ;;  %v789_v52 = vrot.slane %v684_v42, 2  ;;  %v3125_v39 = vld [vmem:[%s3565_s13 + $0x48] sm:$0xe] }
  0xd8   : > { %v2351_v56 = vadd.f32 3.0, %v2319_v53  ;;  %v611_v57 = vadd.f32 %v513_v48, %v301_v13  ;;  %v612_v8 = vadd.f32 %v515_v28, %v302_v22  ;;  %v793_v58 = vsel %vm768_vm2, %v790_v44, %v792_v46 }
  0xd9   : > { %v2350_v59 = vadd.f32 3.0, %v2318_v0  ;;  %v791_v62 = vsel %vm768_vm2, %v789_v52, %v790_v44  ;;  %v955_v63 = vunpack.c.h.bf16 %v3012_v34  ;;  %v991_v60 = vmul.f32 %v3923_v5, %v954_v47  ;;  %v3108_v34 = vld [vmem:[%s3565_s13 + $0x50] sm:$0x1] }
  0xda   : > { %v2383_v50 = vmax.f32 %v2351_v56, 0.0  ;;  %v889_v3 = vadd.f32 %v791_v62, %v611_v57  ;;  %v890_v7 = vadd.f32 %v793_v58, %v612_v8  ;;  %v1067_v9 = vunpack.c.l.bf16 %v3041_v54 }
  0xdb   : > { %v2382_v6 = vmax.f32 %v2350_v59, 0.0  ;;  %v992_v11 = vmul.f32 %v3923_v5, %v955_v63  ;;  %v1096_v12 = vmul.f32 %v3932_v15, %v954_v47  ;;  %v1097_v13 = vmul.f32 %v3932_v15, %v955_v63 }
  0xdc   : > { %v2415_v14 = vmin.f32 %v2383_v50, 6.0  ;;  %v1023_v16 = vadd.f32 %v991_v60, %v889_v3  ;;  %v1098_v18 = vmul.f32 %v3932_v15, %v1067_v9  ;;  %v1344_v19 = vunpack.c.l.bf16 %v3058_v1  ;;  %v369_v1 = vld [vmem:[%s3565_s13 + $0x98] sm:$0x1] }
  0xdd   : > { %v2414_v20 = vmin.f32 %v2382_v6, 6.0  ;;  %v1024_v21 = vadd.f32 %v992_v11, %v890_v7  ;;  %v1200_v22 = vrot.slane %v1096_v12, 1  ;;  %v1201_v23 = vrot.slane %v1097_v13, 1 }
  0xde   : > { %v2447_v24 = vmul.f32 %v2415_v14, %v2319_v53  ;;  %v1203_v61 = vrot.slane %v1098_v18, 1  ;;  %v1373_v25 = vmul.f32 %v3941_v27, %v1344_v19  ;;  %v1374_v26 = vmul.f32 %v3941_v27, %v955_v63 }
  0xdf   : > { %v2446_v29 = vmul.f32 %v2414_v20, %v2318_v0  ;;  %v1202_v30 = vsel %vm490_vm1, %v1200_v22, %v1201_v23  ;;  %v1375_v31 = vmul.f32 %v3941_v27, %v1067_v9  ;;  %v4137_v32 = vunpack.c.l.bf16 %v3275_v4 }
  0xe0   : > { %v2479_v35 = vmul.f32 0.16666667, %v2447_v24  ;;  %v1204_v36 = vsel %vm490_vm1, %v1201_v23, %v1203_v61  ;;  %v1300_v2 = vadd.f32 %v1202_v30, %v1023_v16  ;;  %v1477_v37 = vrot.slane %v1373_v25, 2 }
  0xe1   : > { %v2478_v40 = vmul.f32 0.16666667, %v2446_v29  ;;  %v1301_v49 = vadd.f32 %v1204_v36, %v1024_v21  ;;  %v1478_v42 = vrot.slane %v1374_v26, 2  ;;  %v1480_v53 = vrot.slane %v1375_v31, 2  ;;  %v3028_v29 = vld [vmem:[%s3565_s13 + $0x9c] sm:$0xff]  }
  0xe2   : > { %v4142_v44 = vunpack.c.h.bf16 %v3275_v4  ;;  %v1679_v46 = vmul.f32 %v3957_v45, %v4137_v32  ;;  %v1755_v47 = vunpack.c.l.bf16 %v3108_v34  ;;  %v1784_v0 = vmul.f32 %v3965_v51, %v4137_v32  ;;  %v647_v4 = vld [vmem:[%s3565_s13 + $0x90] sm:$0xe] }
  0xe3   : > { %v2499_v48 = vpack.c.bf16 %v2479_v35, %v2478_v40  ;;  %v1479_v28 = vsel %vm768_vm2, %v1477_v37, %v1478_v42  ;;  %v1481_v52 = vsel %vm768_vm2, %v1478_v42, %v1480_v53  ;;  %v2032_v54 = vunpack.c.l.bf16 %v3125_v39 }
  0xe4   : > { %v1577_v56 = vadd.f32 %v1479_v28, %v1300_v2  ;;  %v1578_v57 = vadd.f32 %v1481_v52, %v1301_v49  ;;  %v1680_v8 = vmul.f32 %v3957_v45, %v4142_v44  ;;  %v1785_v58 = vmul.f32 %v3965_v51, %v4142_v44 }
  0xe5   : > { %3321 = vmatmul.mubr.msk.bf16.gmra.mrb[4].mxu1 %vm2512_vm3, %v2499_v48  ;;  %v1786_v59 = vmul.f32 %v3965_v51, %v1755_v47  ;;  %v1888_v62 = vrot.slane %v1784_v0, 1  ;;  %v2061_v63 = vmul.f32 %v3980_v41, %v2032_v54  ;;  %v2062_v60 = vmul.f32 %v3980_v41, %v4142_v44 }
  0xe6   : > { %v1711_v50 = vadd.f32 %v1679_v46, %v1577_v56  ;;  %v1712_v3 = vadd.f32 %v1680_v8, %v1578_v57  ;;  %v1889_v7 = vrot.slane %v1785_v58, 1  ;;  %v2063_v9 = vmul.f32 %v3980_v41, %v1755_v47  ;;  %v3066_v8 = vld [vmem:[%s3565_s13 + $0x9c] sm:$0xe] }
  0xe7   : > { %v1891_v6 = vrot.slane %v1786_v59, 1  ;;  %v2165_v11 = vrot.slane %v2061_v63, 2  ;;  %v2166_v12 = vrot.slane %v2062_v60, 2  ;;  %v317_v13 = vmul.f32 %v3992_v55, %v3946_v10 }
  0xe8   : > { %v1890_v14 = vsel %vm490_vm1, %v1888_v62, %v1889_v7  ;;  %v2168_v16 = vrot.slane %v2063_v9, 2  ;;  %v318_v18 = vmul.f32 %v3992_v55, %v3952_v17  ;;  %v385_v19 = vunpack.c.l.bf16 %v369_v1 }
  0xe9   : > { %v1892_v20 = vsel %vm490_vm1, %v1889_v7, %v1891_v6  ;;  %v1988_v21 = vadd.f32 %v1890_v14, %v1711_v50  ;;  %v2167_v22 = vsel %vm768_vm2, %v2165_v11, %v2166_v12  ;;  %v430_v23 = vmul.f32 %v3896_v33, %v3946_v10 }
  0xea   : > { %v1989_v24 = vadd.f32 %v1892_v20, %v1712_v3  ;;  %v2169_v61 = vsel %vm768_vm2, %v2166_v12, %v2168_v16  ;;  %v431_v25 = vmul.f32 %v3896_v33, %v3952_v17  ;;  %v432_v26 = vmul.f32 %v3896_v33, %v385_v19  ;;  %v3279_v12 = vld [vmem:[%s3565_s13 + $0xa8] sm:$0xff]  }
  0xeb   : > { %v2265_v30 = vadd.f32 %v2167_v22, %v1988_v21  ;;  %v551_v31 = vrot.slane %v430_v23, 1  ;;  %v663_v34 = vunpack.c.l.bf16 %v647_v4  ;;  %v709_v35 = vmul.f32 %v3908_v43, %v3952_v17  ;;  %v3049_v17 = vld [vmem:[%s3565_s13 + $0xa4] sm:$0x1] }
  0xec   : > { %v2266_v36 = vadd.f32 %v2169_v61, %v1989_v24  ;;  %v552_v2 = vrot.slane %v431_v25, 1  ;;  %v554_v37 = vrot.slane %v432_v26, 1  ;;  %v710_v10 = vmul.f32 %v3908_v43, %v385_v19  ;;  %v3116_v25 = vld [vmem:[%s3565_s13 + $0xb0] sm:$0x1] }
  0xed   : > { %v2304_v39 = vadd.f32 %v4007_v38, %v2265_v30  ;;  %v708_v40 = vmul.f32 %v3908_v43, %v663_v34  ;;  %v830_v49 = vrot.slane %v709_v35, 2  ;;  %v970_v33 = vunpack.c.l.bf16 %v3028_v29  ;;  %v3133_v34 = vld [vmem:[%s3565_s13 + $0xa8] sm:$0xe] }
  0xee   : > { %v2305_v42 = vadd.f32 %v4007_v38, %v2266_v36  ;;  %v553_v53 = vsel %vm490_vm1, %v551_v31, %v552_v2  ;;  %v555_v46 = vsel %vm490_vm1, %v552_v2, %v554_v37  ;;  %v832_v47 = vrot.slane %v710_v10, 2 }
  0xef   : > { %v2336_v0 = vadd.f32 3.0, %v2304_v39  ;;  %v627_v48 = vadd.f32 %v553_v53, %v317_v13  ;;  %v628_v28 = vadd.f32 %v555_v46, %v318_v18  ;;  %v829_v52 = vrot.slane %v708_v40, 2 }
  0xf0   : > { %v2337_v54 = vadd.f32 3.0, %v2305_v42  ;;  %v833_v56 = vsel %vm768_vm2, %v830_v49, %v832_v47  ;;  %v971_v43 = vunpack.c.h.bf16 %v3028_v29  ;;  %v1007_v57 = vmul.f32 %v3923_v5, %v970_v33 }
  0xf1   : > { %v2368_v58 = vmax.f32 %v2336_v0, 0.0  ;;  %v831_v59 = vsel %vm768_vm2, %v829_v52, %v830_v49  ;;  %v906_v62 = vadd.f32 %v833_v56, %v628_v28  ;;  %v1075_v63 = vunpack.c.l.bf16 %v3049_v17  ;;  %v234_v28 = vld [vmem:[%s3565_s13 + $0x3c] sm:$0xff]  }
  0xf2   : > { %v2369_v60 = vmax.f32 %v2337_v54, 0.0  ;;  %v905_v1 = vadd.f32 %v831_v59, %v627_v48  ;;  %v1008_v50 = vmul.f32 %v3923_v5, %v971_v43  ;;  %v1120_v3 = vmul.f32 %v3932_v15, %v970_v33 }
  0xf3   : > { %v2400_v7 = vmin.f32 %v2368_v58, 6.0  ;;  %v1121_v9 = vmul.f32 %v3932_v15, %v971_v43  ;;  %v1122_v6 = vmul.f32 %v3932_v15, %v1075_v63  ;;  %v1352_v11 = vunpack.c.l.bf16 %v3066_v8 }
  0xf4   : > { %v2401_v13 = vmin.f32 %v2369_v60, 6.0  ;;  %v1039_v14 = vadd.f32 %v1007_v57, %v905_v1  ;;  %v1040_v16 = vadd.f32 %v1008_v50, %v906_v62  ;;  %v1240_v18 = vrot.slane %v1120_v3, 1  ;;  %v362_v62 = vld [vmem:[%s3565_s13 + $0x44] sm:$0x1] }
  0xf5   : > { %v2432_v19 = vmul.f32 %v2400_v7, %v2304_v39  ;;  %v1241_v4 = vrot.slane %v1121_v9, 1  ;;  %v1243_v20 = vrot.slane %v1122_v6, 1  ;;  %v1397_v21 = vmul.f32 %v3941_v27, %v1352_v11 }
  0xf6   : > { %v2433_v22 = vmul.f32 %v2401_v13, %v2305_v42  ;;  %v1398_v23 = vmul.f32 %v3941_v27, %v971_v43  ;;  %v1399_v24 = vmul.f32 %v3941_v27, %v1075_v63  ;;  %v4197_v61 = vunpack.c.l.bf16 %v3279_v12 }
  0xf7   : > { %v2464_v26 = vmul.f32 0.16666667, %v2432_v19  ;;  %v1242_v29 = vsel %vm490_vm1, %v1240_v18, %v1241_v4  ;;  %v1244_v30 = vsel %vm490_vm1, %v1241_v4, %v1243_v20  ;;  %v1517_v31 = vrot.slane %v1397_v21, 2 }
  0xf8   : > { %v2465_v35 = vmul.f32 0.16666667, %v2433_v22  ;;  %v1316_v36 = vadd.f32 %v1242_v29, %v1039_v14  ;;  %v1317_v2 = vadd.f32 %v1244_v30, %v1040_v16  ;;  %v1518_v37 = vrot.slane %v1398_v23, 2  ;;  %v640_v16 = vld [vmem:[%s3565_s13 + $0x3c] sm:$0xe] }
  0xf9   : > { %v1520_v10 = vrot.slane %v1399_v24, 2  ;;  %v4203_v39 = vunpack.c.h.bf16 %v3279_v12  ;;  %v1695_v40 = vmul.f32 %v3957_v45, %v4197_v61  ;;  %v1763_v49 = vunpack.c.l.bf16 %v3116_v25  ;;  %v4233_v22 = vld [vmem:[%s4796_s1 + $0x1] ss:$0 sm:$0xff]  ;;  %v4241_v30 = vld [vmem:[%s4796_s1 + $0x2] ss:$0 sm:$0xff] }
  0xfa   : > { %v2492_v33 = vpack.c.bf16 %v2465_v35, %v2464_v26  ;;  %v1519_v42 = vsel %vm768_vm2, %v1517_v31, %v1518_v37  ;;  %v1808_v53 = vmul.f32 %v3965_v51, %v4197_v61  ;;  %v2040_v46 = vunpack.c.l.bf16 %v3133_v34 }
  0xfb   : > { %v1521_v47 = vsel %vm768_vm2, %v1518_v37, %v1520_v10  ;;  %v1593_v17 = vadd.f32 %v1519_v42, %v1316_v36  ;;  %v1696_v0 = vmul.f32 %v3957_v45, %v4203_v39  ;;  %v1809_v48 = vmul.f32 %v3965_v51, %v4203_v39  ;;  %v3042_v42 = vld [vmem:[%s3565_s13 + $0x50] sm:$0x1] }
  0xfc   : > { %3308 = vmatprep.mubr.msk.bf16.mxu0 %vm2512_vm3, %v2492_v33  ;;  %v1594_v52 = vadd.f32 %v1521_v47, %v1317_v2  ;;  %v1810_v54 = vmul.f32 %v3965_v51, %v1763_v49  ;;  %v1928_v56 = vrot.slane %v1808_v53, 1  ;;  %v2085_v43 = vmul.f32 %v3980_v41, %v2040_v46 }
  0xfd   : > { %v1727_v57 = vadd.f32 %v1695_v40, %v1593_v17  ;;  %v1929_v8 = vrot.slane %v1809_v48, 1  ;;  %v2086_v58 = vmul.f32 %v3980_v41, %v4203_v39  ;;  %v2087_v59 = vmul.f32 %v3980_v41, %v1763_v49 }
  0xfe   : > { %v1728_v63 = vadd.f32 %v1696_v0, %v1594_v52  ;;  %v1931_v60 = vrot.slane %v1810_v54, 1  ;;  %v2205_v1 = vrot.slane %v2085_v43, 2  ;;  %v266_v50 = vunpack.c.l.bf16 %v234_v28  ;;  %v4257_v43 = vld [vmem:[%s4796_s1 + $0x3] ss:$0 sm:$0xff] }
  0xff   : > { %v1930_v3 = vsel %vm490_vm1, %v1928_v56, %v1929_v8  ;;  %v2206_v7 = vrot.slane %v2086_v58, 2  ;;  %v2208_v9 = vrot.slane %v2087_v59, 2  ;;  %v267_v6 = vunpack.c.h.bf16 %v234_v28  ;;  %v3059_v58 = vld [vmem:[%s3565_s13 + $0x48] sm:$0xe] }
 0x100   : > { %v1932_v11 = vsel %vm490_vm1, %v1929_v8, %v1931_v60  ;;  %v2004_v12 = vadd.f32 %v1930_v3, %v1727_v57  ;;  %v303_v13 = vmul.f32 %v3992_v55, %v266_v50  ;;  %v378_v14 = vunpack.c.l.bf16 %v362_v62 }
 0x101   : > { %v2005_v18 = vadd.f32 %v1932_v11, %v1728_v63  ;;  %v2207_v19 = vsel %vm768_vm2, %v2205_v1, %v2206_v7  ;;  %v2209_v4 = vsel %vm768_vm2, %v2206_v7, %v2208_v9  ;;  %v304_v20 = vmul.f32 %v3992_v55, %v267_v6 }
 0x102   : > { %v2281_v21 = vadd.f32 %v2207_v19, %v2004_v12  ;;  %v409_v23 = vmul.f32 %v4233_v22, %v266_v50  ;;  %v410_v24 = vmul.f32 %v4233_v22, %v267_v6  ;;  %v411_v25 = vmul.f32 %v4233_v22, %v378_v14  ;;  %v4268_v50 = vld [vmem:[%s4796_s1 + $0x4] ss:$0 sm:$0xff] }
 0x103   : > { %v2282_v26 = vadd.f32 %v2209_v4, %v2005_v18  ;;  %v656_v29 = vunpack.c.l.bf16 %v640_v16  ;;  %v688_v31 = vmul.f32 %v4241_v30, %v267_v6  ;;  %v689_v34 = vmul.f32 %v4241_v30, %v378_v14 }
 0x104   : > { %v2320_v35 = vadd.f32 %v4007_v38, %v2281_v21  ;;  %v516_v36 = vrot.slane %v409_v23, 1  ;;  %v517_v2 = vrot.slane %v410_v24, 1  ;;  %v519_v37 = vrot.slane %v411_v25, 1 }
 0x105   : > { %v2321_v10 = vadd.f32 %v4007_v38, %v2282_v26  ;;  %v687_v40 = vmul.f32 %v4241_v30, %v656_v29  ;;  %v795_v49 = vrot.slane %v688_v31, 2  ;;  %v797_v33 = vrot.slane %v689_v34, 2  ;;  %v3109_v31 = vld [vmem:[%s3565_s13 + $0x5c] sm:$0x1]  ;;  %v3126_v34 = vld [vmem:[%s3565_s13 + $0x54] sm:$0xe] }
 0x106   : > { %v2352_v53 = vadd.f32 3.0, %v2320_v35  ;;  %v518_v46 = vsel %vm490_vm1, %v516_v36, %v517_v2  ;;  %v520_v47 = vsel %vm490_vm1, %v517_v2, %v519_v37  ;;  %v993_v17 = vmul.f32 %v3923_v5, %v4137_v32 }
 0x107   : > { %v2353_v0 = vadd.f32 3.0, %v2321_v10  ;;  %v613_v48 = vadd.f32 %v518_v46, %v303_v13  ;;  %v614_v28 = vadd.f32 %v520_v47, %v304_v20  ;;  %v794_v52 = vrot.slane %v687_v40, 2  ;;  %v3081_v13 = vld [vmem:[%s3565_s13 + $0x54] sm:$0xff]   ;;  %v4278_v20 = vld [vmem:[%s4796_s1 + $0x5] ss:$0 sm:$0xff] }
 0x108   : > { %v2384_v54 = vmax.f32 %v2352_v53, 0.0  ;;  %v798_v56 = vsel %vm768_vm2, %v795_v49, %v797_v33  ;;  %v994_v57 = vmul.f32 %v4257_v43, %v4142_v44  ;;  %v1068_v8 = vunpack.c.l.bf16 %v3042_v42 }
 0x109   : > { %v2385_v59 = vmax.f32 %v2353_v0, 0.0  ;;  %v796_v5 = vsel %vm768_vm2, %v794_v52, %v795_v49  ;;  %v892_v62 = vadd.f32 %v798_v56, %v614_v28  ;;  %v1099_v63 = vmul.f32 %v3932_v15, %v4137_v32  ;;  %v4294_v0 = vld [vmem:[%s4796_s1 + $0x6] ss:$0 sm:$0xff] }
 0x10a   : > { %v2416_v60 = vmin.f32 %v2384_v54, 6.0  ;;  %v891_v1 = vadd.f32 %v796_v5, %v613_v48  ;;  %v1100_v3 = vmul.f32 %v4268_v50, %v4142_v44  ;;  %v1101_v7 = vmul.f32 %v4268_v50, %v1068_v8 }
 0x10b   : > { %v2417_v9 = vmin.f32 %v2385_v59, 6.0  ;;  %v1026_v6 = vadd.f32 %v994_v57, %v892_v62  ;;  %v1205_v11 = vrot.slane %v1099_v63, 1  ;;  %v1345_v12 = vunpack.c.l.bf16 %v3059_v58  ;;  %v4310_v59 = vld [vmem:[%s4796_s1 + $0x8] ss:$0 sm:$0xff] }
 0x10c   : > { %v2448_v15 = vmul.f32 %v2416_v60, %v2320_v35  ;;  %v1025_v14 = vadd.f32 %v993_v17, %v891_v1  ;;  %v1206_v16 = vrot.slane %v1100_v3, 1  ;;  %v1208_v18 = vrot.slane %v1101_v7, 1  ;;  %v370_v7 = vld [vmem:[%s3565_s13 + $0xa4] sm:$0x1] }
 0x10d   : > { %v2449_v19 = vmul.f32 %v2417_v9, %v2321_v10  ;;  %v1376_v4 = vmul.f32 %v3941_v27, %v1345_v12  ;;  %v1377_v21 = vmul.f32 %v4278_v20, %v4142_v44  ;;  %v1378_v23 = vmul.f32 %v4278_v20, %v1068_v8 }
 0x10e   : > { %v2480_v24 = vmul.f32 0.16666667, %v2448_v15  ;;  %v1207_v25 = vsel %vm490_vm1, %v1205_v11, %v1206_v16  ;;  %v1209_v26 = vsel %vm490_vm1, %v1206_v16, %v1208_v18  ;;  %v1644_v29 = vunpack.c.l.bf16 %v3081_v13  ;;  %v648_v16 = vld [vmem:[%s3565_s13 + $0x9c] sm:$0xe] }
 0x10f   : > { %v2481_v35 = vmul.f32 0.16666667, %v2449_v19  ;;  %v1302_v27 = vadd.f32 %v1207_v25, %v1025_v14  ;;  %v1303_v36 = vadd.f32 %v1209_v26, %v1026_v6  ;;  %v1482_v2 = vrot.slane %v1376_v4, 2 }
 0x110   : > { %v1483_v37 = vrot.slane %v1377_v21, 2  ;;  %v1485_v10 = vrot.slane %v1378_v23, 2  ;;  %v1645_v40 = vunpack.c.h.bf16 %v3081_v13  ;;  %v1681_v49 = vmul.f32 %v3957_v45, %v1644_v29  ;;  %v4300_v45 = vld [vmem:[%s4796_s1 + $0x7] ss:$0 sm:$0xff] }
 0x111   : > { %v2500_v33 = vpack.c.bf16 %v2481_v35, %v2480_v24  ;;  %v1756_v42 = vunpack.c.l.bf16 %v3109_v31  ;;  %v1787_v53 = vmul.f32 %v3965_v51, %v1644_v29  ;;  %v2033_v46 = vunpack.c.l.bf16 %v3126_v34  ;;  %v250_v51 = vld [vmem:[%s3565_s13 + $0x9c] sm:$0xff]  }
 0x112   : > { %v1484_v47 = vsel %vm768_vm2, %v1482_v2, %v1483_v37  ;;  %v1486_v17 = vsel %vm768_vm2, %v1483_v37, %v1485_v10  ;;  %v1682_v48 = vmul.f32 %v4294_v0, %v1645_v40  ;;  %v1788_v28 = vmul.f32 %v4300_v45, %v1645_v40  ;;  %v4324_v24 = vld [vmem:[%s4796_s1] ss:$0 sm:$0xff] }
 0x113   : > { %3324 = vmatprep.mubr.msk.bf16.mxu1 %vm2512_vm3, %v2500_v33  ;;  %v1579_v52 = vadd.f32 %v1484_v47, %v1302_v27  ;;  %v1580_v54 = vadd.f32 %v1486_v17, %v1303_v36  ;;  %v1789_v56 = vmul.f32 %v4300_v45, %v1756_v42  ;;  %v1893_v57 = vrot.slane %v1787_v53, 1  ;;  %v4336_v10 = vld [vmem:[%s4797_s2] ss:$0 sm:$0xff]  ;;  %v3050_v17 = vld [vmem:[%s3565_s13 + $0xb0] sm:$0x1] }
 0x114   : > { %v1894_v8 = vrot.slane %v1788_v28, 1  ;;  %v2064_v58 = vmul.f32 %v3980_v41, %v2033_v46  ;;  %v2065_v5 = vmul.f32 %v4310_v59, %v1645_v40  ;;  %v2066_v62 = vmul.f32 %v4310_v59, %v1756_v42 }
 0x115   : > { %v1713_v63 = vadd.f32 %v1681_v49, %v1579_v52  ;;  %v1714_v60 = vadd.f32 %v1682_v48, %v1580_v54  ;;  %v1896_v1 = vrot.slane %v1789_v56, 1  ;;  %v282_v3 = vunpack.c.l.bf16 %v250_v51 }
 0x116   : > { %v1895_v9 = vsel %vm490_vm1, %v1893_v57, %v1894_v8  ;;  %v2170_v6 = vrot.slane %v2064_v58, 2  ;;  %v2171_v11 = vrot.slane %v2065_v5, 2  ;;  %v2173_v41 = vrot.slane %v2066_v62, 2  ;;  %v3067_v58 = vld [vmem:[%s3565_s13 + $0xa8] sm:$0xe] }
 0x117   : > { %v1897_v12 = vsel %vm490_vm1, %v1894_v8, %v1896_v1  ;;  %v1990_v13 = vadd.f32 %v1895_v9, %v1713_v63  ;;  %v283_v15 = vunpack.c.h.bf16 %v250_v51  ;;  %v319_v14 = vmul.f32 %v3992_v55, %v282_v3 }
 0x118   : > { %v1991_v18 = vadd.f32 %v1897_v12, %v1714_v60  ;;  %v2172_v19 = vsel %vm768_vm2, %v2170_v6, %v2171_v11  ;;  %v2174_v4 = vsel %vm768_vm2, %v2171_v11, %v2173_v41  ;;  %v386_v21 = vunpack.c.l.bf16 %v370_v7 }
 0x119   : > { %v2267_v23 = vadd.f32 %v2172_v19, %v1990_v13  ;;  %v320_v25 = vmul.f32 %v4324_v24, %v283_v15  ;;  %v433_v26 = vmul.f32 %v4233_v22, %v282_v3  ;;  %v434_v29 = vmul.f32 %v4233_v22, %v283_v15  ;;  %v3097_v13 = vld [vmem:[%s3565_s13 + $0xb4] sm:$0xff]  }
 0x11a   : > { %v2268_v55 = vadd.f32 %v2174_v4, %v1991_v18  ;;  %v435_v31 = vmul.f32 %v4233_v22, %v386_v21  ;;  %v664_v34 = vunpack.c.l.bf16 %v648_v16  ;;  %v712_v35 = vmul.f32 %v4241_v30, %v283_v15 }
 0x11b   : > { %v2306_v27 = vadd.f32 %v4007_v38, %v2267_v23  ;;  %v556_v36 = vrot.slane %v433_v26, 1  ;;  %v557_v2 = vrot.slane %v434_v29, 1  ;;  %v713_v37 = vmul.f32 %v4241_v30, %v386_v21 }
 0x11c   : > { %v2307_v40 = vadd.f32 %v4336_v10, %v2268_v55  ;;  %v559_v49 = vrot.slane %v435_v31, 1  ;;  %v711_v33 = vmul.f32 %v4241_v30, %v664_v34  ;;  %v835_v42 = vrot.slane %v712_v35, 2  ;;  %v3117_v31 = vld [vmem:[%s3565_s13 + $0xbc] sm:$0x1] }
 0x11d   : > { %v2338_v53 = vadd.f32 3.0, %v2306_v27  ;;  %v558_v46 = vsel %vm490_vm1, %v556_v36, %v557_v2  ;;  %v837_v38 = vrot.slane %v713_v37, 2  ;;  %v1009_v47 = vmul.f32 %v4257_v43, %v4197_v61 }
 0x11e   : > { %v2339_v48 = vadd.f32 3.0, %v2307_v40  ;;  %v560_v28 = vsel %vm490_vm1, %v557_v2, %v559_v49  ;;  %v629_v51 = vadd.f32 %v558_v46, %v319_v14  ;;  %v834_v52 = vrot.slane %v711_v33, 2 }
 0x11f   : > { %v2370_v54 = vmax.f32 %v2338_v53, 0.0  ;;  %v630_v56 = vadd.f32 %v560_v28, %v320_v25  ;;  %v838_v57 = vsel %vm768_vm2, %v835_v42, %v837_v38  ;;  %v1010_v8 = vmul.f32 %v4257_v43, %v4203_v39  ;;  %v3134_v38 = vld [vmem:[%s3565_s13 + $0xb4] sm:$0xe] }
 0x120   : > { %v2371_v5 = vmax.f32 %v2339_v48, 0.0  ;;  %v836_v62 = vsel %vm768_vm2, %v834_v52, %v835_v42  ;;  %v1076_v63 = vunpack.c.l.bf16 %v3050_v17  ;;  %v1123_v60 = vmul.f32 %v4268_v50, %v4197_v61 }
 0x121   : > { %v2402_v1 = vmin.f32 %v2370_v54, 6.0  ;;  %v907_v3 = vadd.f32 %v836_v62, %v629_v51  ;;  %v908_v7 = vadd.f32 %v838_v57, %v630_v56  ;;  %v1124_v9 = vmul.f32 %v4268_v50, %v4203_v39  ;;  %v363_v62 = vld [vmem:[%s3565_s13 + $0x50] sm:$0x1] }
 0x122   : > { %v2403_v6 = vmin.f32 %v2371_v5, 6.0  ;;  %v1125_v11 = vmul.f32 %v4268_v50, %v1076_v63  ;;  %v1245_v41 = vrot.slane %v1123_v60, 1  ;;  %v1353_v12 = vunpack.c.l.bf16 %v3067_v58 }
 0x123   : > { %v2434_v15 = vmul.f32 %v2402_v1, %v2306_v27  ;;  %v1041_v14 = vadd.f32 %v1009_v47, %v907_v3  ;;  %v1042_v16 = vadd.f32 %v1010_v8, %v908_v7  ;;  %v1246_v18 = vrot.slane %v1124_v9, 1 }
 0x124   : > { %v2435_v19 = vmul.f32 %v2403_v6, %v2307_v40  ;;  %v1248_v4 = vrot.slane %v1125_v11, 1  ;;  %v1400_v21 = vmul.f32 %v4278_v20, %v1353_v12  ;;  %v1401_v23 = vmul.f32 %v4278_v20, %v4203_v39 }
 0x125   : > { %v2466_v25 = vmul.f32 0.16666667, %v2434_v15  ;;  %v1247_v26 = vsel %vm490_vm1, %v1245_v41, %v1246_v18  ;;  %v1402_v29 = vmul.f32 %v4278_v20, %v1076_v63  ;;  %v1660_v55 = vunpack.c.l.bf16 %v3097_v13  ;;  %v641_v41 = vld [vmem:[%s3565_s13 + $0x48] sm:$0xe] }
 0x126   : > { %v2467_v34 = vmul.f32 0.16666667, %v2435_v19  ;;  %v1249_v35 = vsel %vm490_vm1, %v1246_v18, %v1248_v4  ;;  %v1318_v27 = vadd.f32 %v1247_v26, %v1041_v14  ;;  %v1522_v36 = vrot.slane %v1400_v21, 2 }
 0x127   : > { %v1319_v2 = vadd.f32 %v1249_v35, %v1042_v16  ;;  %v1523_v37 = vrot.slane %v1401_v23, 2  ;;  %v1525_v40 = vrot.slane %v1402_v29, 2  ;;  %v1661_v49 = vunpack.c.h.bf16 %v3097_v13  ;;  %v3016_v29 = vld [vmem:[%s3565_s13 + $0x54] sm:$0xff]  }
 0x128   : > { %v2493_v33 = vpack.c.bf16 %v2467_v34, %v2466_v25  ;;  %v1697_v42 = vmul.f32 %v4294_v0, %v1660_v55  ;;  %v1764_v53 = vunpack.c.l.bf16 %v3117_v31  ;;  %v1811_v46 = vmul.f32 %v4300_v45, %v1660_v55 }
 0x129   : > { %v1524_v47 = vsel %vm768_vm2, %v1522_v36, %v1523_v37  ;;  %v1526_v17 = vsel %vm768_vm2, %v1523_v37, %v1525_v40  ;;  %v1698_v48 = vmul.f32 %v4294_v0, %v1661_v49  ;;  %v1812_v28 = vmul.f32 %v4300_v45, %v1661_v49 }
 0x12a   : > { %3309 = vmatmul.mubr.msk.bf16.gmra.mrb[8].mxu0 %vm2512_vm3, %v2493_v33  ;;  %v1595_v51 = vadd.f32 %v1524_v47, %v1318_v27  ;;  %v1596_v52 = vadd.f32 %v1526_v17, %v1319_v2  ;;  %v1813_v54 = vmul.f32 %v4300_v45, %v1764_v53  ;;  %v1933_v56 = vrot.slane %v1811_v46, 1 }
 0x12b   : > { %v1934_v57 = vrot.slane %v1812_v28, 1  ;;  %v2041_v8 = vunpack.c.l.bf16 %v3134_v38  ;;  %v2089_v58 = vmul.f32 %v4310_v59, %v1661_v49  ;;  %v2090_v5 = vmul.f32 %v4310_v59, %v1764_v53  ;;  %v3043_v38 = vld [vmem:[%s3565_s13 + $0x5c] sm:$0x1] }
 0x12c   : > { %v1729_v63 = vadd.f32 %v1697_v42, %v1595_v51  ;;  %v1730_v60 = vadd.f32 %v1698_v48, %v1596_v52  ;;  %v1936_v1 = vrot.slane %v1813_v54, 1  ;;  %v305_v3 = vmul.f32 %v4324_v24, %v4137_v32 }
 0x12d   : > { %v1935_v7 = vsel %vm490_vm1, %v1933_v56, %v1934_v57  ;;  %v2088_v9 = vmul.f32 %v4310_v59, %v2041_v8  ;;  %v2211_v6 = vrot.slane %v2089_v58, 2  ;;  %v2213_v11 = vrot.slane %v2090_v5, 2 }
 0x12e   : > { %v1937_v12 = vsel %vm490_vm1, %v1934_v57, %v1936_v1  ;;  %v2006_v13 = vadd.f32 %v1935_v7, %v1729_v63  ;;  %v306_v15 = vmul.f32 %v4324_v24, %v4142_v44  ;;  %v379_v14 = vunpack.c.l.bf16 %v363_v62  ;;  %v3060_v57 = vld [vmem:[%s3565_s13 + $0x54] sm:$0xe] }
 0x12f   : > { %v2007_v16 = vadd.f32 %v1937_v12, %v1730_v60  ;;  %v2210_v18 = vrot.slane %v2088_v9, 2  ;;  %v2214_v19 = vsel %vm768_vm2, %v2211_v6, %v2213_v11  ;;  %v412_v4 = vmul.f32 %v4233_v22, %v4137_v32 }
 0x130   : > { %v413_v21 = vmul.f32 %v4233_v22, %v4142_v44  ;;  %v414_v23 = vmul.f32 %v4233_v22, %v379_v14  ;;  %v657_v25 = vunpack.c.l.bf16 %v641_v41  ;;  %v691_v26 = vmul.f32 %v4241_v30, %v4142_v44  ;;  %v3276_v41 = vld [vmem:[%s3565_s13 + $0x60] sm:$0xff]  }
 0x131   : > { %v2212_v55 = vsel %vm768_vm2, %v2210_v18, %v2211_v6  ;;  %v2284_v31 = vadd.f32 %v2214_v19, %v2007_v16  ;;  %v521_v34 = vrot.slane %v412_v4, 1  ;;  %v692_v35 = vmul.f32 %v4241_v30, %v379_v14 }
 0x132   : > { %v2283_v27 = vadd.f32 %v2212_v55, %v2006_v13  ;;  %v522_v36 = vrot.slane %v413_v21, 1  ;;  %v524_v32 = vrot.slane %v414_v23, 1  ;;  %v690_v2 = vmul.f32 %v4241_v30, %v657_v25 }
 0x133   : > { %v2323_v37 = vadd.f32 %v4336_v10, %v2284_v31  ;;  %v800_v40 = vrot.slane %v691_v26, 2  ;;  %v802_v49 = vrot.slane %v692_v35, 2  ;;  %v958_v33 = vunpack.c.l.bf16 %v3016_v29 }
 0x134   : > { %v2322_v44 = vadd.f32 %v4336_v10, %v2283_v27  ;;  %v523_v42 = vsel %vm490_vm1, %v521_v34, %v522_v36  ;;  %v525_v53 = vsel %vm490_vm1, %v522_v36, %v524_v32  ;;  %v799_v46 = vrot.slane %v690_v2, 2  ;;  %v3127_v27 = vld [vmem:[%s3565_s13 + $0x60] sm:$0xe] }
 0x135   : > { %v2355_v47 = vadd.f32 3.0, %v2323_v37  ;;  %v615_v17 = vadd.f32 %v523_v42, %v305_v3  ;;  %v616_v48 = vadd.f32 %v525_v53, %v306_v15  ;;  %v803_v28 = vsel %vm768_vm2, %v800_v40, %v802_v49 }
 0x136   : > { %v2354_v51 = vadd.f32 3.0, %v2322_v44  ;;  %v801_v52 = vsel %vm768_vm2, %v799_v46, %v800_v40  ;;  %v959_v54 = vunpack.c.h.bf16 %v3016_v29  ;;  %v995_v56 = vmul.f32 %v4257_v43, %v958_v33  ;;  %v3110_v29 = vld [vmem:[%s3565_s13 + $0x68] sm:$0x1] }
 0x137   : > { %v2387_v8 = vmax.f32 %v2355_v47, 0.0  ;;  %v893_v58 = vadd.f32 %v801_v52, %v615_v17  ;;  %v894_v5 = vadd.f32 %v803_v28, %v616_v48  ;;  %v1069_v62 = vunpack.c.l.bf16 %v3043_v38 }
 0x138   : > { %v2386_v63 = vmax.f32 %v2354_v51, 0.0  ;;  %v996_v60 = vmul.f32 %v4257_v43, %v959_v54  ;;  %v1102_v1 = vmul.f32 %v4268_v50, %v958_v33  ;;  %v1103_v3 = vmul.f32 %v4268_v50, %v959_v54 }
 0x139   : > { %v2419_v7 = vmin.f32 %v2387_v8, 6.0  ;;  %v1027_v9 = vadd.f32 %v995_v56, %v893_v58  ;;  %v1104_v6 = vmul.f32 %v4268_v50, %v1069_v62  ;;  %v1346_v11 = vunpack.c.l.bf16 %v3060_v57  ;;  %v371_v57 = vld [vmem:[%s3565_s13 + $0xb0] sm:$0x1] }
 0x13a   : > { %v2418_v12 = vmin.f32 %v2386_v63, 6.0  ;;  %v1028_v13 = vadd.f32 %v996_v60, %v894_v5  ;;  %v1210_v15 = vrot.slane %v1102_v1, 1  ;;  %v1211_v14 = vrot.slane %v1103_v3, 1 }
 0x13b   : > { %v2451_v16 = vmul.f32 %v2419_v7, %v2323_v37  ;;  %v1213_v18 = vrot.slane %v1104_v6, 1  ;;  %v1379_v19 = vmul.f32 %v4278_v20, %v1346_v11  ;;  %v1380_v4 = vmul.f32 %v4278_v20, %v959_v54 }
 0x13c   : > { %v2450_v21 = vmul.f32 %v2418_v12, %v2322_v44  ;;  %v1212_v23 = vsel %vm490_vm1, %v1210_v15, %v1211_v14  ;;  %v1381_v25 = vmul.f32 %v4278_v20, %v1069_v62  ;;  %v4413_v26 = vunpack.c.l.bf16 %v3276_v41 }
 0x13d   : > { %v2483_v55 = vmul.f32 0.16666667, %v2451_v16  ;;  %v1214_v31 = vsel %vm490_vm1, %v1211_v14, %v1213_v18  ;;  %v1304_v34 = vadd.f32 %v1212_v23, %v1027_v9  ;;  %v1487_v35 = vrot.slane %v1379_v19, 2 }
 0x13e   : > { %v2482_v36 = vmul.f32 0.16666667, %v2450_v21  ;;  %v1305_v32 = vadd.f32 %v1214_v31, %v1028_v13  ;;  %v1488_v2 = vrot.slane %v1380_v4, 2  ;;  %v1490_v37 = vrot.slane %v1381_v25, 2  ;;  %v649_v13 = vld [vmem:[%s3565_s13 + $0xa8] sm:$0xe] }
 0x13f   : > { %v4418_v40 = vunpack.c.h.bf16 %v3276_v41  ;;  %v1683_v49 = vmul.f32 %v4294_v0, %v4413_v26  ;;  %v1757_v33 = vunpack.c.l.bf16 %v3110_v29  ;;  %v1790_v44 = vmul.f32 %v4300_v45, %v4413_v26 }
 0x140   : > { %v2501_v42 = vpack.c.bf16 %v2483_v55, %v2482_v36  ;;  %v1489_v53 = vsel %vm768_vm2, %v1487_v35, %v1488_v2  ;;  %v1491_v46 = vsel %vm768_vm2, %v1488_v2, %v1490_v37  ;;  %v2034_v38 = vunpack.c.l.bf16 %v3127_v27  ;;  %v3032_v55 = vld [vmem:[%s3565_s13 + $0xb4] sm:$0xff]  }
 0x141   : > { %v1581_v47 = vadd.f32 %v1489_v53, %v1304_v34  ;;  %v1582_v17 = vadd.f32 %v1491_v46, %v1305_v32  ;;  %v1684_v48 = vmul.f32 %v4294_v0, %v4418_v40  ;;  %v1791_v28 = vmul.f32 %v4300_v45, %v4418_v40 }
 0x142   : > { %3325 = vmatmul.mubr.msk.bf16.gmra.mrb[8].mxu1 %vm2512_vm3, %v2501_v42  ;;  %v1792_v51 = vmul.f32 %v4300_v45, %v1757_v33  ;;  %v1898_v52 = vrot.slane %v1790_v44, 1  ;;  %v2067_v54 = vmul.f32 %v4310_v59, %v2034_v38  ;;  %v2068_v56 = vmul.f32 %v4310_v59, %v4418_v40 }
 0x143   : > { %v1715_v8 = vadd.f32 %v1683_v49, %v1581_v47  ;;  %v1716_v58 = vadd.f32 %v1684_v48, %v1582_v17  ;;  %v1899_v5 = vrot.slane %v1791_v28, 1  ;;  %v2069_v62 = vmul.f32 %v4310_v59, %v1757_v33  ;;  %v4437_v63 = vpop.f32.mrb[0].mxu0 }
 0x144   : > { %v1901_v60 = vrot.slane %v1792_v51, 1  ;;  %v2175_v1 = vrot.slane %v2067_v54, 2  ;;  %v2176_v3 = vrot.slane %v2068_v56, 2  ;;  %v321_v7 = vmul.f32 %v4324_v24, %v4197_v61  ;;  %v4441_v9 = vpop.f32.mrb[1].mxu0 }
 0x145   : > { %v1900_v6 = vsel %vm490_vm1, %v1898_v52, %v1899_v5  ;;  %v2178_v11 = vrot.slane %v2069_v62, 2  ;;  %v322_v41 = vmul.f32 %v4324_v24, %v4203_v39  ;;  %v387_v12 = vunpack.c.l.bf16 %v371_v57  ;;  %v4447_v15 = vpop.f32.mrb[2].mxu0  ;;  %v3068_v57 = vld [vmem:[%s3565_s13 + $0xb4] sm:$0xe] }
 0x146   : > { %v1902_v14 = vsel %vm490_vm1, %v1899_v5, %v1901_v60  ;;  %v1992_v16 = vadd.f32 %v1900_v6, %v1715_v8  ;;  %v2177_v18 = vsel %vm768_vm2, %v2175_v1, %v2176_v3  ;;  %v436_v19 = vmul.f32 %v4233_v22, %v4197_v61  ;;  %v4453_v4 = vpop.f32.mrb[3].mxu0 }
 0x147   : > { %v1993_v21 = vadd.f32 %v1902_v14, %v1716_v58  ;;  %v2179_v23 = vsel %vm768_vm2, %v2176_v3, %v2178_v11  ;;  %v437_v25 = vmul.f32 %v4233_v22, %v4203_v39  ;;  %v438_v29 = vmul.f32 %v4233_v22, %v387_v12 }
 0x148   : > { %v2269_v31 = vadd.f32 %v2177_v18, %v1992_v16  ;;  %v561_v34 = vrot.slane %v436_v19, 1  ;;  %v665_v35 = vunpack.c.l.bf16 %v649_v13  ;;  %v715_v27 = vmul.f32 %v4241_v30, %v4203_v39  ;;  %v3051_v39 = vld [vmem:[%s3565_s13 + $0xbc] sm:$0x1]  ;;  %v3280_v13 = vld [vmem:[%s3565_s13 + $0xc0] sm:$0xff]  }
 0x149   : > { %v2270_v36 = vadd.f32 %v2179_v23, %v1993_v21  ;;  %v562_v61 = vrot.slane %v437_v25, 1  ;;  %v564_v32 = vrot.slane %v438_v29, 1  ;;  %v716_v2 = vmul.f32 %v4241_v30, %v387_v12 }
 0x14a   : > { %v2308_v37 = vadd.f32 %v4336_v10, %v2269_v31  ;;  %v714_v49 = vmul.f32 %v4241_v30, %v665_v35  ;;  %v840_v33 = vrot.slane %v715_v27, 2  ;;  %v974_v44 = vunpack.c.l.bf16 %v3032_v55  ;;  %v3118_v27 = vld [vmem:[%s3565_s13 + $0xc8] sm:$0x1] }
 0x14b   : > { %v2309_v42 = vadd.f32 %v4336_v10, %v2270_v36  ;;  %v563_v53 = vsel %vm490_vm1, %v561_v34, %v562_v61  ;;  %v565_v46 = vsel %vm490_vm1, %v562_v61, %v564_v32  ;;  %v842_v38 = vrot.slane %v716_v2, 2 }
 0x14c   : > { %v2340_v47 = vadd.f32 3.0, %v2308_v37  ;;  %v631_v17 = vadd.f32 %v563_v53, %v321_v7  ;;  %v632_v48 = vadd.f32 %v565_v46, %v322_v41  ;;  %v839_v28 = vrot.slane %v714_v49, 2  ;;  %v3135_v49 = vld [vmem:[%s3565_s13 + $0xc0] sm:$0xe] }
 0x14d   : > { %v2341_v51 = vadd.f32 3.0, %v2309_v42  ;;  %v843_v52 = vsel %vm768_vm2, %v840_v33, %v842_v38  ;;  %v975_v54 = vunpack.c.h.bf16 %v3032_v55  ;;  %v1011_v56 = vmul.f32 %v4257_v43, %v974_v44 }
 0x14e   : > { %v2372_v8 = vmax.f32 %v2340_v47, 0.0  ;;  %v841_v58 = vsel %vm768_vm2, %v839_v28, %v840_v33  ;;  %v910_v5 = vadd.f32 %v843_v52, %v632_v48  ;;  %v1077_v62 = vunpack.c.l.bf16 %v3051_v39 }
 0x14f   : > { %v2373_v60 = vmax.f32 %v2341_v51, 0.0  ;;  %v909_v1 = vadd.f32 %v841_v58, %v631_v17  ;;  %v1012_v3 = vmul.f32 %v4257_v43, %v975_v54  ;;  %v1126_v7 = vmul.f32 %v4268_v50, %v974_v44 }
 0x150   : > { %v2404_v6 = vmin.f32 %v2372_v8, 6.0  ;;  %v1127_v11 = vmul.f32 %v4268_v50, %v975_v54  ;;  %v1128_v41 = vmul.f32 %v4268_v50, %v1077_v62  ;;  %v1354_v12 = vunpack.c.l.bf16 %v3068_v57  ;;  %v238_v57 = vld [vmem:[%s3565_s13 + $0x54] sm:$0xff]  }
 0x151   : > { %v2405_v14 = vmin.f32 %v2373_v60, 6.0  ;;  %v1043_v16 = vadd.f32 %v1011_v56, %v909_v1  ;;  %v1044_v18 = vadd.f32 %v1012_v3, %v910_v5  ;;  %v1250_v19 = vrot.slane %v1126_v7, 1 }
 0x152   : > { %v2436_v21 = vmul.f32 %v2404_v6, %v2308_v37  ;;  %v1251_v23 = vrot.slane %v1127_v11, 1  ;;  %v1253_v25 = vrot.slane %v1128_v41, 1  ;;  %v1403_v29 = vmul.f32 %v4278_v20, %v1354_v12  ;;  %v364_v6 = vld [vmem:[%s3565_s13 + $0x5c] sm:$0x1] }
 0x153   : > { %v2437_v55 = vmul.f32 %v2405_v14, %v2309_v42  ;;  %v1404_v31 = vmul.f32 %v4278_v20, %v975_v54  ;;  %v1405_v34 = vmul.f32 %v4278_v20, %v1077_v62  ;;  %v4481_v35 = vunpack.c.l.bf16 %v3280_v13 }
 0x154   : > { %v2468_v36 = vmul.f32 0.16666667, %v2436_v21  ;;  %v1252_v61 = vsel %vm490_vm1, %v1250_v19, %v1251_v23  ;;  %v1254_v32 = vsel %vm490_vm1, %v1251_v23, %v1253_v25  ;;  %v1527_v2 = vrot.slane %v1403_v29, 2 }
 0x155   : > { %v2469_v37 = vmul.f32 0.16666667, %v2437_v55  ;;  %v1320_v33 = vadd.f32 %v1252_v61, %v1043_v16  ;;  %v1321_v44 = vadd.f32 %v1254_v32, %v1044_v18  ;;  %v1528_v53 = vrot.slane %v1404_v31, 2 }
 0x156   : > { %v1530_v42 = vrot.slane %v1405_v34, 2  ;;  %v4487_v46 = vunpack.c.h.bf16 %v3280_v13  ;;  %v1699_v38 = vmul.f32 %v4294_v0, %v4481_v35  ;;  %v1765_v39 = vunpack.c.l.bf16 %v3118_v27  ;;  %v642_v34 = vld [vmem:[%s3565_s13 + $0x54] sm:$0xe] }
 0x157   : > { %v2494_v47 = vpack.c.bf16 %v2469_v37, %v2468_v36  ;;  %v1529_v17 = vsel %vm768_vm2, %v1527_v2, %v1528_v53  ;;  %v1814_v48 = vmul.f32 %v4300_v45, %v4481_v35  ;;  %v2042_v28 = vunpack.c.l.bf16 %v3135_v49 }
 0x158   : > { %v1531_v51 = vsel %vm768_vm2, %v1528_v53, %v1530_v42  ;;  %v1597_v52 = vadd.f32 %v1529_v17, %v1320_v33  ;;  %v1700_v54 = vmul.f32 %v4294_v0, %v4487_v46  ;;  %v1815_v56 = vmul.f32 %v4300_v45, %v4487_v46 }
 0x159   : > { %3312 = vmatprep.mubr.msk.bf16.mxu0 %vm2512_vm3, %v2494_v47  ;;  %v1598_v8 = vadd.f32 %v1531_v51, %v1321_v44  ;;  %v1816_v58 = vmul.f32 %v4300_v45, %v1765_v39  ;;  %v1938_v5 = vrot.slane %v1814_v48, 1  ;;  %v2091_v62 = vmul.f32 %v4310_v59, %v2042_v28 }
 0x15a   : > { %v1731_v60 = vadd.f32 %v1699_v38, %v1597_v52  ;;  %v1939_v1 = vrot.slane %v1815_v56, 1  ;;  %v2092_v3 = vmul.f32 %v4310_v59, %v4487_v46  ;;  %v2093_v7 = vmul.f32 %v4310_v59, %v1765_v39 }
 0x15b   : > { %v1732_v11 = vadd.f32 %v1700_v54, %v1598_v8  ;;  %v1941_v41 = vrot.slane %v1816_v58, 1  ;;  %v2215_v12 = vrot.slane %v2091_v62, 2  ;;  %v270_v13 = vunpack.c.l.bf16 %v238_v57  ;;  %v4507_v14 = vpop.f32.mrb[0].mxu1  ;;  %v3044_v8 = vld [vmem:[%s3565_s13 + $0x68] sm:$0x1] }
 0x15c   : > { %v1940_v16 = vsel %vm490_vm1, %v1938_v5, %v1939_v1  ;;  %v2216_v18 = vrot.slane %v2092_v3, 2  ;;  %v2218_v19 = vrot.slane %v2093_v7, 2  ;;  %v271_v21 = vunpack.c.h.bf16 %v238_v57  ;;  %v4510_v23 = vpop.f32.mrb[1].mxu1 }
 0x15d   : > { %v1942_v25 = vsel %vm490_vm1, %v1939_v1, %v1941_v41  ;;  %v2008_v29 = vadd.f32 %v1940_v16, %v1731_v60  ;;  %v307_v55 = vmul.f32 %v4324_v24, %v270_v13  ;;  %v380_v31 = vunpack.c.l.bf16 %v364_v6  ;;  %v4515_v27 = vpop.f32.mrb[2].mxu1 }
 0x15e   : > { %v2009_v36 = vadd.f32 %v1942_v25, %v1732_v11  ;;  %v2217_v61 = vsel %vm768_vm2, %v2215_v12, %v2216_v18  ;;  %v2219_v32 = vsel %vm768_vm2, %v2216_v18, %v2218_v19  ;;  %v308_v2 = vmul.f32 %v4324_v24, %v271_v21  ;;  %v4520_v49 = vpop.f32.mrb[3].mxu1  ;;  %v3061_v12 = vld [vmem:[%s3565_s13 + $0x60] sm:$0xe] }
 0x15f   : > { %v2285_v37 = vadd.f32 %v2217_v61, %v2008_v29  ;;  %v415_v33 = vmul.f32 %v4233_v22, %v270_v13  ;;  %v416_v44 = vmul.f32 %v4233_v22, %v271_v21  ;;  %v417_v53 = vmul.f32 %v4233_v22, %v380_v31 }
 0x160   : > { %v2286_v42 = vadd.f32 %v2219_v32, %v2009_v36  ;;  %v658_v38 = vunpack.c.l.bf16 %v642_v34  ;;  %v694_v39 = vmul.f32 %v4241_v30, %v271_v21  ;;  %v695_v47 = vmul.f32 %v4241_v30, %v380_v31  ;;  %v3085_v32 = vld [vmem:[%s3565_s13 + $0x6c] sm:$0xff]  }
 0x161   : > { %v2324_v17 = vadd.f32 %v4336_v10, %v2285_v37  ;;  %v526_v48 = vrot.slane %v415_v33, 1  ;;  %v527_v28 = vrot.slane %v416_v44, 1  ;;  %v529_v51 = vrot.slane %v417_v53, 1 }
 0x162   : > { %v2325_v52 = vadd.f32 %v4336_v10, %v2286_v42  ;;  %v693_v54 = vmul.f32 %v4241_v30, %v658_v38  ;;  %v805_v56 = vrot.slane %v694_v39, 2  ;;  %v807_v57 = vrot.slane %v695_v47, 2 }
 0x163   : > { %v2356_v22 = vadd.f32 3.0, %v2324_v17  ;;  %v528_v58 = vsel %vm490_vm1, %v526_v48, %v527_v28  ;;  %v530_v5 = vsel %vm490_vm1, %v527_v28, %v529_v51  ;;  %v997_v62 = vmul.f32 %v4257_v43, %v4413_v26  ;;  %v3111_v28 = vld [vmem:[%s3565_s13 + $0x74] sm:$0x1]  ;;  %v3128_v51 = vld [vmem:[%s3565_s13 + $0x6c] sm:$0xe] }
 0x164   : > { %v2357_v60 = vadd.f32 3.0, %v2325_v52  ;;  %v617_v1 = vadd.f32 %v528_v58, %v307_v55  ;;  %v618_v3 = vadd.f32 %v530_v5, %v308_v2  ;;  %v804_v7 = vrot.slane %v693_v54, 2 }
 0x165   : > { %v2388_v6 = vmax.f32 %v2356_v22, 0.0  ;;  %v808_v11 = vsel %vm768_vm2, %v805_v56, %v807_v57  ;;  %v998_v30 = vmul.f32 %v4257_v43, %v4418_v40  ;;  %v1070_v41 = vunpack.c.l.bf16 %v3044_v8 }
 0x166   : > { %v2389_v13 = vmax.f32 %v2357_v60, 0.0  ;;  %v806_v16 = vsel %vm768_vm2, %v804_v7, %v805_v56  ;;  %v896_v18 = vadd.f32 %v808_v11, %v618_v3  ;;  %v1105_v19 = vmul.f32 %v4268_v50, %v4413_v26 }
 0x167   : > { %v2420_v21 = vmin.f32 %v2388_v6, 6.0  ;;  %v895_v25 = vadd.f32 %v806_v16, %v617_v1  ;;  %v1106_v29 = vmul.f32 %v4268_v50, %v4418_v40  ;;  %v1107_v55 = vmul.f32 %v4268_v50, %v1070_v41  ;;  %v254_v6 = vld [vmem:[%s3565_s13 + $0xb4] sm:$0xff]  }
 0x168   : > { %v2421_v31 = vmin.f32 %v2389_v13, 6.0  ;;  %v1030_v34 = vadd.f32 %v998_v30, %v896_v18  ;;  %v1215_v36 = vrot.slane %v1105_v19, 1  ;;  %v1347_v61 = vunpack.c.l.bf16 %v3061_v12 }
 0x169   : > { %v2452_v2 = vmul.f32 %v2420_v21, %v2324_v17  ;;  %v1029_v37 = vadd.f32 %v997_v62, %v895_v25  ;;  %v1216_v33 = vrot.slane %v1106_v29, 1  ;;  %v1218_v44 = vrot.slane %v1107_v55, 1 }
 0x16a   : > { %v2453_v53 = vmul.f32 %v2421_v31, %v2325_v52  ;;  %v1382_v26 = vmul.f32 %v4278_v20, %v1347_v61  ;;  %v1383_v42 = vmul.f32 %v4278_v20, %v4418_v40  ;;  %v1384_v38 = vmul.f32 %v4278_v20, %v1070_v41  ;;  %v372_v31 = vld [vmem:[%s3565_s13 + $0xbc] sm:$0x1] }
 0x16b   : > { %v2484_v50 = vmul.f32 0.16666667, %v2452_v2  ;;  %v1217_v39 = vsel %vm490_vm1, %v1215_v36, %v1216_v33  ;;  %v1219_v47 = vsel %vm490_vm1, %v1216_v33, %v1218_v44  ;;  %v1648_v48 = vunpack.c.l.bf16 %v3085_v32  ;;  %v650_v44 = vld [vmem:[%s3565_s13 + $0xb4] sm:$0xe] }
 0x16c   : > { %v2485_v17 = vmul.f32 0.16666667, %v2453_v53  ;;  %v1306_v54 = vadd.f32 %v1217_v39, %v1029_v37  ;;  %v1307_v56 = vadd.f32 %v1219_v47, %v1030_v34  ;;  %v1492_v52 = vrot.slane %v1382_v26, 2  ;;  %v3398_v39 = vld [vmem:[%s4796_s1 + $0x1] ss:$0 sm:$0xff] }
 0x16d   : > { %v1493_v57 = vrot.slane %v1383_v42, 2  ;;  %v1495_v8 = vrot.slane %v1384_v38, 2  ;;  %v1649_v22 = vunpack.c.h.bf16 %v3085_v32  ;;  %v1685_v40 = vmul.f32 %v4294_v0, %v1648_v48 }
 0x16e   : > { %v2502_v58 = vpack.c.bf16 %v2485_v17, %v2484_v50  ;;  %v1758_v20 = vunpack.c.l.bf16 %v3111_v28  ;;  %v1793_v5 = vmul.f32 %v4300_v45, %v1648_v48  ;;  %v2035_v62 = vunpack.c.l.bf16 %v3128_v51 }
 0x16f   : > { %v1494_v60 = vsel %vm768_vm2, %v1492_v52, %v1493_v57  ;;  %v1496_v1 = vsel %vm768_vm2, %v1493_v57, %v1495_v8  ;;  %v1686_v3 = vmul.f32 %v4294_v0, %v1649_v22  ;;  %v1794_v7 = vmul.f32 %v4300_v45, %v1649_v22 }
 0x170   : > { %3328 = vmatprep.mubr.msk.bf16.mxu1 %vm2512_vm3, %v2502_v58  ;;  %v1583_v11 = vadd.f32 %v1494_v60, %v1306_v54  ;;  %v1584_v30 = vadd.f32 %v1496_v1, %v1307_v56  ;;  %v1795_v41 = vmul.f32 %v4300_v45, %v1758_v20  ;;  %v1903_v12 = vrot.slane %v1793_v5, 1  ;;  %v3399_v54 = vld [vmem:[%s4796_s1 + $0x2] ss:$0 sm:$0xff] }
 0x171   : > { %v1904_v13 = vrot.slane %v1794_v7, 1  ;;  %v2070_v16 = vmul.f32 %v4310_v59, %v2035_v62  ;;  %v2071_v18 = vmul.f32 %v4310_v59, %v1649_v22  ;;  %v2072_v19 = vmul.f32 %v4310_v59, %v1758_v20 }
 0x172   : > { %v1717_v21 = vadd.f32 %v1685_v40, %v1583_v11  ;;  %v1718_v25 = vadd.f32 %v1686_v3, %v1584_v30  ;;  %v1906_v29 = vrot.slane %v1795_v41, 1  ;;  %v286_v55 = vunpack.c.l.bf16 %v254_v6  ;;  %v3052_v3 = vld [vmem:[%s3565_s13 + $0xc8] sm:$0x1] }
 0x173   : > { %v1905_v34 = vsel %vm490_vm1, %v1903_v12, %v1904_v13  ;;  %v2180_v36 = vrot.slane %v2070_v16, 2  ;;  %v2181_v61 = vrot.slane %v2071_v18, 2  ;;  %v2183_v32 = vrot.slane %v2072_v19, 2  ;;  %v3069_v18 = vld [vmem:[%s3565_s13 + $0xc0] sm:$0xe] }
 0x174   : > { %v1907_v45 = vsel %vm490_vm1, %v1904_v13, %v1906_v29  ;;  %v1994_v2 = vadd.f32 %v1905_v34, %v1717_v21  ;;  %v287_v37 = vunpack.c.h.bf16 %v254_v6  ;;  %v323_v33 = vmul.f32 %v4324_v24, %v286_v55  ;;  %v3400_v13 = vld [vmem:[%s4796_s1 + $0x3] ss:$0 sm:$0xff] }
 0x175   : > { %v1995_v53 = vadd.f32 %v1907_v45, %v1718_v25  ;;  %v2182_v59 = vsel %vm768_vm2, %v2180_v36, %v2181_v61  ;;  %v2184_v26 = vsel %vm768_vm2, %v2181_v61, %v2183_v32  ;;  %v388_v42 = vunpack.c.l.bf16 %v372_v31  ;;  %v3401_v25 = vld [vmem:[%s4796_s1 + $0x4] ss:$0 sm:$0xff] }
 0x176   : > { %v2271_v38 = vadd.f32 %v2182_v59, %v1994_v2  ;;  %v324_v50 = vmul.f32 %v4324_v24, %v287_v37  ;;  %v439_v47 = vmul.f32 %v3398_v39, %v286_v55  ;;  %v440_v48 = vmul.f32 %v3398_v39, %v287_v37 }
 0x177   : > { %v2272_v28 = vadd.f32 %v2184_v26, %v1995_v53  ;;  %v441_v51 = vmul.f32 %v3398_v39, %v388_v42  ;;  %v666_v17 = vunpack.c.l.bf16 %v650_v44  ;;  %v718_v56 = vmul.f32 %v3399_v54, %v287_v37  ;;  %v3101_v37 = vld [vmem:[%s3565_s13 + $0xcc] sm:$0xff]  }
 0x178   : > { %v2310_v52 = vadd.f32 %v4336_v10, %v2271_v38  ;;  %v566_v57 = vrot.slane %v439_v47, 1  ;;  %v567_v8 = vrot.slane %v440_v48, 1  ;;  %v719_v24 = vmul.f32 %v3399_v54, %v388_v42 }
 0x179   : > { %v2311_v22 = vadd.f32 %v4336_v10, %v2272_v28  ;;  %v569_v40 = vrot.slane %v441_v51, 1  ;;  %v717_v58 = vmul.f32 %v3399_v54, %v666_v17  ;;  %v845_v20 = vrot.slane %v718_v56, 2  ;;  %v3119_v51 = vld [vmem:[%s3565_s13 + $0xd4] sm:$0x1] }
 0x17a   : > { %v2342_v5 = vadd.f32 3.0, %v2310_v52  ;;  %v568_v62 = vsel %vm490_vm1, %v566_v57, %v567_v8  ;;  %v847_v60 = vrot.slane %v719_v24, 2  ;;  %v1013_v1 = vmul.f32 %v4257_v43, %v4481_v35 }
 0x17b   : > { %v2343_v7 = vadd.f32 3.0, %v2311_v22  ;;  %v570_v6 = vsel %vm490_vm1, %v567_v8, %v569_v40  ;;  %v633_v11 = vadd.f32 %v568_v62, %v323_v33  ;;  %v844_v30 = vrot.slane %v717_v58, 2  ;;  %v3136_v62 = vld [vmem:[%s3565_s13 + $0xcc] sm:$0xe] }
 0x17c   : > { %v2374_v41 = vmax.f32 %v2342_v5, 0.0  ;;  %v634_v12 = vadd.f32 %v570_v6, %v324_v50  ;;  %v848_v10 = vsel %vm768_vm2, %v845_v20, %v847_v60  ;;  %v1014_v16 = vmul.f32 %v3400_v13, %v4487_v46 }
 0x17d   : > { %v2375_v19 = vmax.f32 %v2343_v7, 0.0  ;;  %v846_v43 = vsel %vm768_vm2, %v844_v30, %v845_v20  ;;  %v1078_v21 = vunpack.c.l.bf16 %v3052_v3  ;;  %v1129_v29 = vmul.f32 %v3401_v25, %v4481_v35  ;;  %v3402_v35 = vld [vmem:[%s4796_s1 + $0x5] ss:$0 sm:$0xff]  ;;  %v3403_v20 = vld [vmem:[%s4796_s1 + $0x7] ss:$0 sm:$0xff] }
 0x17e   : > { %v2406_v55 = vmin.f32 %v2374_v41, 6.0  ;;  %v911_v31 = vadd.f32 %v846_v43, %v633_v11  ;;  %v912_v34 = vadd.f32 %v848_v10, %v634_v12  ;;  %v1130_v36 = vmul.f32 %v3401_v25, %v4487_v46  ;;  %v3404_v3 = vld [vmem:[%s4796_s1 + $0x6] ss:$0 sm:$0xff] }
 0x17f   : > { %v2407_v61 = vmin.f32 %v2375_v19, 6.0  ;;  %v1131_v32 = vmul.f32 %v3401_v25, %v1078_v21  ;;  %v1255_v45 = vrot.slane %v1129_v29, 1  ;;  %v1355_v2 = vunpack.c.l.bf16 %v3069_v18 }
 0x180   : > { %v2438_v33 = vmul.f32 %v2406_v55, %v2310_v52  ;;  %v1045_v44 = vadd.f32 %v1013_v1, %v911_v31  ;;  %v1046_v53 = vadd.f32 %v1014_v16, %v912_v34  ;;  %v1256_v59 = vrot.slane %v1130_v36, 1  ;;  %v3405_v16 = vld [vmem:[%s4796_s1 + $0x8] ss:$0 sm:$0xff] }
 0x181   : > { %v2439_v26 = vmul.f32 %v2407_v61, %v2311_v22  ;;  %v1258_v42 = vrot.slane %v1131_v32, 1  ;;  %v1406_v38 = vmul.f32 %v3402_v35, %v1355_v2  ;;  %v1407_v50 = vmul.f32 %v3402_v35, %v4487_v46 }
 0x182   : > { %v2470_v39 = vmul.f32 0.16666667, %v2438_v33  ;;  %v1257_v47 = vsel %vm490_vm1, %v1255_v45, %v1256_v59  ;;  %v1408_v48 = vmul.f32 %v3402_v35, %v1078_v21  ;;  %v1664_v28 = vunpack.c.l.bf16 %v3101_v37 }
 0x183   : > { %v2471_v17 = vmul.f32 0.16666667, %v2439_v26  ;;  %v1259_v54 = vsel %vm490_vm1, %v1256_v59, %v1258_v42  ;;  %v1322_v56 = vadd.f32 %v1257_v47, %v1045_v44  ;;  %v1532_v52 = vrot.slane %v1406_v38, 2 }
 0x184   : > { %v1323_v57 = vadd.f32 %v1259_v54, %v1046_v53  ;;  %v1533_v8 = vrot.slane %v1407_v50, 2  ;;  %v1535_v24 = vrot.slane %v1408_v48, 2  ;;  %v1665_v22 = vunpack.c.h.bf16 %v3101_v37 }
 0x185   : > { %v2495_v40 = vpack.c.bf16 %v2471_v17, %v2470_v39  ;;  %v1701_v58 = vmul.f32 %v4294_v0, %v1664_v28  ;;  %v1766_v46 = vunpack.c.l.bf16 %v3119_v51  ;;  %v1817_v5 = vmul.f32 %v3403_v20, %v1664_v28  ;;  %v4620_v0 = vld [vmem:[%s4799_s4] ss:$0 sm:$0xff] }
 0x186   : > { %v1534_v60 = vsel %vm768_vm2, %v1532_v52, %v1533_v8  ;;  %v1536_v1 = vsel %vm768_vm2, %v1533_v8, %v1535_v24  ;;  %v1702_v7 = vmul.f32 %v3404_v3, %v1665_v22  ;;  %v1818_v6 = vmul.f32 %v3403_v20, %v1665_v22 }
 0x187   : > { %3313 = vmatmul.mubr.msk.bf16.gmra.mrb[12].mxu0 %vm2512_vm3, %v2495_v40  ;;  %v1599_v11 = vadd.f32 %v1534_v60, %v1322_v56  ;;  %v1600_v30 = vadd.f32 %v1536_v1, %v1323_v57  ;;  %v1819_v41 = vmul.f32 %v3403_v20, %v1766_v46  ;;  %v1943_v12 = vrot.slane %v1817_v5, 1 }
 0x188   : > { %v1944_v10 = vrot.slane %v1818_v6, 1  ;;  %v2043_v13 = vunpack.c.l.bf16 %v3136_v62  ;;  %v2095_v18 = vmul.f32 %v3405_v16, %v1665_v22  ;;  %v2096_v19 = vmul.f32 %v3405_v16, %v1766_v46 }
 0x189   : > { %v1733_v43 = vadd.f32 %v1701_v58, %v1599_v11  ;;  %v1734_v21 = vadd.f32 %v1702_v7, %v1600_v30  ;;  %v1946_v25 = vrot.slane %v1819_v41, 1  ;;  %v2608_v29 = vadd.f32 %v4437_v63, %v4620_v0 }
 0x18a   : > { %v1945_v55 = vsel %vm490_vm1, %v1943_v12, %v1944_v10  ;;  %v2094_v31 = vmul.f32 %v3405_v16, %v2043_v13  ;;  %v2221_v34 = vrot.slane %v2095_v18, 2  ;;  %v2223_v36 = vrot.slane %v2096_v19, 2 }
 0x18b   : > { %v1947_v61 = vsel %vm490_vm1, %v1944_v10, %v1946_v25  ;;  %v2010_v32 = vadd.f32 %v1945_v55, %v1733_v43  ;;  %v2728_v45 = vadd.f32 3.0, %v2608_v29  ;;  %v2672_v44 = vadd.f32 %v4507_v14, %v4620_v0 }
 0x18c   : > { %v2011_v2 = vadd.f32 %v1947_v61, %v1734_v21  ;;  %v2220_v37 = vrot.slane %v2094_v31, 2  ;;  %v2224_v33 = vsel %vm768_vm2, %v2221_v34, %v2223_v36  ;;  %v2600_v53 = vadd.f32 %v4620_v0, %v4441_v9  ;;  %v3406_v9 = vld [vmem:[%s4797_s2] ss:$0 sm:$0xff] }
 0x18d   : > { %v2760_v63 = vmax.f32 %v2728_v45, 0.0  ;;  %v2664_v59 = vadd.f32 %v4620_v0, %v4510_v23  ;;  %v2611_v26 = vadd.f32 %v4447_v15, %v4620_v0  ;;  %v2744_v38 = vadd.f32 3.0, %v2672_v44 }
 0x18e   : > { %v2222_v42 = vsel %vm768_vm2, %v2220_v37, %v2221_v34  ;;  %v2288_v35 = vadd.f32 %v2224_v33, %v2011_v2  ;;  %v2675_v50 = vadd.f32 %v4515_v27, %v4620_v0  ;;  %v2726_v47 = vadd.f32 3.0, %v2600_v53 }
 0x18f   : > { %v2287_v39 = vadd.f32 %v2222_v42, %v2010_v32  ;;  %v2792_v14 = vmin.f32 %v2760_v63, 6.0  ;;  %v2742_v48 = vadd.f32 3.0, %v2664_v59  ;;  %v2776_v28 = vmax.f32 %v2744_v38, 0.0 }
 0x190   : > { %v2327_v23 = vadd.f32 %v3406_v9, %v2288_v35  ;;  %v2729_v15 = vadd.f32 3.0, %v2611_v26  ;;  %v2745_v51 = vadd.f32 3.0, %v2675_v50  ;;  %v2758_v56 = vmax.f32 %v2726_v47, 0.0 }
 0x191   : > { %v2326_v17 = vadd.f32 %v3406_v9, %v2287_v39  ;;  %v2824_v54 = vmul.f32 %v2792_v14, %v2608_v29  ;;  %v2774_v52 = vmax.f32 %v2742_v48, 0.0  ;;  %v2808_v27 = vmin.f32 %v2776_v28, 6.0 }
 0x192   : > { %v2359_v57 = vadd.f32 3.0, %v2327_v23  ;;  %v2761_v8 = vmax.f32 %v2729_v15, 0.0  ;;  %v2777_v24 = vmax.f32 %v2745_v51, 0.0  ;;  %v2790_v58 = vmin.f32 %v2758_v56, 6.0 }
 0x193   : > { %v2358_v22 = vadd.f32 3.0, %v2326_v17  ;;  %v2856_v40 = vmul.f32 0.16666667, %v2824_v54  ;;  %v2806_v46 = vmin.f32 %v2774_v52, 6.0  ;;  %v2840_v5 = vmul.f32 %v2808_v27, %v2672_v44 }
 0x194   : > { %v2391_v20 = vmax.f32 %v2359_v57, 0.0  ;;  %v2793_v62 = vmin.f32 %v2761_v8, 6.0  ;;  %v2809_v60 = vmin.f32 %v2777_v24, 6.0  ;;  %v2822_v3 = vmul.f32 %v2790_v58, %v2600_v53 }
 0x195   : > { %v2390_v1 = vmax.f32 %v2358_v22, 0.0  ;;  %2889 = vst.msk [vmem:[%s4648_s23 + $0x10] sm:$0xff] %vm2886_vm4, %v2856_v40  ;;  %v2838_v7 = vmul.f32 %v2806_v46, %v2664_v59  ;;  %v2603_v6 = vadd.f32 %v4620_v0, %v4453_v4  ;;  %v2872_v30 = vmul.f32 0.16666667, %v2840_v5 }
 0x196   : > { %v2423_v11 = vmin.f32 %v2391_v20, 6.0  ;;  %v2825_v41 = vmul.f32 %v2793_v62, %v2611_v26  ;;  %v2841_v12 = vmul.f32 %v2809_v60, %v2675_v50  ;;  %v2854_v13 = vmul.f32 0.16666667, %v2822_v3 }
 0x197   : > { %v2422_v10 = vmin.f32 %v2390_v1, 6.0  ;;  %v2870_v16 = vmul.f32 0.16666667, %v2838_v7  ;;  %v2727_v18 = vadd.f32 3.0, %v2603_v6  ;;  %2905 = vst.msk [vmem:[%s4648_s23 + $0x90] sm:$0xff] %vm2886_vm4, %v2872_v30  ;;  %v2667_v25 = vadd.f32 %v4620_v0, %v4520_v49 }
 0x198   : > { %v2455_v19 = vmul.f32 %v2423_v11, %v2327_v23  ;;  %v2857_v43 = vmul.f32 0.16666667, %v2825_v41  ;;  %v2873_v21 = vmul.f32 0.16666667, %v2841_v12  ;;  %2887 = vst.msk [vmem:[%s4648_s23] sm:$0xff] %vm2886_vm4, %v2854_v13 }
 0x199   : > { %v2454_v4 = vmul.f32 %v2422_v10, %v2326_v17  ;;  %2903 = vst.msk [vmem:[%s4648_s23 + $0x80] sm:$0xff] %vm2886_vm4, %v2870_v16  ;;  %v2759_v29 = vmax.f32 %v2727_v18, 0.0  ;;  %v2743_v31 = vadd.f32 3.0, %v2667_v25 }
 0x19a   : > { %v2487_v55 = vmul.f32 0.16666667, %v2455_v19  ;;  %2890 = vst.msk [vmem:[%s4648_s23 + $0x18] sm:$0xff] %vm2886_vm4, %v2857_v43  ;;  %2906 = vst.msk [vmem:[%s4648_s23 + $0x98] sm:$0xff] %vm2886_vm4, %v2873_v21 }
 0x19b   : > { %v2486_v34 = vmul.f32 0.16666667, %v2454_v4  ;;  %v2791_v36 = vmin.f32 %v2759_v29, 6.0  ;;  %v2775_v61 = vmax.f32 %v2743_v31, 0.0 }
 0x19d   : > { %v2503_v32 = vpack.c.bf16 %v2487_v55, %v2486_v34  ;;  %v2823_v45 = vmul.f32 %v2791_v36, %v2603_v6  ;;  %v2807_v49 = vmin.f32 %v2775_v61, 6.0 }
 0x19f   : > { %3329 = vmatmul.mubr.msk.bf16.gmra.mrb[12].mxu1 %vm2512_vm3, %v2503_v32  ;;  %v2855_v2 = vmul.f32 0.16666667, %v2823_v45  ;;  %v2839_v37 = vmul.f32 %v2807_v49, %v2667_v25 }
 0x1a0   : > { %v3306_v33 = vpop.f32.mrb[4].mxu0 }
 0x1a1   : > { %2888 = vst.msk [vmem:[%s4648_s23 + $0x8] sm:$0xff] %vm2886_vm4, %v2855_v2  ;;  %v2624_v44 = vadd.f32 %v3306_v33, %v4620_v0  ;;  %v2615_v63 = vpop.f32.mrb[5].mxu0  ;;  %v2871_v53 = vmul.f32 0.16666667, %v2839_v37 }
 0x1a2   : > { %v2616_v59 = vadd.f32 %v4620_v0, %v2615_v63  ;;  %v3307_v26 = vpop.f32.mrb[6].mxu0 }
 0x1a3   : > { %v2732_v42 = vadd.f32 3.0, %v2624_v44  ;;  %v2627_v35 = vadd.f32 %v3307_v26, %v4620_v0  ;;  %v2618_v38 = vpop.f32.mrb[7].mxu0  ;;  %2904 = vst.msk [vmem:[%s4648_s23 + $0x88] sm:$0xff] %vm2886_vm4, %v2871_v53 }
 0x1a4   : > { %v2730_v50 = vadd.f32 3.0, %v2616_v59  ;;  %v2619_v39 = vadd.f32 %v4620_v0, %v2618_v38 }
 0x1a5   : > { %v2764_v14 = vmax.f32 %v2732_v42, 0.0  ;;  %v2733_v47 = vadd.f32 3.0, %v2627_v35 }
 0x1a6   : > { %v2762_v48 = vmax.f32 %v2730_v50, 0.0  ;;  %v2731_v9 = vadd.f32 3.0, %v2619_v39 }
 0x1a7   : > { %v2796_v23 = vmin.f32 %v2764_v14, 6.0  ;;  %v2765_v28 = vmax.f32 %v2733_v47, 0.0 }
 0x1a8   : > { %v2794_v15 = vmin.f32 %v2762_v48, 6.0  ;;  %v2763_v51 = vmax.f32 %v2731_v9, 0.0 }
 0x1a9   : > { %v2828_v17 = vmul.f32 %v2796_v23, %v2624_v44  ;;  %v2797_v54 = vmin.f32 %v2765_v28, 6.0 }
 0x1aa   : > { %v2826_v56 = vmul.f32 %v2794_v15, %v2616_v59  ;;  %v2795_v52 = vmin.f32 %v2763_v51, 6.0 }
 0x1ab   : > { %v2860_v57 = vmul.f32 0.16666667, %v2828_v17  ;;  %v2829_v27 = vmul.f32 %v2797_v54, %v2627_v35 }
 0x1ac   : > { %v2858_v8 = vmul.f32 0.16666667, %v2826_v56  ;;  %v2827_v24 = vmul.f32 %v2795_v52, %v2619_v39 }
 0x1ad   : > { %2893 = vst.msk [vmem:[%s4648_s23 + $0x30] sm:$0xff] %vm2886_vm4, %v2860_v57  ;;  %v2861_v22 = vmul.f32 0.16666667, %v2829_v27 }
 0x1ae   : > { %2891 = vst.msk [vmem:[%s4648_s23 + $0x20] sm:$0xff] %vm2886_vm4, %v2858_v8  ;;  %v2859_v40 = vmul.f32 0.16666667, %v2827_v24 }
 0x1af   : > { %2894 = vst.msk [vmem:[%s4648_s23 + $0x38] sm:$0xff] %vm2886_vm4, %v2861_v22 }
 0x1b0   : > { %2892 = vst.msk [vmem:[%s4648_s23 + $0x28] sm:$0xff] %vm2886_vm4, %v2859_v40 }
 0x1b8   : > { %v3322_v58 = vpop.f32.mrb[4].mxu1 }
 0x1b9   : > { %v2688_v46 = vadd.f32 %v3322_v58, %v4620_v0  ;;  %v2679_v20 = vpop.f32.mrb[5].mxu1 }
 0x1ba   : > { %v2680_v5 = vadd.f32 %v4620_v0, %v2679_v20  ;;  %v3323_v62 = vpop.f32.mrb[6].mxu1 }
 0x1bb   : > { %v2748_v60 = vadd.f32 3.0, %v2688_v46  ;;  %v2691_v1 = vadd.f32 %v3323_v62, %v4620_v0  ;;  %v2682_v3 = vpop.f32.mrb[7].mxu1 }
 0x1bc   : > { %v2746_v7 = vadd.f32 3.0, %v2680_v5  ;;  %v2683_v6 = vadd.f32 %v4620_v0, %v2682_v3 }
 0x1bd   : > { %v2780_v11 = vmax.f32 %v2748_v60, 0.0  ;;  %v2749_v30 = vadd.f32 3.0, %v2691_v1 }
 0x1be   : > { %v2778_v41 = vmax.f32 %v2746_v7, 0.0  ;;  %v2747_v12 = vadd.f32 3.0, %v2683_v6 }
 0x1bf   : > { %v2812_v10 = vmin.f32 %v2780_v11, 6.0  ;;  %v2781_v13 = vmax.f32 %v2749_v30, 0.0 }
 0x1c0   : > { %v2810_v16 = vmin.f32 %v2778_v41, 6.0  ;;  %v2779_v18 = vmax.f32 %v2747_v12, 0.0 }
 0x1c1   : > { %v2844_v19 = vmul.f32 %v2812_v10, %v2688_v46  ;;  %v2813_v43 = vmin.f32 %v2781_v13, 6.0 }
 0x1c2   : > { %v2842_v21 = vmul.f32 %v2810_v16, %v2680_v5  ;;  %v2811_v25 = vmin.f32 %v2779_v18, 6.0 }
 0x1c3   : > { %v2876_v4 = vmul.f32 0.16666667, %v2844_v19  ;;  %v2845_v29 = vmul.f32 %v2813_v43, %v2691_v1 }
 0x1c4   : > { %v2874_v55 = vmul.f32 0.16666667, %v2842_v21  ;;  %v2843_v31 = vmul.f32 %v2811_v25, %v2683_v6 }
 0x1c5   : > { %2909 = vst.msk [vmem:[%s4648_s23 + $0xb0] sm:$0xff] %vm2886_vm4, %v2876_v4  ;;  %v2877_v34 = vmul.f32 0.16666667, %v2845_v29 }
 0x1c6   : > { %2907 = vst.msk [vmem:[%s4648_s23 + $0xa0] sm:$0xff] %vm2886_vm4, %v2874_v55  ;;  %v2875_v36 = vmul.f32 0.16666667, %v2843_v31 }
 0x1c7   : > { %2910 = vst.msk [vmem:[%s4648_s23 + $0xb8] sm:$0xff] %vm2886_vm4, %v2877_v34 }
 0x1c8   : > { %2908 = vst.msk [vmem:[%s4648_s23 + $0xa8] sm:$0xff] %vm2886_vm4, %v2875_v36 }
 0x1fd   : > { %v3310_v61 = vpop.f32.mrb[8].mxu0 }
 0x1fe   : > { %v2640_v32 = vadd.f32 %v3310_v61, %v4620_v0  ;;  %v2631_v45 = vpop.f32.mrb[9].mxu0 }
 0x1ff   : > { %v2632_v49 = vadd.f32 %v4620_v0, %v2631_v45  ;;  %v3311_v2 = vpop.f32.mrb[10].mxu0 }
 0x200   : > { %v2736_v37 = vadd.f32 3.0, %v2640_v32  ;;  %v2643_v33 = vadd.f32 %v3311_v2, %v4620_v0  ;;  %v2634_v44 = vpop.f32.mrb[11].mxu0 }
 0x201   : > { %v2734_v63 = vadd.f32 3.0, %v2632_v49  ;;  %v2635_v53 = vadd.f32 %v4620_v0, %v2634_v44 }
 0x202   : > { %v2768_v59 = vmax.f32 %v2736_v37, 0.0  ;;  %v2737_v26 = vadd.f32 3.0, %v2643_v33 }
 0x203   : > { %v2766_v42 = vmax.f32 %v2734_v63, 0.0  ;;  %v2735_v35 = vadd.f32 3.0, %v2635_v53 }
 0x204   : > { %v2800_v38 = vmin.f32 %v2768_v59, 6.0  ;;  %v2769_v50 = vmax.f32 %v2737_v26, 0.0 }
 0x205   : > { %v2798_v39 = vmin.f32 %v2766_v42, 6.0  ;;  %v2767_v14 = vmax.f32 %v2735_v35, 0.0 }
 0x206   : > { %v2832_v47 = vmul.f32 %v2800_v38, %v2640_v32  ;;  %v2801_v48 = vmin.f32 %v2769_v50, 6.0 }
 0x207   : > { %v2830_v9 = vmul.f32 %v2798_v39, %v2632_v49  ;;  %v2799_v23 = vmin.f32 %v2767_v14, 6.0 }
 0x208   : > { %v2864_v28 = vmul.f32 0.16666667, %v2832_v47  ;;  %v2833_v15 = vmul.f32 %v2801_v48, %v2643_v33 }
 0x209   : > { %v2862_v51 = vmul.f32 0.16666667, %v2830_v9  ;;  %v2831_v17 = vmul.f32 %v2799_v23, %v2635_v53 }
 0x20a   : > { %2897 = vst.msk [vmem:[%s4648_s23 + $0x50] sm:$0xff] %vm2886_vm4, %v2864_v28  ;;  %v2865_v54 = vmul.f32 0.16666667, %v2833_v15 }
 0x20b   : > { %2895 = vst.msk [vmem:[%s4648_s23 + $0x40] sm:$0xff] %vm2886_vm4, %v2862_v51  ;;  %v2863_v56 = vmul.f32 0.16666667, %v2831_v17 }
 0x20c   : > { %2898 = vst.msk [vmem:[%s4648_s23 + $0x58] sm:$0xff] %vm2886_vm4, %v2865_v54 }
 0x20d   : > { %2896 = vst.msk [vmem:[%s4648_s23 + $0x48] sm:$0xff] %vm2886_vm4, %v2863_v56 }
 0x215   : > { %v3326_v52 = vpop.f32.mrb[8].mxu1 }
 0x216   : > { %v2704_v57 = vadd.f32 %v3326_v52, %v4620_v0  ;;  %v2695_v27 = vpop.f32.mrb[9].mxu1 }
 0x217   : > { %v2696_v8 = vadd.f32 %v4620_v0, %v2695_v27  ;;  %v3327_v24 = vpop.f32.mrb[10].mxu1 }
 0x218   : > { %v2752_v22 = vadd.f32 3.0, %v2704_v57  ;;  %v2707_v40 = vadd.f32 %v3327_v24, %v4620_v0  ;;  %v2698_v58 = vpop.f32.mrb[11].mxu1 }
 0x219   : > { %v2750_v46 = vadd.f32 3.0, %v2696_v8  ;;  %v2699_v20 = vadd.f32 %v4620_v0, %v2698_v58 }
 0x21a   : > { %v2784_v5 = vmax.f32 %v2752_v22, 0.0  ;;  %v2753_v62 = vadd.f32 3.0, %v2707_v40 }
 0x21b   : > { %v2782_v60 = vmax.f32 %v2750_v46, 0.0  ;;  %v2751_v1 = vadd.f32 3.0, %v2699_v20 }
 0x21c   : > { %v2816_v3 = vmin.f32 %v2784_v5, 6.0  ;;  %v2785_v7 = vmax.f32 %v2753_v62, 0.0 }
 0x21d   : > { %v2814_v6 = vmin.f32 %v2782_v60, 6.0  ;;  %v2783_v11 = vmax.f32 %v2751_v1, 0.0 }
 0x21e   : > { %v2848_v30 = vmul.f32 %v2816_v3, %v2704_v57  ;;  %v2817_v41 = vmin.f32 %v2785_v7, 6.0 }
 0x21f   : > { %v2846_v12 = vmul.f32 %v2814_v6, %v2696_v8  ;;  %v2815_v10 = vmin.f32 %v2783_v11, 6.0 }
 0x220   : > { %v2880_v13 = vmul.f32 0.16666667, %v2848_v30  ;;  %v2849_v16 = vmul.f32 %v2817_v41, %v2707_v40 }
 0x221   : > { %v2878_v18 = vmul.f32 0.16666667, %v2846_v12  ;;  %v2847_v19 = vmul.f32 %v2815_v10, %v2699_v20 }
 0x222   : > { %2913 = vst.msk [vmem:[%s4648_s23 + $0xd0] sm:$0xff] %vm2886_vm4, %v2880_v13  ;;  %v2881_v43 = vmul.f32 0.16666667, %v2849_v16 }
 0x223   : > { %2911 = vst.msk [vmem:[%s4648_s23 + $0xc0] sm:$0xff] %vm2886_vm4, %v2878_v18  ;;  %v2879_v21 = vmul.f32 0.16666667, %v2847_v19 }
 0x224   : > { %2914 = vst.msk [vmem:[%s4648_s23 + $0xd8] sm:$0xff] %vm2886_vm4, %v2881_v43 }
 0x225   : > { %2912 = vst.msk [vmem:[%s4648_s23 + $0xc8] sm:$0xff] %vm2886_vm4, %v2879_v21 }
 0x25a   : > { %v3314_v25 = vpop.f32.mrb[12].mxu0 }
 0x25b   : > { %v2656_v4 = vadd.f32 %v3314_v25, %v4620_v0  ;;  %v2647_v29 = vpop.f32.mrb[13].mxu0 }
 0x25c   : > { %v2648_v55 = vadd.f32 %v4620_v0, %v2647_v29  ;;  %v3315_v31 = vpop.f32.mrb[14].mxu0 }
 0x25d   : > { %v2740_v34 = vadd.f32 3.0, %v2656_v4  ;;  %v2659_v36 = vadd.f32 %v3315_v31, %v4620_v0  ;;  %v2650_v61 = vpop.f32.mrb[15].mxu0 }
 0x25e   : > { %v2738_v32 = vadd.f32 3.0, %v2648_v55  ;;  %v2651_v45 = vadd.f32 %v4620_v0, %v2650_v61 }
 0x25f   : > { %v2772_v49 = vmax.f32 %v2740_v34, 0.0  ;;  %v2741_v2 = vadd.f32 3.0, %v2659_v36 }
 0x260   : > { %v2770_v37 = vmax.f32 %v2738_v32, 0.0  ;;  %v2739_v33 = vadd.f32 3.0, %v2651_v45 }
 0x261   : > { %v2804_v44 = vmin.f32 %v2772_v49, 6.0  ;;  %v2773_v63 = vmax.f32 %v2741_v2, 0.0 }
 0x262   : > { %v2802_v53 = vmin.f32 %v2770_v37, 6.0  ;;  %v2771_v59 = vmax.f32 %v2739_v33, 0.0 }
 0x263   : > { %v2836_v26 = vmul.f32 %v2804_v44, %v2656_v4  ;;  %v2805_v42 = vmin.f32 %v2773_v63, 6.0 }
 0x264   : > { %v2834_v35 = vmul.f32 %v2802_v53, %v2648_v55  ;;  %v2803_v38 = vmin.f32 %v2771_v59, 6.0 }
 0x265   : > { %v2868_v50 = vmul.f32 0.16666667, %v2836_v26  ;;  %v2837_v39 = vmul.f32 %v2805_v42, %v2659_v36 }
 0x266   : > { %v2866_v14 = vmul.f32 0.16666667, %v2834_v35  ;;  %v2835_v47 = vmul.f32 %v2803_v38, %v2651_v45 }
 0x267   : > { %2901 = vst.msk [vmem:[%s4648_s23 + $0x70] sm:$0xff] %vm2886_vm4, %v2868_v50  ;;  %v2869_v48 = vmul.f32 0.16666667, %v2837_v39 }
 0x268   : > { %2899 = vst.msk [vmem:[%s4648_s23 + $0x60] sm:$0xff] %vm2886_vm4, %v2866_v14  ;;  %v2867_v9 = vmul.f32 0.16666667, %v2835_v47 }
 0x269   : > { %2902 = vst.msk [vmem:[%s4648_s23 + $0x78] sm:$0xff] %vm2886_vm4, %v2869_v48 }
 0x26a   : > { %2900 = vst.msk [vmem:[%s4648_s23 + $0x68] sm:$0xff] %vm2886_vm4, %v2867_v9 }
 0x272   : > { %v3330_v23 = vpop.f32.mrb[12].mxu1 }
 0x273   : > { %v2720_v28 = vadd.f32 %v3330_v23, %v4620_v0  ;;  %v2711_v15 = vpop.f32.mrb[13].mxu1 }
 0x274   : > { %v2712_v51 = vadd.f32 %v4620_v0, %v2711_v15  ;;  %v3331_v17 = vpop.f32.mrb[14].mxu1 }
 0x275   : > { %v2756_v54 = vadd.f32 3.0, %v2720_v28  ;;  %v2723_v56 = vadd.f32 %v3331_v17, %v4620_v0  ;;  %v2714_v52 = vpop.f32.mrb[15].mxu1 }
 0x276   : > { %v2754_v57 = vadd.f32 3.0, %v2712_v51  ;;  %v2715_v27 = vadd.f32 %v4620_v0, %v2714_v52 }
 0x277   : > { %v2788_v8 = vmax.f32 %v2756_v54, 0.0  ;;  %v2757_v24 = vadd.f32 3.0, %v2723_v56 }
 0x278   : > { %v2786_v22 = vmax.f32 %v2754_v57, 0.0  ;;  %v2755_v40 = vadd.f32 3.0, %v2715_v27 }
 0x279   : > { %v2820_v58 = vmin.f32 %v2788_v8, 6.0  ;;  %v2789_v46 = vmax.f32 %v2757_v24, 0.0 }
 0x27a   : > { %v2818_v20 = vmin.f32 %v2786_v22, 6.0  ;;  %v2787_v5 = vmax.f32 %v2755_v40, 0.0 }
 0x27b   : > { %v2852_v62 = vmul.f32 %v2820_v58, %v2720_v28  ;;  %v2821_v60 = vmin.f32 %v2789_v46, 6.0 }
 0x27c   : > { %v2850_v1 = vmul.f32 %v2818_v20, %v2712_v51  ;;  %v2819_v3 = vmin.f32 %v2787_v5, 6.0 }
 0x27d   : > { %v2884_v0 = vmul.f32 0.16666667, %v2852_v62  ;;  %v2853_v7 = vmul.f32 %v2821_v60, %v2723_v56 }
 0x27e   : > { %v2882_v6 = vmul.f32 0.16666667, %v2850_v1  ;;  %v2851_v11 = vmul.f32 %v2819_v3, %v2715_v27 }
 0x27f   : > { %2917 = vst.msk [vmem:[%s4648_s23 + $0xf0] sm:$0xff] %vm2886_vm4, %v2884_v0  ;;  %v2885_v30 = vmul.f32 0.16666667, %v2853_v7 }
 0x280   : > { %2915 = vst.msk [vmem:[%s4648_s23 + $0xe0] sm:$0xff] %vm2886_vm4, %v2882_v6  ;;  %v2883_v41 = vmul.f32 0.16666667, %v2851_v11 }
 0x281   : > { %2918 = vst.msk [vmem:[%s4648_s23 + $0xf8] sm:$0xff] %vm2886_vm4, %v2885_v30 }
 0x282   : > { %2916 = vst.msk [vmem:[%s4648_s23 + $0xe8] sm:$0xff] %vm2886_vm4, %v2883_v41 }
 0x283   : > { %3420 = shalt.err (!%p3417_p3)
}
 0x284   : > { %s3421_s13 = scalar_lea.hbm %s4742_s7, 4096  ;;  %s3425_s15 = scalar_lea.hbm %s4800_s5, 8192 }
 0x285   : > { %p3422_p4 = scmp.ne.s32.totalorder %s4742_s7, %s3421_s13  ;;  %p3426_p9 = scmp.lt.u32.totalorder %s4742_s7, %s4800_s5 }
 0x286   : > { %p3427_p10 = scmp.lt.u32.totalorder %s3425_s15, %s3421_s13  ;;  %p3429_p12 = scmp.lt.u32.totalorder %s3421_s13, %s4742_s7 }
 0x287   : > { %p3423_p7 = pnand %p3422_p4, %p3542_p5 }
 0x288   : > { %p3428_p11 = por %p3427_p10, %p3426_p9 }
 0x289   : > { %p3424_p8 = pneg %p3423_p7 }
 0x28a   : > { %p3430_p13 = por %p3429_p12, %p3428_p11 }
 0x28c   : > { %p3431_p0 = pnand %p3430_p13, %p3424_p8 }
 0x28e   : > { %3434 = shalt.err (!%p3431_p0)
}
 0x28f   : > { %s3472_s23 = smov 128   ;;  %s3473_s25 = smov 8  }
 0x290   : > { %3337 = dma.vmem_to_hbm [thread:$0]  (%p3542_p5), %s4744_s26, 4096, %s4742_s7, %s4754_s22, %s3472_s23, %s3472_s23, %s3473_s25  }
 0x291 PF: > { %p3343_p1 = scmp.ge.s32.totalorder %s3469_s21, 2  ;;  %s2948_s30 = sand.u32 1, %s3457_s18  }
 0x292   : > { %s2949_s6 = scalar_lea.sflag [#allocation3], %s2948_s30 }
 0x293   : > { %p3340_p2 = pnand %p3343_p1, %p3546_p6 }
 0x295   : > { %3452 = dma.done.wait (!%p3340_p2), %s2949_s6, 4096  }
 0x296   : > { %3454 = vsyncadd (!%p3340_p2), %s2949_s6, 4294963200  ;;  %p15_p3 = scmp.ge.s32.totalorder %s3529_s24, 4   ;;  %s4803_s18 = smov %s3461_s19 }
 0x297   : > { %s4804_s19 = smov %s3465_s20  ;;  %s4805_s20 = smov %s3540_s27 }
 0x298   : > { %s4806_s21 = smov %s3529_s24  ;;  %17 = sbr.rel (!%p15_p3) target bundleno = 3 (0x3), region = 77 }
 0x29f   :  { %2954 = vsyncpa [#allocation3], 1 }
 0x2a0   :  { %2956 = vsyncpa [#allocation3 + $0x1], 1 }

</bundles_post_ra>
